<compile_context>
chip_gen: v7x
topology: tpu7x:2x2x1
jax: 0.10.0
libtpu: 0.0.40
codegen_flags: <defaults>
</compile_context>

<pallas_src>
import math

import jax
import jax.numpy as jnp
from jax.experimental import pallas as pl
from jax.experimental.pallas import tpu as pltpu

_EPS = 1e-5              # BatchNorm2d default eps
_MM_ROW_TILE = 512       # im2col rows per grid step (halve for v7x at big C)
_EW_ROW_TILE = 1024      # spatial rows per grid step for fused BN kernels


def _row_tile(m, target):
    """Largest tile dividing m, <= target, multiple of 8 (or full m)."""
    t = math.gcd(m, target)
    if t != m and t % 8 != 0:
        t = m
    return t


# --------------------------------------------------------------------------
# Kernels
# --------------------------------------------------------------------------
def _matmul_bias_kernel(x_ref, w_ref, b_ref, o_ref):
    # x: (tm, K) im2col patches, w: (K, Cout), b: (1, Cout)
    acc = jnp.dot(x_ref[...].astype(jnp.float32), w_ref[...],
                  preferred_element_type=jnp.float32)
    o_ref[...] = (acc + b_ref[...]).astype(o_ref.dtype)


def _stats_loss_kernel(x_ref, w_ref, sum_ref, sq_ref, l_ref):
    # Single sweep over the scaled activation s = w * x:
    #   per-(pair*batch, channel) sum and sum-of-squares  (for BN stats)
    #   per-(batch, channel) sum of |s_x1 - s_x2|         (cycle loss)
    # Accumulated across the ("arbitrary") grid axis.
    @pl.when(pl.program_id(0) == 0)
    def _():
        sum_ref[...] = jnp.zeros_like(sum_ref)
        sq_ref[...] = jnp.zeros_like(sq_ref)
        l_ref[...] = jnp.zeros_like(l_ref)

    s = x_ref[...].astype(jnp.float32) * w_ref[...]      # (P, T, C)
    sum_ref[...] += jnp.sum(s, axis=1)                   # (P, C)
    sq_ref[...] += jnp.sum(s * s, axis=1)                # (P, C)
    n = l_ref.shape[0]                                   # N (pair size = 2N)
    d = jnp.abs(s[:n] - s[n:])                           # (N, T, C)
    l_ref[...] += jnp.sum(d, axis=1)                     # (N, C)


def _scale_bn_relu_kernel(x_ref, ws_ref, sh_ref, o_ref):
    # z = relu((w*x - mean) * inv_std * gamma + beta) = relu(x*ws + sh)
    x = x_ref[...].astype(jnp.float32)
    o_ref[...] = jnp.maximum(x * ws_ref[...] + sh_ref[...], 0.0).astype(o_ref.dtype)


def _gap_sigmoid_kernel(x_ref, o_ref):
    # AdaptiveAvgPool2d([1,1]) + Sigmoid on a tiny tensor: x (N, S, C) -> (N, 1, C)
    x = x_ref[...].astype(jnp.float32)
    m = jnp.sum(x, axis=1, keepdims=True) * (1.0 / x.shape[1])
    o_ref[...] = jax.nn.sigmoid(m).astype(o_ref.dtype)


# --------------------------------------------------------------------------
# Gridded pallas_call wrappers
# --------------------------------------------------------------------------
def matmul_bias(x, w, b):
    # x: (M, K), w: (K, Cout), b: (Cout,)
    M, K = x.shape
    Cout = w.shape[1]
    tm = _row_tile(M, _MM_ROW_TILE)
    return pl.pallas_call(
        _matmul_bias_kernel,
        out_shape=jax.ShapeDtypeStruct((M, Cout), x.dtype),
        grid=(M // tm,),
        in_specs=[pl.BlockSpec((tm, K), lambda i: (i, 0)),
                  pl.BlockSpec((K, Cout), lambda i: (0, 0)),
                  pl.BlockSpec((1, Cout), lambda i: (0, 0))],
        out_specs=pl.BlockSpec((tm, Cout), lambda i: (i, 0)),
        compiler_params=pltpu.CompilerParams(
            dimension_semantics=("parallel",)),
    )(x, w, b.reshape(1, Cout))


def _im2col(x, stride):
    # x: (..., H, W, Cin), k=3, pad=1.  Returns ((prod(lead)*Ho*Wo, 9*Cin), Ho, Wo).
    *lead, H, W, Cin = x.shape
    Ho = (H - 1) // stride + 1
    Wo = (W - 1) // stride + 1
    xp = jnp.pad(x, [(0, 0)] * len(lead) + [(1, 1), (1, 1), (0, 0)])
    cols = []
    for kh in range(3):
        for kw in range(3):
            cols.append(xp[..., kh:kh + stride * (Ho - 1) + 1:stride,
                               kw:kw + stride * (Wo - 1) + 1:stride, :])
    patches = jnp.concatenate(cols, axis=-1)              # (..., Ho, Wo, 9*Cin)
    m = 1
    for d in lead:
        m *= d
    return patches.reshape(m * Ho * Wo, 9 * Cin), Ho, Wo


def conv3x3(x, w_oihw, b, stride=1):
    # x: (..., H, W, Cin) channels-last; w: PyTorch (Cout, Cin, 3, 3); pad=1.
    *lead, H, W, Cin = x.shape
    Cout = w_oihw.shape[0]
    w = jnp.transpose(w_oihw, (2, 3, 1, 0)).reshape(9 * Cin, Cout)
    patches, Ho, Wo = _im2col(x, stride)
    y = matmul_bias(patches, w, b)
    return y.reshape(*lead, Ho, Wo, Cout)


def gap_sigmoid(x):
    # x: (N, Hs, Ws, C) -> (N, C); tiny, single invocation.
    N, Hs, Ws, C = x.shape
    out = pl.pallas_call(
        _gap_sigmoid_kernel,
        out_shape=jax.ShapeDtypeStruct((N, 1, C), jnp.float32),
        in_specs=[pl.BlockSpec(memory_space=pltpu.MemorySpace.VMEM)],
        out_specs=pl.BlockSpec(memory_space=pltpu.MemorySpace.VMEM),
    )(x.reshape(N, Hs * Ws, C))
    return out.reshape(N, C)


def scale_loss_bn_relu(y, w_gate, gamma, beta, n_batch):
    # y: (P, HW, C) conv output (P = 2*n_batch, rows [x1-batch | x2-batch]).
    # w_gate: (n_batch, C) channel gate shared by both tensors of the pair.
    # Returns relu(bn(w*y)) with per-tensor BN stats, and mean|w*y1 - w*y2|.
    P, HW, C = y.shape
    w_p = jnp.concatenate([w_gate, w_gate], axis=0).reshape(P, 1, C)
    w_p = w_p.astype(jnp.float32)

    thw = _row_tile(HW, _EW_ROW_TILE)
    grid = (HW // thw,)

    # ---- pass 1: fused stats + cycle-loss reduction (arbitrary axis) ----
    s_sum, s_sq, l_sum = pl.pallas_call(
        _stats_loss_kernel,
        out_shape=(jax.ShapeDtypeStruct((P, C), jnp.float32),
                   jax.ShapeDtypeStruct((P, C), jnp.float32),
                   jax.ShapeDtypeStruct((n_batch, C), jnp.float32)),
        grid=grid,
        in_specs=[pl.BlockSpec((P, thw, C), lambda t: (0, t, 0)),
                  pl.BlockSpec((P, 1, C), lambda t: (0, 0, 0))],
        out_specs=(pl.BlockSpec((P, C), lambda t: (0, 0)),
                   pl.BlockSpec((P, C), lambda t: (0, 0)),
                   pl.BlockSpec((n_batch, C), lambda t: (0, 0))),
        compiler_params=pltpu.CompilerParams(
            dimension_semantics=("arbitrary",)),
    )(y, w_p)

    # Tiny (2, C) finalization of the BN affine terms (trace-time / XLA glue).
    cnt = n_batch * HW
    mean = s_sum.reshape(2, n_batch, C).sum(axis=1) / cnt          # (2, C)
    ex2 = s_sq.reshape(2, n_batch, C).sum(axis=1) / cnt
    var = ex2 - mean * mean
    inv_std = jax.lax.rsqrt(var + _EPS)
    g_scale = gamma[None, :] * inv_std                             # (2, C)
    shift = beta[None, :] - mean * g_scale                         # (2, C)
    ws = w_p * jnp.repeat(g_scale, n_batch, axis=0).reshape(P, 1, C)
    sh = jnp.repeat(shift, n_batch, axis=0).reshape(P, 1, C)

    # ---- pass 2: fused scale + normalize + ReLU (parallel axis) ----
    z = pl.pallas_call(
        _scale_bn_relu_kernel,
        out_shape=jax.ShapeDtypeStruct((P, HW, C), y.dtype),
        grid=grid,
        in_specs=[pl.BlockSpec((P, thw, C), lambda t: (0, t, 0)),
                  pl.BlockSpec((P, 1, C), lambda t: (0, 0, 0)),
                  pl.BlockSpec((P, 1, C), lambda t: (0, 0, 0))],
        out_specs=pl.BlockSpec((P, thw, C), lambda t: (0, t, 0)),
        compiler_params=pltpu.CompilerParams(
            dimension_semantics=("parallel",)),
    )(y, ws, sh)

    loss = jnp.sum(l_sum) / (cnt * C)
    return z, loss


# --------------------------------------------------------------------------
# Module forward passes
# --------------------------------------------------------------------------
def weight_learning(y1, y2, p):
    # y1, y2: (N, H, W, C).  conv(s=2) -> conv(s=2) -> GAP -> sigmoid.
    x = jnp.concatenate([y1, y2], axis=-1)                 # channel concat
    x = conv3x3(x, p['c1_w'], p['c1_b'], stride=2)
    x = conv3x3(x, p['c2_w'], p['c2_b'], stride=2)
    return gap_sigmoid(x)                                  # (N, C)


def double_conv_forward(params, x1, x2):
    # Inputs / outputs NCHW, matching the PyTorch module (training-mode BN).
    N, Cin, H, W = x1.shape
    Cout = params['c1_b'].shape[0]
    P = 2 * N
    to_nhwc = lambda t: jnp.transpose(t, (0, 2, 3, 1))
    to_nchw = lambda t: jnp.transpose(t, (0, 3, 1, 2))

    # Stack the two symmetric paths along the batch axis (shared weights).
    x = jnp.concatenate([to_nhwc(x1), to_nhwc(x2)], axis=0)      # (P, H, W, Cin)

    # conv1 on both tensors in one batched matmul
    y = conv3x3(x, params['c1_w'], params['c1_b'])               # (P, H, W, Cout)
    w1 = weight_learning(y[:N], y[N:], params['wl1'])            # (N, Cout)
    y, loss1 = scale_loss_bn_relu(y.reshape(P, H * W, Cout), w1,
                                  params['bn1_g'], params['bn1_b'], N)
    y = y.reshape(P, H, W, Cout)

    # conv2 on both tensors in one batched matmul
    y = conv3x3(y, params['c2_w'], params['c2_b'])
    w2 = weight_learning(y[:N], y[N:], params['wl2'])
    y, loss2 = scale_loss_bn_relu(y.reshape(P, H * W, Cout), w2,
                                  params['bn2_g'], params['bn2_b'], N)
    y = y.reshape(P, H, W, Cout)

    return to_nchw(y[:N]), to_nchw(y[N:]), (loss1 + loss2) / 2.0


# --------------------------------------------------------------------------
# Deterministic parameter init (shapes as in the PyTorch __init__)
# --------------------------------------------------------------------------
def init_params(key, in_ch, out_ch):
    ks = jax.random.split(key, 6)

    def w(k, shape, scale=0.1):
        return scale * jax.random.normal(k, shape, jnp.float32)

    def wl_params(k, c):
        k1, k2, k3, k4 = jax.random.split(k, 4)
        return {'c1_w': w(k1, (c, 2 * c, 3, 3)), 'c1_b': w(k2, (c,)),
                'c2_w': w(k3, (c, c, 3, 3)), 'c2_b': w(k4, (c,))}

    return {
        'c1_w': w(ks[0], (out_ch, in_ch, 3, 3)), 'c1_b': w(ks[1], (out_ch,)),
        'c2_w': w(ks[2], (out_ch, out_ch, 3, 3)), 'c2_b': w(ks[3], (out_ch,)),
        'bn1_g': jnp.ones((out_ch,), jnp.float32),
        'bn1_b': jnp.zeros((out_ch,), jnp.float32),
        'bn2_g': jnp.ones((out_ch,), jnp.float32),
        'bn2_b': jnp.zeros((out_ch,), jnp.float32),
        'wl1': wl_params(ks[4], out_ch),
        'wl2': wl_params(ks[5], out_ch),
    }


if __name__ == "__main__":
    key = jax.random.PRNGKey(0)
    kp, k1, k2 = jax.random.split(key, 3)

    in_ch, out_ch = 8, 4
    N, H, W = 2, 16, 16

    params = init_params(kp, in_ch, out_ch)
    x1 = jax.random.normal(k1, (N, in_ch, H, W), jnp.float32)
    x2 = jax.random.normal(k2, (N, in_ch, H, W), jnp.float32)

    y1, y2, loss = jax.jit(double_conv_forward)(params, x1, x2)
    jax.block_until_ready((y1, y2, loss))

    assert y1.shape == (N, out_ch, H, W)
    assert y2.shape == (N, out_ch, H, W)
    assert loss.shape == ()
    assert bool(jnp.isfinite(loss))
    print("KERNEL_OK")
</pallas_src>

<mosaic_0001>
module attributes {stable_mosaic.version = 11 : i64} {
  func.func @_matmul_bias_kernel(%arg0: i32, %arg1: memref<512x72xf32, #tpu.memory_space<vmem>>, %arg2: memref<72x4xf32, #tpu.memory_space<vmem>>, %arg3: memref<1x4xf32, #tpu.memory_space<vmem>>, %arg4: memref<512x4xf32, #tpu.memory_space<vmem>>) attributes {dimension_semantics = [#tpu.dimension_semantics<parallel>], iteration_bounds = array<i64: 2>, scalar_prefetch = 0 : i64, scratch_operands = 0 : i64, tpu.core_type = #tpu.core_type<tc>, window_params = [{transform_indices = @transform_0, window_bounds = array<i64: 512, 72>}, {pipeline_mode = #tpu.pipeline_mode<synchronous>, transform_indices = @transform_1, window_bounds = array<i64: 72, 4>}, {pipeline_mode = #tpu.pipeline_mode<synchronous>, transform_indices = @transform_2, window_bounds = array<i64: 1, 4>}, {transform_indices = @transform_3, window_bounds = array<i64: 512, 4>}]} {
    %c0 = arith.constant 0 : index
    %c0_0 = arith.constant 0 : index
    %0 = vector.load %arg1[%c0, %c0_0] : memref<512x72xf32, #tpu.memory_space<vmem>>, vector<512x72xf32>
    %c0_1 = arith.constant 0 : index
    %c0_2 = arith.constant 0 : index
    %1 = vector.load %arg2[%c0_1, %c0_2] : memref<72x4xf32, #tpu.memory_space<vmem>>, vector<72x4xf32>
    %cst = arith.constant dense<0.000000e+00> : vector<512x4xf32>
    %2 = tpu.matmul %0, %1, %cst {dimension_numbers = #tpu.dot_dimension_numbers<[1], [0], [0], [1], [0, 0, 1, 1], [], []>} : vector<512x72xf32>, vector<72x4xf32>, vector<512x4xf32> -> vector<512x4xf32>
    %c0_3 = arith.constant 0 : index
    %c0_4 = arith.constant 0 : index
    %3 = vector.load %arg3[%c0_3, %c0_4] : memref<1x4xf32, #tpu.memory_space<vmem>>, vector<1x4xf32>
    %4 = vector.broadcast %3 : vector<1x4xf32> to vector<512x4xf32>
    %5 = arith.addf %2, %4 : vector<512x4xf32>
    %c0_5 = arith.constant 0 : index
    %c0_6 = arith.constant 0 : index
    %6 = vector.load %arg4[%c0_5, %c0_6] : memref<512x4xf32, #tpu.memory_space<vmem>>, vector<512x4xf32>
    tpu.vector_store %arg4[%c0_5, %c0_6], %5 {strides = array<i32>} : memref<512x4xf32, #tpu.memory_space<vmem>>, vector<512x4xf32>,
    return
  }
  func.func @transform_0(%arg0: i32) -> (i32, i32) {
    %c0_i32 = arith.constant 0 : i32
    %c0_i32_0 = arith.constant 0 : i32
    return %arg0, %c0_i32 : i32, i32
  }
  func.func @transform_1(%arg0: i32) -> (i32, i32) {
    %c0_i32 = arith.constant 0 : i32
    %c0_i32_0 = arith.constant 0 : i32
    %c0_i32_1 = arith.constant 0 : i32
    return %c0_i32, %c0_i32_0 : i32, i32
  }
  func.func @transform_2(%arg0: i32) -> (i32, i32) {
    %c0_i32 = arith.constant 0 : i32
    %c0_i32_0 = arith.constant 0 : i32
    %c0_i32_1 = arith.constant 0 : i32
    return %c0_i32, %c0_i32_0 : i32, i32
  }
  func.func @transform_3(%arg0: i32) -> (i32, i32) {
    %c0_i32 = arith.constant 0 : i32
    %c0_i32_0 = arith.constant 0 : i32
    return %arg0, %c0_i32 : i32, i32
  }
}

module attributes {stable_mosaic.version = 11 : i64} {
  func.func @_matmul_bias_kernel(%arg0: i32, %arg1: memref<128x72xf32, #tpu.memory_space<vmem>>, %arg2: memref<72x4xf32, #tpu.memory_space<vmem>>, %arg3: memref<1x4xf32, #tpu.memory_space<vmem>>, %arg4: memref<128x4xf32, #tpu.memory_space<vmem>>) attributes {dimension_semantics = [#tpu.dimension_semantics<parallel>], iteration_bounds = array<i64: 1>, scalar_prefetch = 0 : i64, scratch_operands = 0 : i64, tpu.core_type = #tpu.core_type<tc>, window_params = [{transform_indices = @transform_0, window_bounds = array<i64: 128, 72>}, {pipeline_mode = #tpu.pipeline_mode<synchronous>, transform_indices = @transform_1, window_bounds = array<i64: 72, 4>}, {pipeline_mode = #tpu.pipeline_mode<synchronous>, transform_indices = @transform_2, window_bounds = array<i64: 1, 4>}, {transform_indices = @transform_3, window_bounds = array<i64: 128, 4>}]} {
    %c0 = arith.constant 0 : index
    %c0_0 = arith.constant 0 : index
    %0 = vector.load %arg1[%c0, %c0_0] : memref<128x72xf32, #tpu.memory_space<vmem>>, vector<128x72xf32>
    %c0_1 = arith.constant 0 : index
    %c0_2 = arith.constant 0 : index
    %1 = vector.load %arg2[%c0_1, %c0_2] : memref<72x4xf32, #tpu.memory_space<vmem>>, vector<72x4xf32>
    %cst = arith.constant dense<0.000000e+00> : vector<128x4xf32>
    %2 = tpu.matmul %0, %1, %cst {dimension_numbers = #tpu.dot_dimension_numbers<[1], [0], [0], [1], [0, 0, 1, 1], [], []>} : vector<128x72xf32>, vector<72x4xf32>, vector<128x4xf32> -> vector<128x4xf32>
    %c0_3 = arith.constant 0 : index
    %c0_4 = arith.constant 0 : index
    %3 = vector.load %arg3[%c0_3, %c0_4] : memref<1x4xf32, #tpu.memory_space<vmem>>, vector<1x4xf32>
    %4 = vector.broadcast %3 : vector<1x4xf32> to vector<128x4xf32>
    %5 = arith.addf %2, %4 : vector<128x4xf32>
    %c0_5 = arith.constant 0 : index
    %c0_6 = arith.constant 0 : index
    %6 = vector.load %arg4[%c0_5, %c0_6] : memref<128x4xf32, #tpu.memory_space<vmem>>, vector<128x4xf32>
    tpu.vector_store %arg4[%c0_5, %c0_6], %5 {strides = array<i32>} : memref<128x4xf32, #tpu.memory_space<vmem>>, vector<128x4xf32>,
    return
  }
  func.func @transform_0(%arg0: i32) -> (i32, i32) {
    %c0_i32 = arith.constant 0 : i32
    %c0_i32_0 = arith.constant 0 : i32
    return %arg0, %c0_i32 : i32, i32
  }
  func.func @transform_1(%arg0: i32) -> (i32, i32) {
    %c0_i32 = arith.constant 0 : i32
    %c0_i32_0 = arith.constant 0 : i32
    %c0_i32_1 = arith.constant 0 : i32
    return %c0_i32, %c0_i32_0 : i32, i32
  }
  func.func @transform_2(%arg0: i32) -> (i32, i32) {
    %c0_i32 = arith.constant 0 : i32
    %c0_i32_0 = arith.constant 0 : i32
    %c0_i32_1 = arith.constant 0 : i32
    return %c0_i32, %c0_i32_0 : i32, i32
  }
  func.func @transform_3(%arg0: i32) -> (i32, i32) {
    %c0_i32 = arith.constant 0 : i32
    %c0_i32_0 = arith.constant 0 : i32
    return %arg0, %c0_i32 : i32, i32
  }
}

module attributes {stable_mosaic.version = 11 : i64} {
  func.func @_matmul_bias_kernel(%arg0: i32, %arg1: memref<32x36xf32, #tpu.memory_space<vmem>>, %arg2: memref<36x4xf32, #tpu.memory_space<vmem>>, %arg3: memref<1x4xf32, #tpu.memory_space<vmem>>, %arg4: memref<32x4xf32, #tpu.memory_space<vmem>>) attributes {dimension_semantics = [#tpu.dimension_semantics<parallel>], iteration_bounds = array<i64: 1>, scalar_prefetch = 0 : i64, scratch_operands = 0 : i64, tpu.core_type = #tpu.core_type<tc>, window_params = [{transform_indices = @transform_0, window_bounds = array<i64: 32, 36>}, {pipeline_mode = #tpu.pipeline_mode<synchronous>, transform_indices = @transform_1, window_bounds = array<i64: 36, 4>}, {pipeline_mode = #tpu.pipeline_mode<synchronous>, transform_indices = @transform_2, window_bounds = array<i64: 1, 4>}, {transform_indices = @transform_3, window_bounds = array<i64: 32, 4>}]} {
    %c0 = arith.constant 0 : index
    %c0_0 = arith.constant 0 : index
    %0 = vector.load %arg1[%c0, %c0_0] : memref<32x36xf32, #tpu.memory_space<vmem>>, vector<32x36xf32>
    %c0_1 = arith.constant 0 : index
    %c0_2 = arith.constant 0 : index
    %1 = vector.load %arg2[%c0_1, %c0_2] : memref<36x4xf32, #tpu.memory_space<vmem>>, vector<36x4xf32>
    %cst = arith.constant dense<0.000000e+00> : vector<32x4xf32>
    %2 = tpu.matmul %0, %1, %cst {dimension_numbers = #tpu.dot_dimension_numbers<[1], [0], [0], [1], [0, 0, 1, 1], [], []>} : vector<32x36xf32>, vector<36x4xf32>, vector<32x4xf32> -> vector<32x4xf32>
    %c0_3 = arith.constant 0 : index
    %c0_4 = arith.constant 0 : index
    %3 = vector.load %arg3[%c0_3, %c0_4] : memref<1x4xf32, #tpu.memory_space<vmem>>, vector<1x4xf32>
    %4 = vector.broadcast %3 : vector<1x4xf32> to vector<32x4xf32>
    %5 = arith.addf %2, %4 : vector<32x4xf32>
    %c0_5 = arith.constant 0 : index
    %c0_6 = arith.constant 0 : index
    %6 = vector.load %arg4[%c0_5, %c0_6] : memref<32x4xf32, #tpu.memory_space<vmem>>, vector<32x4xf32>
    tpu.vector_store %arg4[%c0_5, %c0_6], %5 {strides = array<i32>} : memref<32x4xf32, #tpu.memory_space<vmem>>, vector<32x4xf32>,
    return
  }
  func.func @transform_0(%arg0: i32) -> (i32, i32) {
    %c0_i32 = arith.constant 0 : i32
    %c0_i32_0 = arith.constant 0 : i32
    return %arg0, %c0_i32 : i32, i32
  }
  func.func @transform_1(%arg0: i32) -> (i32, i32) {
    %c0_i32 = arith.constant 0 : i32
    %c0_i32_0 = arith.constant 0 : i32
    %c0_i32_1 = arith.constant 0 : i32
    return %c0_i32, %c0_i32_0 : i32, i32
  }
  func.func @transform_2(%arg0: i32) -> (i32, i32) {
    %c0_i32 = arith.constant 0 : i32
    %c0_i32_0 = arith.constant 0 : i32
    %c0_i32_1 = arith.constant 0 : i32
    return %c0_i32, %c0_i32_0 : i32, i32
  }
  func.func @transform_3(%arg0: i32) -> (i32, i32) {
    %c0_i32 = arith.constant 0 : i32
    %c0_i32_0 = arith.constant 0 : i32
    return %arg0, %c0_i32 : i32, i32
  }
}

module attributes {stable_mosaic.version = 11 : i64} {
  func.func @_stats_loss_kernel(%arg0: i32, %arg1: memref<4x256x4xf32, #tpu.memory_space<vmem>>, %arg2: memref<4x1x4xf32, #tpu.memory_space<vmem>>, %arg3: memref<4x4xf32, #tpu.memory_space<vmem>>, %arg4: memref<4x4xf32, #tpu.memory_space<vmem>>, %arg5: memref<2x4xf32, #tpu.memory_space<vmem>>) attributes {dimension_semantics = [#tpu.dimension_semantics<arbitrary>], iteration_bounds = array<i64: 1>, scalar_prefetch = 0 : i64, scratch_operands = 0 : i64, tpu.core_type = #tpu.core_type<tc>, window_params = [{transform_indices = @transform_0, window_bounds = array<i64: 4, 256, 4>}, {pipeline_mode = #tpu.pipeline_mode<synchronous>, transform_indices = @transform_1, window_bounds = array<i64: 4, 1, 4>}, {pipeline_mode = #tpu.pipeline_mode<synchronous>, transform_indices = @transform_2, window_bounds = array<i64: 4, 4>}, {pipeline_mode = #tpu.pipeline_mode<synchronous>, transform_indices = @transform_3, window_bounds = array<i64: 4, 4>}, {pipeline_mode = #tpu.pipeline_mode<synchronous>, transform_indices = @transform_4, window_bounds = array<i64: 2, 4>}]} {
    %c0_i32 = arith.constant 0 : i32
    %0 = arith.cmpi eq, %arg0, %c0_i32 : i32
    %1 = arith.extui %0 : i1 to i32
    %c0_i32_0 = arith.constant 0 : i32
    %2 = arith.cmpi ne, %1, %c0_i32_0 : i32
    scf.if %2 {
      %cst_20 = arith.constant 0.000000e+00 : f32
      %24 = vector.broadcast %cst_20 : f32 to vector<4x4xf32>
      %c0_21 = arith.constant 0 : index
      %c0_22 = arith.constant 0 : index
      %25 = vector.load %arg3[%c0_21, %c0_22] : memref<4x4xf32, #tpu.memory_space<vmem>>, vector<4x4xf32>
      tpu.vector_store %arg3[%c0_21, %c0_22], %24 {strides = array<i32>} : memref<4x4xf32, #tpu.memory_space<vmem>>, vector<4x4xf32>,
      %cst_23 = arith.constant 0.000000e+00 : f32
      %26 = vector.broadcast %cst_23 : f32 to vector<4x4xf32>
      %c0_24 = arith.constant 0 : index
      %c0_25 = arith.constant 0 : index
      %27 = vector.load %arg4[%c0_24, %c0_25] : memref<4x4xf32, #tpu.memory_space<vmem>>, vector<4x4xf32>
      tpu.vector_store %arg4[%c0_24, %c0_25], %26 {strides = array<i32>} : memref<4x4xf32, #tpu.memory_space<vmem>>, vector<4x4xf32>,
      %cst_26 = arith.constant 0.000000e+00 : f32
      %28 = vector.broadcast %cst_26 : f32 to vector<2x4xf32>
      %c0_27 = arith.constant 0 : index
      %c0_28 = arith.constant 0 : index
      %29 = vector.load %arg5[%c0_27, %c0_28] : memref<2x4xf32, #tpu.memory_space<vmem>>, vector<2x4xf32>
      tpu.vector_store %arg5[%c0_27, %c0_28], %28 {strides = array<i32>} : memref<2x4xf32, #tpu.memory_space<vmem>>, vector<2x4xf32>,
    } else {
    }
    %c0 = arith.constant 0 : index
    %c0_1 = arith.constant 0 : index
    %c0_2 = arith.constant 0 : index
    %3 = vector.load %arg1[%c0, %c0_1, %c0_2] : memref<4x256x4xf32, #tpu.memory_space<vmem>>, vector<4x256x4xf32>
    %c0_3 = arith.constant 0 : index
    %c0_4 = arith.constant 0 : index
    %c0_5 = arith.constant 0 : index
    %4 = vector.load %arg2[%c0_3, %c0_4, %c0_5] : memref<4x1x4xf32, #tpu.memory_space<vmem>>, vector<4x1x4xf32>
    %5 = vector.broadcast %4 : vector<4x1x4xf32> to vector<4x256x4xf32>
    %6 = arith.mulf %3, %5 : vector<4x256x4xf32>
    %c0_6 = arith.constant 0 : index
    %c0_7 = arith.constant 0 : index
    %7 = vector.load %arg3[%c0_6, %c0_7] : memref<4x4xf32, #tpu.memory_space<vmem>>, vector<4x4xf32>
    %cst = arith.constant dense<0.000000e+00> : vector<4x4xf32>
    %8 = vector.multi_reduction <add>, %6, %cst [1] : vector<4x256x4xf32> to vector<4x4xf32>
    %9 = arith.addf %7, %8 : vector<4x4xf32>
    %c0_8 = arith.constant 0 : index
    %c0_9 = arith.constant 0 : index
    %10 = vector.load %arg3[%c0_8, %c0_9] : memref<4x4xf32, #tpu.memory_space<vmem>>, vector<4x4xf32>
    tpu.vector_store %arg3[%c0_8, %c0_9], %9 {strides = array<i32>} : memref<4x4xf32, #tpu.memory_space<vmem>>, vector<4x4xf32>,
    %c0_10 = arith.constant 0 : index
    %c0_11 = arith.constant 0 : index
    %11 = vector.load %arg4[%c0_10, %c0_11] : memref<4x4xf32, #tpu.memory_space<vmem>>, vector<4x4xf32>
    %12 = arith.mulf %6, %6 : vector<4x256x4xf32>
    %cst_12 = arith.constant dense<0.000000e+00> : vector<4x4xf32>
    %13 = vector.multi_reduction <add>, %12, %cst_12 [1] : vector<4x256x4xf32> to vector<4x4xf32>
    %14 = arith.addf %11, %13 : vector<4x4xf32>
    %c0_13 = arith.constant 0 : index
    %c0_14 = arith.constant 0 : index
    %15 = vector.load %arg4[%c0_13, %c0_14] : memref<4x4xf32, #tpu.memory_space<vmem>>, vector<4x4xf32>
    tpu.vector_store %arg4[%c0_13, %c0_14], %14 {strides = array<i32>} : memref<4x4xf32, #tpu.memory_space<vmem>>, vector<4x4xf32>,
    %16 = vector.extract_strided_slice %6 {offsets = [0, 0, 0], sizes = [2, 256, 4], strides = [1, 1, 1]} : vector<4x256x4xf32> to vector<2x256x4xf32>
    %17 = vector.extract_strided_slice %6 {offsets = [2, 0, 0], sizes = [2, 256, 4], strides = [1, 1, 1]} : vector<4x256x4xf32> to vector<2x256x4xf32>
    %18 = arith.subf %16, %17 : vector<2x256x4xf32>
    %19 = math.absf %18 : vector<2x256x4xf32>
    %c0_15 = arith.constant 0 : index
    %c0_16 = arith.constant 0 : index
    %20 = vector.load %arg5[%c0_15, %c0_16] : memref<2x4xf32, #tpu.memory_space<vmem>>, vector<2x4xf32>
    %cst_17 = arith.constant dense<0.000000e+00> : vector<2x4xf32>
    %21 = vector.multi_reduction <add>, %19, %cst_17 [1] : vector<2x256x4xf32> to vector<2x4xf32>
    %22 = arith.addf %20, %21 : vector<2x4xf32>
    %c0_18 = arith.constant 0 : index
    %c0_19 = arith.constant 0 : index
    %23 = vector.load %arg5[%c0_18, %c0_19] : memref<2x4xf32, #tpu.memory_space<vmem>>, vector<2x4xf32>
    tpu.vector_store %arg5[%c0_18, %c0_19], %22 {strides = array<i32>} : memref<2x4xf32, #tpu.memory_space<vmem>>, vector<2x4xf32>,
    return
  }
  func.func @transform_0(%arg0: i32) -> (i32, i32, i32) {
    %c0_i32 = arith.constant 0 : i32
    %c0_i32_0 = arith.constant 0 : i32
    %c0_i32_1 = arith.constant 0 : i32
    return %c0_i32, %arg0, %c0_i32_0 : i32, i32, i32
  }
  func.func @transform_1(%arg0: i32) -> (i32, i32, i32) {
    %c0_i32 = arith.constant 0 : i32
    %c0_i32_0 = arith.constant 0 : i32
    %c0_i32_1 = arith.constant 0 : i32
    %c0_i32_2 = arith.constant 0 : i32
    return %c0_i32, %c0_i32_0, %c0_i32_1 : i32, i32, i32
  }
  func.func @transform_2(%arg0: i32) -> (i32, i32) {
    %c0_i32 = arith.constant 0 : i32
    %c0_i32_0 = arith.constant 0 : i32
    %c0_i32_1 = arith.constant 0 : i32
    return %c0_i32, %c0_i32_0 : i32, i32
  }
  func.func @transform_3(%arg0: i32) -> (i32, i32) {
    %c0_i32 = arith.constant 0 : i32
    %c0_i32_0 = arith.constant 0 : i32
    %c0_i32_1 = arith.constant 0 : i32
    return %c0_i32, %c0_i32_0 : i32, i32
  }
  func.func @transform_4(%arg0: i32) -> (i32, i32) {
    %c0_i32 = arith.constant 0 : i32
    %c0_i32_0 = arith.constant 0 : i32
    %c0_i32_1 = arith.constant 0 : i32
    return %c0_i32, %c0_i32_0 : i32, i32
  }
}

module attributes {stable_mosaic.version = 11 : i64} {
  func.func @_gap_sigmoid_kernel(%arg0: memref<2x16x4xf32, #tpu.memory_space<vmem>>, %arg1: memref<2x1x4xf32, #tpu.memory_space<vmem>>) attributes {dimension_semantics = [], scalar_prefetch = 0 : i64, scratch_operands = 0 : i64, tpu.core_type = #tpu.core_type<tc>} {
    %c0 = arith.constant 0 : index
    %c0_0 = arith.constant 0 : index
    %c0_1 = arith.constant 0 : index
    %0 = vector.load %arg0[%c0, %c0_0, %c0_1] : memref<2x16x4xf32, #tpu.memory_space<vmem>>, vector<2x16x4xf32>
    %cst = arith.constant dense<0.000000e+00> : vector<2x4xf32>
    %1 = vector.multi_reduction <add>, %0, %cst [1] : vector<2x16x4xf32> to vector<2x4xf32>
    %2 = vector.shape_cast %1 : vector<2x4xf32> to vector<2x1x4xf32>
    %cst_2 = arith.constant 6.250000e-02 : f32
    %3 = vector.broadcast %cst_2 : f32 to vector<2x1x4xf32>
    %4 = arith.mulf %2, %3 : vector<2x1x4xf32>
    %5 = arith.negf %4 : vector<2x1x4xf32>
    %6 = math.exp %5 : vector<2x1x4xf32>
    %cst_3 = arith.constant 1.000000e+00 : f32
    %7 = vector.broadcast %cst_3 : f32 to vector<2x1x4xf32>
    %8 = arith.addf %7, %6 : vector<2x1x4xf32>
    %9 = arith.divf %7, %8 : vector<2x1x4xf32>
    %c0_4 = arith.constant 0 : index
    %c0_5 = arith.constant 0 : index
    %c0_6 = arith.constant 0 : index
    %10 = vector.load %arg1[%c0_4, %c0_5, %c0_6] : memref<2x1x4xf32, #tpu.memory_space<vmem>>, vector<2x1x4xf32>
    tpu.vector_store %arg1[%c0_4, %c0_5, %c0_6], %9 {strides = array<i32>} : memref<2x1x4xf32, #tpu.memory_space<vmem>>, vector<2x1x4xf32>,
    return
  }
}

module attributes {stable_mosaic.version = 11 : i64} {
  func.func @_scale_bn_relu_kernel(%arg0: i32, %arg1: memref<4x256x4xf32, #tpu.memory_space<vmem>>, %arg2: memref<4x1x4xf32, #tpu.memory_space<vmem>>, %arg3: memref<4x1x4xf32, #tpu.memory_space<vmem>>, %arg4: memref<4x256x4xf32, #tpu.memory_space<vmem>>) attributes {dimension_semantics = [#tpu.dimension_semantics<parallel>], iteration_bounds = array<i64: 1>, scalar_prefetch = 0 : i64, scratch_operands = 0 : i64, tpu.core_type = #tpu.core_type<tc>, window_params = [{transform_indices = @transform_0, window_bounds = array<i64: 4, 256, 4>}, {pipeline_mode = #tpu.pipeline_mode<synchronous>, transform_indices = @transform_1, window_bounds = array<i64: 4, 1, 4>}, {pipeline_mode = #tpu.pipeline_mode<synchronous>, transform_indices = @transform_2, window_bounds = array<i64: 4, 1, 4>}, {transform_indices = @transform_3, window_bounds = array<i64: 4, 256, 4>}]} {
    %c0 = arith.constant 0 : index
    %c0_0 = arith.constant 0 : index
    %c0_1 = arith.constant 0 : index
    %0 = vector.load %arg1[%c0, %c0_0, %c0_1] : memref<4x256x4xf32, #tpu.memory_space<vmem>>, vector<4x256x4xf32>
    %c0_2 = arith.constant 0 : index
    %c0_3 = arith.constant 0 : index
    %c0_4 = arith.constant 0 : index
    %1 = vector.load %arg2[%c0_2, %c0_3, %c0_4] : memref<4x1x4xf32, #tpu.memory_space<vmem>>, vector<4x1x4xf32>
    %2 = vector.broadcast %1 : vector<4x1x4xf32> to vector<4x256x4xf32>
    %3 = arith.mulf %0, %2 : vector<4x256x4xf32>
    %c0_5 = arith.constant 0 : index
    %c0_6 = arith.constant 0 : index
    %c0_7 = arith.constant 0 : index
    %4 = vector.load %arg3[%c0_5, %c0_6, %c0_7] : memref<4x1x4xf32, #tpu.memory_space<vmem>>, vector<4x1x4xf32>
    %5 = vector.broadcast %4 : vector<4x1x4xf32> to vector<4x256x4xf32>
    %6 = arith.addf %3, %5 : vector<4x256x4xf32>
    %cst = arith.constant 0.000000e+00 : f32
    %7 = vector.broadcast %cst : f32 to vector<4x256x4xf32>
    %8 = arith.maximumf %6, %7 : vector<4x256x4xf32>
    %c0_8 = arith.constant 0 : index
    %c0_9 = arith.constant 0 : index
    %c0_10 = arith.constant 0 : index
    %9 = vector.load %arg4[%c0_8, %c0_9, %c0_10] : memref<4x256x4xf32, #tpu.memory_space<vmem>>, vector<4x256x4xf32>
    tpu.vector_store %arg4[%c0_8, %c0_9, %c0_10], %8 {strides = array<i32>} : memref<4x256x4xf32, #tpu.memory_space<vmem>>, vector<4x256x4xf32>,
    return
  }
  func.func @transform_0(%arg0: i32) -> (i32, i32, i32) {
    %c0_i32 = arith.constant 0 : i32
    %c0_i32_0 = arith.constant 0 : i32
    %c0_i32_1 = arith.constant 0 : i32
    return %c0_i32, %arg0, %c0_i32_0 : i32, i32, i32
  }
  func.func @transform_1(%arg0: i32) -> (i32, i32, i32) {
    %c0_i32 = arith.constant 0 : i32
    %c0_i32_0 = arith.constant 0 : i32
    %c0_i32_1 = arith.constant 0 : i32
    %c0_i32_2 = arith.constant 0 : i32
    return %c0_i32, %c0_i32_0, %c0_i32_1 : i32, i32, i32
  }
  func.func @transform_2(%arg0: i32) -> (i32, i32, i32) {
    %c0_i32 = arith.constant 0 : i32
    %c0_i32_0 = arith.constant 0 : i32
    %c0_i32_1 = arith.constant 0 : i32
    %c0_i32_2 = arith.constant 0 : i32
    return %c0_i32, %c0_i32_0, %c0_i32_1 : i32, i32, i32
  }
  func.func @transform_3(%arg0: i32) -> (i32, i32, i32) {
    %c0_i32 = arith.constant 0 : i32
    %c0_i32_0 = arith.constant 0 : i32
    %c0_i32_1 = arith.constant 0 : i32
    return %c0_i32, %arg0, %c0_i32_0 : i32, i32, i32
  }
}

module attributes {stable_mosaic.version = 11 : i64} {
  func.func @_matmul_bias_kernel(%arg0: i32, %arg1: memref<512x36xf32, #tpu.memory_space<vmem>>, %arg2: memref<36x4xf32, #tpu.memory_space<vmem>>, %arg3: memref<1x4xf32, #tpu.memory_space<vmem>>, %arg4: memref<512x4xf32, #tpu.memory_space<vmem>>) attributes {dimension_semantics = [#tpu.dimension_semantics<parallel>], iteration_bounds = array<i64: 2>, scalar_prefetch = 0 : i64, scratch_operands = 0 : i64, tpu.core_type = #tpu.core_type<tc>, window_params = [{transform_indices = @transform_0, window_bounds = array<i64: 512, 36>}, {pipeline_mode = #tpu.pipeline_mode<synchronous>, transform_indices = @transform_1, window_bounds = array<i64: 36, 4>}, {pipeline_mode = #tpu.pipeline_mode<synchronous>, transform_indices = @transform_2, window_bounds = array<i64: 1, 4>}, {transform_indices = @transform_3, window_bounds = array<i64: 512, 4>}]} {
    %c0 = arith.constant 0 : index
    %c0_0 = arith.constant 0 : index
    %0 = vector.load %arg1[%c0, %c0_0] : memref<512x36xf32, #tpu.memory_space<vmem>>, vector<512x36xf32>
    %c0_1 = arith.constant 0 : index
    %c0_2 = arith.constant 0 : index
    %1 = vector.load %arg2[%c0_1, %c0_2] : memref<36x4xf32, #tpu.memory_space<vmem>>, vector<36x4xf32>
    %cst = arith.constant dense<0.000000e+00> : vector<512x4xf32>
    %2 = tpu.matmul %0, %1, %cst {dimension_numbers = #tpu.dot_dimension_numbers<[1], [0], [0], [1], [0, 0, 1, 1], [], []>} : vector<512x36xf32>, vector<36x4xf32>, vector<512x4xf32> -> vector<512x4xf32>
    %c0_3 = arith.constant 0 : index
    %c0_4 = arith.constant 0 : index
    %3 = vector.load %arg3[%c0_3, %c0_4] : memref<1x4xf32, #tpu.memory_space<vmem>>, vector<1x4xf32>
    %4 = vector.broadcast %3 : vector<1x4xf32> to vector<512x4xf32>
    %5 = arith.addf %2, %4 : vector<512x4xf32>
    %c0_5 = arith.constant 0 : index
    %c0_6 = arith.constant 0 : index
    %6 = vector.load %arg4[%c0_5, %c0_6] : memref<512x4xf32, #tpu.memory_space<vmem>>, vector<512x4xf32>
    tpu.vector_store %arg4[%c0_5, %c0_6], %5 {strides = array<i32>} : memref<512x4xf32, #tpu.memory_space<vmem>>, vector<512x4xf32>,
    return
  }
  func.func @transform_0(%arg0: i32) -> (i32, i32) {
    %c0_i32 = arith.constant 0 : i32
    %c0_i32_0 = arith.constant 0 : i32
    return %arg0, %c0_i32 : i32, i32
  }
  func.func @transform_1(%arg0: i32) -> (i32, i32) {
    %c0_i32 = arith.constant 0 : i32
    %c0_i32_0 = arith.constant 0 : i32
    %c0_i32_1 = arith.constant 0 : i32
    return %c0_i32, %c0_i32_0 : i32, i32
  }
  func.func @transform_2(%arg0: i32) -> (i32, i32) {
    %c0_i32 = arith.constant 0 : i32
    %c0_i32_0 = arith.constant 0 : i32
    %c0_i32_1 = arith.constant 0 : i32
    return %c0_i32, %c0_i32_0 : i32, i32
  }
  func.func @transform_3(%arg0: i32) -> (i32, i32) {
    %c0_i32 = arith.constant 0 : i32
    %c0_i32_0 = arith.constant 0 : i32
    return %arg0, %c0_i32 : i32, i32
  }
}

</mosaic_0001>

<bundles_post_ra>
// kernel: double_conv_forward.12
= control target key start
LH: loop header
LB: loop body
LE: loop exit
PB: predicated region body
PF: predicated region fallthrough
CT: control target
= control target key end

     0   :  { %s1278_s12 = smov 0   ;;  %s1658_s0 = inlined_call_operand.vmem [shape: f32[1024,72], index: 0, kind: input, shape index: {}]   ;;  %s1659_s1 = inlined_call_operand.vmem [shape: f32[72,4], index: 1, kind: input, shape index: {}]   ;;  %s1660_s2 = inlined_call_operand.vmem [shape: f32[1,4], index: 2, kind: input, shape index: {}]   ;;  %s1661_s3 = inlined_call_operand.vmem [shape: f32[1024,4], index: 3, kind: output, shape index: {}]  }
   0x1 LB: > { %s953_s13 = sadd.s32 4294967295, %s1256_s12   ;;  %p957_p0 = scmp.ge.s32.totalorder %s1256_s12, 1  ;;  %s1256_s12 = sphi %s1278_s12, %s13_s12  }
   0x2   : > { %p138_p1 = scmp.lt.s32.totalorder %s1256_s12, 3 }
   0x4   : > { %p139_p2 = pnand %p957_p0, %p138_p1 }
   0x5   : > { %v238_v0 = vld [vmem:[%s1659_s1] sm:$0xff] (!%p139_p2)  ;;  %v239_v1 = vld [vmem:[%s1659_s1 + $0x8] sm:$0xff] (!%p139_p2)  ;;  %v240_v2 = vld [vmem:[%s1659_s1 + $0x10] sm:$0xff] (!%p139_p2)  ;;  %s958_s20 = sshll.u32 (!%p139_p2), %s953_s13, 6  ;;  %vm254_vm0 = vcmask (!%p139_p2), 588800   ;;  %vm832_vm1 = vcmask (!%p139_p2), 31744  }
   0x6   : > { %142 = sbr.rel (%p139_p2) target bundleno = 303 (0x12f), region = 32  ;;  %v1216_v3 = vpack.c.bf16 (!%p139_p2), %v239_v1, %v238_v0  ;;  %v241_v4 = vld [vmem:[%s1659_s1 + $0x18] sm:$0xff] (!%p139_p2)  ;;  %p163_p3 = scmp.lt.s32.totalorder (!%p139_p2), %s958_s20, 127  ;;  %v242_v6 = vld [vmem:[%s1659_s1 + $0x20] sm:$0xff] (!%p139_p2)  ;;  %v243_v7 = vld [vmem:[%s1659_s1 + $0x28] sm:$0xff] (!%p139_p2) }
   0x7   : > { %v1220_v5 = vpack.c.bf16 (!%p139_p2), %v241_v4, %v240_v2  ;;  %v1224_v8 = vpack.c.bf16 (!%p139_p2), %v243_v7, %v242_v6  ;;  %v244_v9 = vld [vmem:[%s1659_s1 + $0x30] sm:$0xff] (!%p139_p2)  ;;  %v245_v10 = vld [vmem:[%s1659_s1 + $0x38] sm:$0xff] (!%p139_p2)  ;;  %v246_v14 = vld [vmem:[%s1659_s1 + $0x40] sm:$0xff] (!%p139_p2) }
   0x8   : > { %1217 = vmatprep.subr.bf16.mxu0 (!%p139_p2), %v1216_v3  ;;  %1232 = vmatprep.subr.bf16.mxu1 (!%p139_p2), %v1216_v3  ;;  %v1228_v13 = vpack.c.bf16 (!%p139_p2), %v245_v10, %v244_v9 }
   0x9   : > { %1219 = vmatpush3.bf16.msra.mxu0 (!%p139_p2), %v1216_v3  ;;  %1237 = vmatpush3.bf16.msra.mxu1 (!%p139_p2), %v1216_v3 }
   0xa   : > { %1221 = vmatprep.subr.bf16.mxu0 (!%p139_p2), %v1220_v5  ;;  %1233 = vmatprep.subr.bf16.mxu1 (!%p139_p2), %v1220_v5 }
   0xd   : > { %s1663_s20 = smov (!%p163_p3, %s958_s20), 127  ;;  %1223 = vmatpush3.bf16.msra.mxu0 %v1220_v5  ;;  %1238 = vmatpush3.bf16.msra.mxu1 %v1220_v5 }
   0xe   : > { %s959_s27 = sshll.u32 %s1663_s20, 3  ;;  %1225 = vmatprep.subr.bf16.mxu0 %v1224_v8  ;;  %1234 = vmatprep.subr.bf16.mxu1 %v1224_v8 }
   0xf   : > { %s1318_s7 = scalar_lea.vmem %s1658_s0, %s959_s27  ;;  %s1461_s15 = scalar_lea.vmem %s1661_s3, %s959_s27 }
  0x10   : > { %v174_v11 = vld [vmem:[%s1318_s7] sm:$0xff]  ;;  %v175_v15 = vld [vmem:[%s1318_s7 + $0x8] sm:$0xff]  ;;  %v176_v17 = vld [vmem:[%s1318_s7 + $0x10] sm:$0xff] }
  0x11   : > { %v206_v12 = vld [vmem:[%s1318_s7 + $0x100] sm:$0xff]  ;;  %1120 = vmatprep.mubr.msk.f32.mxu0 %vm254_vm0, %v174_v11  ;;  %1227 = vmatpush3.bf16.msra.mxu0 %v1224_v8  ;;  %v207_v16 = vld [vmem:[%s1318_s7 + $0x108] sm:$0xff]  ;;  %v208_v18 = vld [vmem:[%s1318_s7 + $0x110] sm:$0xff] }
  0x12   : > { %1168 = vmatprep.mubr.msk.f32.mxu1 %vm254_vm0, %v206_v12  ;;  %1239 = vmatpush3.bf16.msra.mxu1 %v1224_v8  ;;  %v177_v19 = vld [vmem:[%s1318_s7 + $0x18] sm:$0xff]  ;;  %v178_v21 = vld [vmem:[%s1318_s7 + $0x20] sm:$0xff]  ;;  %v179_v23 = vld [vmem:[%s1318_s7 + $0x28] sm:$0xff] }
  0x13   : > { %1229 = vmatprep.subr.bf16.mxu0 %v1228_v13  ;;  %1235 = vmatprep.subr.bf16.mxu1 %v1228_v13  ;;  %v209_v20 = vld [vmem:[%s1318_s7 + $0x118] sm:$0xff]  ;;  %v210_v22 = vld [vmem:[%s1318_s7 + $0x120] sm:$0xff]  ;;  %v211_v24 = vld [vmem:[%s1318_s7 + $0x128] sm:$0xff] }
  0x14   : > { %v180_v25 = vld [vmem:[%s1318_s7 + $0x30] sm:$0xff]  ;;  %v181_v27 = vld [vmem:[%s1318_s7 + $0x38] sm:$0xff]  ;;  %v182_v29 = vld [vmem:[%s1318_s7 + $0x40] sm:$0xff] }
  0x15   : > { %1231 = vmatpush3.bf16.msra.mxu0 %v1228_v13  ;;  %v212_v26 = vld [vmem:[%s1318_s7 + $0x130] sm:$0xff]  ;;  %v213_v28 = vld [vmem:[%s1318_s7 + $0x138] sm:$0xff]  ;;  %v214_v30 = vld [vmem:[%s1318_s7 + $0x140] sm:$0xff] }
  0x16   : > { %1240 = vmatpush3.bf16.msra.mxu1 %v1228_v13  ;;  %1118 = vmatprep.subr.mxu0 %v246_v14  ;;  %v183_v31 = vld [vmem:[%s1318_s7 + $0x48] sm:$0xff]  ;;  %v184_v33 = vld [vmem:[%s1318_s7 + $0x50] sm:$0xff]  ;;  %v185_v35 = vld [vmem:[%s1318_s7 + $0x58] sm:$0xff] }
  0x17   : > { %1236 = vmatprep.subr.mxu1 %v246_v14  ;;  %v215_v32 = vld [vmem:[%s1318_s7 + $0x148] sm:$0xff]  ;;  %v216_v34 = vld [vmem:[%s1318_s7 + $0x150] sm:$0xff]  ;;  %v217_v36 = vld [vmem:[%s1318_s7 + $0x158] sm:$0xff] }
  0x18   : > { %v186_v37 = vld [vmem:[%s1318_s7 + $0x60] sm:$0xff]  ;;  %v187_v39 = vld [vmem:[%s1318_s7 + $0x68] sm:$0xff]  ;;  %v188_v41 = vld [vmem:[%s1318_s7 + $0x70] sm:$0xff] }
  0x19   : > { %1119 = vmatpush3.msra.mxu0 %v246_v14  ;;  %v218_v38 = vld [vmem:[%s1318_s7 + $0x160] sm:$0xff]  ;;  %v219_v40 = vld [vmem:[%s1318_s7 + $0x168] sm:$0xff]  ;;  %v220_v42 = vld [vmem:[%s1318_s7 + $0x170] sm:$0xff] }
  0x1a   : > { %1241 = vmatpush3.msra.mxu1 %v246_v14  ;;  %1121 = vmatmul.mubr.msk.f32.vlgmr.msra.gmra.mrb[0].mxu0 %vm254_vm0, %v175_v15  ;;  %v189_v43 = vld [vmem:[%s1318_s7 + $0x78] sm:$0xff]  ;;  %v190_v45 = vld [vmem:[%s1318_s7 + $0x80] sm:$0xff]  ;;  %v191_v47 = vld [vmem:[%s1318_s7 + $0x88] sm:$0xff] }
  0x1b   : > { %1169 = vmatmul.mubr.msk.f32.vlgmr.msra.gmra.mrb[0].mxu1 %vm254_vm0, %v207_v16  ;;  %1123 = vmatprep.mubr.msk.f32.mxu0 %vm254_vm0, %v176_v17  ;;  %v221_v44 = vld [vmem:[%s1318_s7 + $0x178] sm:$0xff]  ;;  %v222_v46 = vld [vmem:[%s1318_s7 + $0x180] sm:$0xff]  ;;  %v223_v48 = vld [vmem:[%s1318_s7 + $0x188] sm:$0xff] }
  0x1c   : > { %1171 = vmatprep.mubr.msk.f32.mxu1 %vm254_vm0, %v208_v18  ;;  %v192_v49 = vld [vmem:[%s1318_s7 + $0x90] sm:$0xff]  ;;  %v193_v51 = vld [vmem:[%s1318_s7 + $0x98] sm:$0xff]  ;;  %v194_v53 = vld [vmem:[%s1318_s7 + $0xa0] sm:$0xff] }
  0x1d   : > { %v224_v50 = vld [vmem:[%s1318_s7 + $0x190] sm:$0xff]  ;;  %v225_v52 = vld [vmem:[%s1318_s7 + $0x198] sm:$0xff]  ;;  %v226_v54 = vld [vmem:[%s1318_s7 + $0x1a0] sm:$0xff] }
  0x1e   : > { %1124 = vmatmul.mubr.msk.f32.gmra.mrb[2].mxu0 %vm254_vm0, %v177_v19  ;;  %v195_v55 = vld [vmem:[%s1318_s7 + $0xa8] sm:$0xff]  ;;  %v196_v57 = vld [vmem:[%s1318_s7 + $0xb0] sm:$0xff]  ;;  %v197_v59 = vld [vmem:[%s1318_s7 + $0xb8] sm:$0xff] }
  0x1f   : > { %1172 = vmatmul.mubr.msk.f32.gmra.mrb[2].mxu1 %vm254_vm0, %v209_v20  ;;  %1126 = vmatprep.mubr.msk.f32.mxu0 %vm254_vm0, %v178_v21  ;;  %v227_v56 = vld [vmem:[%s1318_s7 + $0x1a8] sm:$0xff]  ;;  %v228_v58 = vld [vmem:[%s1318_s7 + $0x1b0] sm:$0xff]  ;;  %v229_v60 = vld [vmem:[%s1318_s7 + $0x1b8] sm:$0xff] }
  0x20   : > { %1174 = vmatprep.mubr.msk.f32.mxu1 %vm254_vm0, %v210_v22  ;;  %v198_v61 = vld [vmem:[%s1318_s7 + $0xc0] sm:$0xff]  ;;  %v199_v63 = vld [vmem:[%s1318_s7 + $0xc8] sm:$0xff]  ;;  %v200_v1 = vld [vmem:[%s1318_s7 + $0xd0] sm:$0xff] }
  0x21   : > { %v230_v62 = vld [vmem:[%s1318_s7 + $0x1c0] sm:$0xff]  ;;  %v231_v0 = vld [vmem:[%s1318_s7 + $0x1c8] sm:$0xff]  ;;  %v232_v2 = vld [vmem:[%s1318_s7 + $0x1d0] sm:$0xff] }
  0x22   : > { %1127 = vmatmul.mubr.msk.f32.gmra.mrb[4].mxu0 %vm254_vm0, %v179_v23  ;;  %v201_v3 = vld [vmem:[%s1318_s7 + $0xd8] sm:$0xff]  ;;  %v202_v5 = vld [vmem:[%s1318_s7 + $0xe0] sm:$0xff]  ;;  %v203_v7 = vld [vmem:[%s1318_s7 + $0xe8] sm:$0xff] }
  0x23   : > { %1175 = vmatmul.mubr.msk.f32.gmra.mrb[4].mxu1 %vm254_vm0, %v211_v24  ;;  %1129 = vmatprep.mubr.msk.f32.mxu0 %vm254_vm0, %v180_v25  ;;  %v233_v4 = vld [vmem:[%s1318_s7 + $0x1d8] sm:$0xff]  ;;  %v234_v6 = vld [vmem:[%s1318_s7 + $0x1e0] sm:$0xff]  ;;  %v235_v8 = vld [vmem:[%s1318_s7 + $0x1e8] sm:$0xff] }
  0x24   : > { %1177 = vmatprep.mubr.msk.f32.mxu1 %vm254_vm0, %v212_v26  ;;  %v204_v9 = vld [vmem:[%s1318_s7 + $0xf0] sm:$0xff]  ;;  %v205_v11 = vld [vmem:[%s1318_s7 + $0xf8] sm:$0xff]  ;;  %v1454_v13 = vld [vmem:[%s1660_s2] ss:$0 sm:$0xff] }
  0x25   : > { %v236_v10 = vld [vmem:[%s1318_s7 + $0x1f0] sm:$0xff]  ;;  %v237_v12 = vld [vmem:[%s1318_s7 + $0x1f8] sm:$0xff] }
  0x26   : > { %1130 = vmatmul.mubr.msk.f32.gmra.mrb[6].mxu0 %vm254_vm0, %v181_v27 }
  0x27   : > { %1178 = vmatmul.mubr.msk.f32.gmra.mrb[6].mxu1 %vm254_vm0, %v213_v28  ;;  %1132 = vmatprep.mubr.msk.f32.mxu0 %vm254_vm0, %v182_v29 }
  0x28   : > { %1180 = vmatprep.mubr.msk.f32.mxu1 %vm254_vm0, %v214_v30 }
  0x2a   : > { %1133 = vmatmul.mubr.msk.f32.gmra.mrb[8].mxu0 %vm254_vm0, %v183_v31 }
  0x2b   : > { %1181 = vmatmul.mubr.msk.f32.gmra.mrb[8].mxu1 %vm254_vm0, %v215_v32  ;;  %1135 = vmatprep.mubr.msk.f32.mxu0 %vm254_vm0, %v184_v33 }
  0x2c   : > { %1183 = vmatprep.mubr.msk.f32.mxu1 %vm254_vm0, %v216_v34 }
  0x2e   : > { %1136 = vmatmul.mubr.msk.f32.gmra.mrb[10].mxu0 %vm254_vm0, %v185_v35 }
  0x2f   : > { %1184 = vmatmul.mubr.msk.f32.gmra.mrb[10].mxu1 %vm254_vm0, %v217_v36  ;;  %1138 = vmatprep.mubr.msk.f32.mxu0 %vm254_vm0, %v186_v37 }
  0x30   : > { %1186 = vmatprep.mubr.msk.f32.mxu1 %vm254_vm0, %v218_v38 }
  0x32   : > { %1139 = vmatmul.mubr.msk.f32.gmra.mrb[12].mxu0 %vm254_vm0, %v187_v39 }
  0x33   : > { %1187 = vmatmul.mubr.msk.f32.gmra.mrb[12].mxu1 %vm254_vm0, %v219_v40  ;;  %1141 = vmatprep.mubr.msk.f32.mxu0 %vm254_vm0, %v188_v41 }
  0x34   : > { %1189 = vmatprep.mubr.msk.f32.mxu1 %vm254_vm0, %v220_v42 }
  0x36   : > { %1142 = vmatmul.mubr.msk.f32.gmra.mrb[14].mxu0 %vm254_vm0, %v189_v43 }
  0x37   : > { %1190 = vmatmul.mubr.msk.f32.gmra.mrb[14].mxu1 %vm254_vm0, %v221_v44  ;;  %1144 = vmatprep.mubr.msk.f32.mxu0 %vm254_vm0, %v190_v45 }
  0x38   : > { %1192 = vmatprep.mubr.msk.f32.mxu1 %vm254_vm0, %v222_v46 }
  0x3a   : > { %1145 = vmatmul.mubr.msk.f32.gmra.mrb[16].mxu0 %vm254_vm0, %v191_v47 }
  0x3b   : > { %1193 = vmatmul.mubr.msk.f32.gmra.mrb[16].mxu1 %vm254_vm0, %v223_v48  ;;  %1147 = vmatprep.mubr.msk.f32.mxu0 %vm254_vm0, %v192_v49 }
  0x3c   : > { %1195 = vmatprep.mubr.msk.f32.mxu1 %vm254_vm0, %v224_v50 }
  0x3e   : > { %1148 = vmatmul.mubr.msk.f32.gmra.mrb[18].mxu0 %vm254_vm0, %v193_v51 }
  0x3f   : > { %1196 = vmatmul.mubr.msk.f32.gmra.mrb[18].mxu1 %vm254_vm0, %v225_v52  ;;  %1150 = vmatprep.mubr.msk.f32.mxu0 %vm254_vm0, %v194_v53 }
  0x40   : > { %1198 = vmatprep.mubr.msk.f32.mxu1 %vm254_vm0, %v226_v54 }
  0x42   : > { %1151 = vmatmul.mubr.msk.f32.gmra.mrb[20].mxu0 %vm254_vm0, %v195_v55 }
  0x43   : > { %1199 = vmatmul.mubr.msk.f32.gmra.mrb[20].mxu1 %vm254_vm0, %v227_v56  ;;  %1153 = vmatprep.mubr.msk.f32.mxu0 %vm254_vm0, %v196_v57 }
  0x44   : > { %1201 = vmatprep.mubr.msk.f32.mxu1 %vm254_vm0, %v228_v58 }
  0x46   : > { %1154 = vmatmul.mubr.msk.f32.gmra.mrb[22].mxu0 %vm254_vm0, %v197_v59 }
  0x47   : > { %1202 = vmatmul.mubr.msk.f32.gmra.mrb[22].mxu1 %vm254_vm0, %v229_v60  ;;  %1156 = vmatprep.mubr.msk.f32.mxu0 %vm254_vm0, %v198_v61 }
  0x48   : > { %1204 = vmatprep.mubr.msk.f32.mxu1 %vm254_vm0, %v230_v62 }
  0x4a   : > { %1157 = vmatmul.mubr.msk.f32.gmra.mrb[24].mxu0 %vm254_vm0, %v199_v63 }
  0x4b   : > { %1205 = vmatmul.mubr.msk.f32.gmra.mrb[24].mxu1 %vm254_vm0, %v231_v0  ;;  %1159 = vmatprep.mubr.msk.f32.mxu0 %vm254_vm0, %v200_v1 }
  0x4c   : > { %1207 = vmatprep.mubr.msk.f32.mxu1 %vm254_vm0, %v232_v2 }
  0x4e   : > { %1160 = vmatmul.mubr.msk.f32.gmra.mrb[26].mxu0 %vm254_vm0, %v201_v3 }
  0x4f   : > { %1208 = vmatmul.mubr.msk.f32.gmra.mrb[26].mxu1 %vm254_vm0, %v233_v4  ;;  %1162 = vmatprep.mubr.msk.f32.mxu0 %vm254_vm0, %v202_v5 }
  0x50   : > { %1210 = vmatprep.mubr.msk.f32.mxu1 %vm254_vm0, %v234_v6 }
  0x52   : > { %1163 = vmatmul.mubr.msk.f32.gmra.mrb[28].mxu0 %vm254_vm0, %v203_v7 }
  0x53   : > { %1211 = vmatmul.mubr.msk.f32.gmra.mrb[28].mxu1 %vm254_vm0, %v235_v8  ;;  %1165 = vmatprep.mubr.msk.f32.mxu0 %vm254_vm0, %v204_v9 }
  0x54   : > { %1213 = vmatprep.mubr.msk.f32.mxu1 %vm254_vm0, %v236_v10 }
  0x56   : > { %1166 = vmatmul.mubr.msk.f32.gmra.mrb[30].mxu0 %vm254_vm0, %v205_v11 }
  0x57   : > { %1214 = vmatmul.mubr.msk.f32.gmra.mrb[30].mxu1 %vm254_vm0, %v237_v12 }
  0xed   : > { %v1122_v14 = vpop.f32.mrb[0].mxu0 }
  0xee   : > { %v1170_v15 = vpop.f32.mrb[0].mxu1  ;;  %v519_v16 = vadd.f32 %v1122_v14, %v1454_v13  ;;  %v513_v18 = vpop.f32.mrb[1].mxu0 }
  0xef   : > { %v679_v17 = vadd.f32 %v1170_v15, %v1454_v13  ;;  %v673_v19 = vpop.f32.mrb[1].mxu1  ;;  %v514_v20 = vadd.f32 %v1454_v13, %v513_v18 }
  0xf0   : > { %v674_v21 = vadd.f32 %v1454_v13, %v673_v19  ;;  %834 = vst.msk [vmem:[%s1461_s15 + $0x8] sm:$0xff] %vm832_vm1, %v519_v16 }
  0xf1   : > { %866 = vst.msk [vmem:[%s1461_s15 + $0x108] sm:$0xff] %vm832_vm1, %v679_v17  ;;  %833 = vst.msk [vmem:[%s1461_s15] sm:$0xff] %vm832_vm1, %v514_v20  ;;  %v1125_v22 = vpop.f32.mrb[2].mxu0 }
  0xf2   : > { %865 = vst.msk [vmem:[%s1461_s15 + $0x100] sm:$0xff] %vm832_vm1, %v674_v21  ;;  %v1173_v23 = vpop.f32.mrb[2].mxu1  ;;  %v529_v24 = vadd.f32 %v1125_v22, %v1454_v13  ;;  %v523_v26 = vpop.f32.mrb[3].mxu0 }
  0xf3   : > { %v689_v25 = vadd.f32 %v1173_v23, %v1454_v13  ;;  %v683_v27 = vpop.f32.mrb[3].mxu1  ;;  %v524_v28 = vadd.f32 %v1454_v13, %v523_v26 }
  0xf4   : > { %v684_v29 = vadd.f32 %v1454_v13, %v683_v27  ;;  %836 = vst.msk [vmem:[%s1461_s15 + $0x18] sm:$0xff] %vm832_vm1, %v529_v24 }
  0xf5   : > { %868 = vst.msk [vmem:[%s1461_s15 + $0x118] sm:$0xff] %vm832_vm1, %v689_v25  ;;  %835 = vst.msk [vmem:[%s1461_s15 + $0x10] sm:$0xff] %vm832_vm1, %v524_v28  ;;  %v1128_v30 = vpop.f32.mrb[4].mxu0 }
  0xf6   : > { %867 = vst.msk [vmem:[%s1461_s15 + $0x110] sm:$0xff] %vm832_vm1, %v684_v29  ;;  %v1176_v31 = vpop.f32.mrb[4].mxu1  ;;  %v539_v32 = vadd.f32 %v1128_v30, %v1454_v13  ;;  %v533_v34 = vpop.f32.mrb[5].mxu0 }
  0xf7   : > { %v699_v33 = vadd.f32 %v1176_v31, %v1454_v13  ;;  %v693_v35 = vpop.f32.mrb[5].mxu1  ;;  %v534_v36 = vadd.f32 %v1454_v13, %v533_v34 }
  0xf8   : > { %v694_v37 = vadd.f32 %v1454_v13, %v693_v35  ;;  %838 = vst.msk [vmem:[%s1461_s15 + $0x28] sm:$0xff] %vm832_vm1, %v539_v32 }
  0xf9   : > { %870 = vst.msk [vmem:[%s1461_s15 + $0x128] sm:$0xff] %vm832_vm1, %v699_v33  ;;  %837 = vst.msk [vmem:[%s1461_s15 + $0x20] sm:$0xff] %vm832_vm1, %v534_v36  ;;  %v1131_v38 = vpop.f32.mrb[6].mxu0 }
  0xfa   : > { %869 = vst.msk [vmem:[%s1461_s15 + $0x120] sm:$0xff] %vm832_vm1, %v694_v37  ;;  %v1179_v39 = vpop.f32.mrb[6].mxu1  ;;  %v549_v40 = vadd.f32 %v1131_v38, %v1454_v13  ;;  %v543_v42 = vpop.f32.mrb[7].mxu0 }
  0xfb   : > { %v709_v41 = vadd.f32 %v1179_v39, %v1454_v13  ;;  %v703_v43 = vpop.f32.mrb[7].mxu1  ;;  %v544_v44 = vadd.f32 %v1454_v13, %v543_v42 }
  0xfc   : > { %v704_v45 = vadd.f32 %v1454_v13, %v703_v43  ;;  %840 = vst.msk [vmem:[%s1461_s15 + $0x38] sm:$0xff] %vm832_vm1, %v549_v40 }
  0xfd   : > { %872 = vst.msk [vmem:[%s1461_s15 + $0x138] sm:$0xff] %vm832_vm1, %v709_v41  ;;  %839 = vst.msk [vmem:[%s1461_s15 + $0x30] sm:$0xff] %vm832_vm1, %v544_v44  ;;  %v1134_v46 = vpop.f32.mrb[8].mxu0 }
  0xfe   : > { %871 = vst.msk [vmem:[%s1461_s15 + $0x130] sm:$0xff] %vm832_vm1, %v704_v45  ;;  %v1182_v47 = vpop.f32.mrb[8].mxu1  ;;  %v559_v48 = vadd.f32 %v1134_v46, %v1454_v13  ;;  %v553_v50 = vpop.f32.mrb[9].mxu0 }
  0xff   : > { %v719_v49 = vadd.f32 %v1182_v47, %v1454_v13  ;;  %v713_v51 = vpop.f32.mrb[9].mxu1  ;;  %v554_v52 = vadd.f32 %v1454_v13, %v553_v50 }
 0x100   : > { %v714_v53 = vadd.f32 %v1454_v13, %v713_v51  ;;  %842 = vst.msk [vmem:[%s1461_s15 + $0x48] sm:$0xff] %vm832_vm1, %v559_v48 }
 0x101   : > { %874 = vst.msk [vmem:[%s1461_s15 + $0x148] sm:$0xff] %vm832_vm1, %v719_v49  ;;  %841 = vst.msk [vmem:[%s1461_s15 + $0x40] sm:$0xff] %vm832_vm1, %v554_v52  ;;  %v1137_v54 = vpop.f32.mrb[10].mxu0 }
 0x102   : > { %873 = vst.msk [vmem:[%s1461_s15 + $0x140] sm:$0xff] %vm832_vm1, %v714_v53  ;;  %v1185_v55 = vpop.f32.mrb[10].mxu1  ;;  %v569_v56 = vadd.f32 %v1137_v54, %v1454_v13  ;;  %v563_v58 = vpop.f32.mrb[11].mxu0 }
 0x103   : > { %v729_v57 = vadd.f32 %v1185_v55, %v1454_v13  ;;  %v723_v59 = vpop.f32.mrb[11].mxu1  ;;  %v564_v60 = vadd.f32 %v1454_v13, %v563_v58 }
 0x104   : > { %v724_v61 = vadd.f32 %v1454_v13, %v723_v59  ;;  %844 = vst.msk [vmem:[%s1461_s15 + $0x58] sm:$0xff] %vm832_vm1, %v569_v56 }
 0x105   : > { %876 = vst.msk [vmem:[%s1461_s15 + $0x158] sm:$0xff] %vm832_vm1, %v729_v57  ;;  %843 = vst.msk [vmem:[%s1461_s15 + $0x50] sm:$0xff] %vm832_vm1, %v564_v60  ;;  %v1140_v62 = vpop.f32.mrb[12].mxu0 }
 0x106   : > { %875 = vst.msk [vmem:[%s1461_s15 + $0x150] sm:$0xff] %vm832_vm1, %v724_v61  ;;  %v1188_v63 = vpop.f32.mrb[12].mxu1  ;;  %v579_v0 = vadd.f32 %v1140_v62, %v1454_v13  ;;  %v573_v2 = vpop.f32.mrb[13].mxu0 }
 0x107   : > { %v739_v1 = vadd.f32 %v1188_v63, %v1454_v13  ;;  %v733_v3 = vpop.f32.mrb[13].mxu1  ;;  %v574_v4 = vadd.f32 %v1454_v13, %v573_v2 }
 0x108   : > { %v734_v5 = vadd.f32 %v1454_v13, %v733_v3  ;;  %846 = vst.msk [vmem:[%s1461_s15 + $0x68] sm:$0xff] %vm832_vm1, %v579_v0 }
 0x109   : > { %878 = vst.msk [vmem:[%s1461_s15 + $0x168] sm:$0xff] %vm832_vm1, %v739_v1  ;;  %845 = vst.msk [vmem:[%s1461_s15 + $0x60] sm:$0xff] %vm832_vm1, %v574_v4  ;;  %v1143_v6 = vpop.f32.mrb[14].mxu0 }
 0x10a   : > { %877 = vst.msk [vmem:[%s1461_s15 + $0x160] sm:$0xff] %vm832_vm1, %v734_v5  ;;  %v1191_v7 = vpop.f32.mrb[14].mxu1  ;;  %v589_v8 = vadd.f32 %v1143_v6, %v1454_v13  ;;  %v583_v10 = vpop.f32.mrb[15].mxu0 }
 0x10b   : > { %v749_v9 = vadd.f32 %v1191_v7, %v1454_v13  ;;  %v743_v11 = vpop.f32.mrb[15].mxu1  ;;  %v584_v12 = vadd.f32 %v1454_v13, %v583_v10 }
 0x10c   : > { %v744_v14 = vadd.f32 %v1454_v13, %v743_v11  ;;  %848 = vst.msk [vmem:[%s1461_s15 + $0x78] sm:$0xff] %vm832_vm1, %v589_v8 }
 0x10d   : > { %880 = vst.msk [vmem:[%s1461_s15 + $0x178] sm:$0xff] %vm832_vm1, %v749_v9  ;;  %847 = vst.msk [vmem:[%s1461_s15 + $0x70] sm:$0xff] %vm832_vm1, %v584_v12  ;;  %v1146_v15 = vpop.f32.mrb[16].mxu0 }
 0x10e   : > { %879 = vst.msk [vmem:[%s1461_s15 + $0x170] sm:$0xff] %vm832_vm1, %v744_v14  ;;  %v1194_v16 = vpop.f32.mrb[16].mxu1  ;;  %v599_v17 = vadd.f32 %v1146_v15, %v1454_v13  ;;  %v593_v19 = vpop.f32.mrb[17].mxu0 }
 0x10f   : > { %v759_v18 = vadd.f32 %v1194_v16, %v1454_v13  ;;  %v753_v20 = vpop.f32.mrb[17].mxu1  ;;  %v594_v21 = vadd.f32 %v1454_v13, %v593_v19 }
 0x110   : > { %v754_v22 = vadd.f32 %v1454_v13, %v753_v20  ;;  %850 = vst.msk [vmem:[%s1461_s15 + $0x88] sm:$0xff] %vm832_vm1, %v599_v17 }
 0x111   : > { %882 = vst.msk [vmem:[%s1461_s15 + $0x188] sm:$0xff] %vm832_vm1, %v759_v18  ;;  %849 = vst.msk [vmem:[%s1461_s15 + $0x80] sm:$0xff] %vm832_vm1, %v594_v21  ;;  %v1149_v23 = vpop.f32.mrb[18].mxu0 }
 0x112   : > { %881 = vst.msk [vmem:[%s1461_s15 + $0x180] sm:$0xff] %vm832_vm1, %v754_v22  ;;  %v1197_v24 = vpop.f32.mrb[18].mxu1  ;;  %v609_v25 = vadd.f32 %v1149_v23, %v1454_v13  ;;  %v603_v27 = vpop.f32.mrb[19].mxu0 }
 0x113   : > { %v769_v26 = vadd.f32 %v1197_v24, %v1454_v13  ;;  %v763_v28 = vpop.f32.mrb[19].mxu1  ;;  %v604_v29 = vadd.f32 %v1454_v13, %v603_v27 }
 0x114   : > { %v764_v30 = vadd.f32 %v1454_v13, %v763_v28  ;;  %852 = vst.msk [vmem:[%s1461_s15 + $0x98] sm:$0xff] %vm832_vm1, %v609_v25 }
 0x115   : > { %884 = vst.msk [vmem:[%s1461_s15 + $0x198] sm:$0xff] %vm832_vm1, %v769_v26  ;;  %851 = vst.msk [vmem:[%s1461_s15 + $0x90] sm:$0xff] %vm832_vm1, %v604_v29  ;;  %v1152_v31 = vpop.f32.mrb[20].mxu0 }
 0x116   : > { %883 = vst.msk [vmem:[%s1461_s15 + $0x190] sm:$0xff] %vm832_vm1, %v764_v30  ;;  %v1200_v32 = vpop.f32.mrb[20].mxu1  ;;  %v619_v33 = vadd.f32 %v1152_v31, %v1454_v13  ;;  %v613_v35 = vpop.f32.mrb[21].mxu0 }
 0x117   : > { %v779_v34 = vadd.f32 %v1200_v32, %v1454_v13  ;;  %v773_v36 = vpop.f32.mrb[21].mxu1  ;;  %v614_v37 = vadd.f32 %v1454_v13, %v613_v35 }
 0x118   : > { %v774_v38 = vadd.f32 %v1454_v13, %v773_v36  ;;  %854 = vst.msk [vmem:[%s1461_s15 + $0xa8] sm:$0xff] %vm832_vm1, %v619_v33 }
 0x119   : > { %886 = vst.msk [vmem:[%s1461_s15 + $0x1a8] sm:$0xff] %vm832_vm1, %v779_v34  ;;  %853 = vst.msk [vmem:[%s1461_s15 + $0xa0] sm:$0xff] %vm832_vm1, %v614_v37  ;;  %v1155_v39 = vpop.f32.mrb[22].mxu0 }
 0x11a   : > { %885 = vst.msk [vmem:[%s1461_s15 + $0x1a0] sm:$0xff] %vm832_vm1, %v774_v38  ;;  %v1203_v40 = vpop.f32.mrb[22].mxu1  ;;  %v629_v41 = vadd.f32 %v1155_v39, %v1454_v13  ;;  %v623_v43 = vpop.f32.mrb[23].mxu0 }
 0x11b   : > { %v789_v42 = vadd.f32 %v1203_v40, %v1454_v13  ;;  %v783_v44 = vpop.f32.mrb[23].mxu1  ;;  %v624_v45 = vadd.f32 %v1454_v13, %v623_v43 }
 0x11c   : > { %v784_v46 = vadd.f32 %v1454_v13, %v783_v44  ;;  %856 = vst.msk [vmem:[%s1461_s15 + $0xb8] sm:$0xff] %vm832_vm1, %v629_v41 }
 0x11d   : > { %888 = vst.msk [vmem:[%s1461_s15 + $0x1b8] sm:$0xff] %vm832_vm1, %v789_v42  ;;  %855 = vst.msk [vmem:[%s1461_s15 + $0xb0] sm:$0xff] %vm832_vm1, %v624_v45  ;;  %v1158_v47 = vpop.f32.mrb[24].mxu0 }
 0x11e   : > { %887 = vst.msk [vmem:[%s1461_s15 + $0x1b0] sm:$0xff] %vm832_vm1, %v784_v46  ;;  %v1206_v48 = vpop.f32.mrb[24].mxu1  ;;  %v639_v49 = vadd.f32 %v1158_v47, %v1454_v13  ;;  %v633_v51 = vpop.f32.mrb[25].mxu0 }
 0x11f   : > { %v799_v50 = vadd.f32 %v1206_v48, %v1454_v13  ;;  %v793_v52 = vpop.f32.mrb[25].mxu1  ;;  %v634_v53 = vadd.f32 %v1454_v13, %v633_v51 }
 0x120   : > { %v794_v54 = vadd.f32 %v1454_v13, %v793_v52  ;;  %858 = vst.msk [vmem:[%s1461_s15 + $0xc8] sm:$0xff] %vm832_vm1, %v639_v49 }
 0x121   : > { %890 = vst.msk [vmem:[%s1461_s15 + $0x1c8] sm:$0xff] %vm832_vm1, %v799_v50  ;;  %857 = vst.msk [vmem:[%s1461_s15 + $0xc0] sm:$0xff] %vm832_vm1, %v634_v53  ;;  %v1161_v55 = vpop.f32.mrb[26].mxu0 }
 0x122   : > { %889 = vst.msk [vmem:[%s1461_s15 + $0x1c0] sm:$0xff] %vm832_vm1, %v794_v54  ;;  %v1209_v56 = vpop.f32.mrb[26].mxu1  ;;  %v649_v57 = vadd.f32 %v1161_v55, %v1454_v13  ;;  %v643_v59 = vpop.f32.mrb[27].mxu0 }
 0x123   : > { %v809_v58 = vadd.f32 %v1209_v56, %v1454_v13  ;;  %v803_v60 = vpop.f32.mrb[27].mxu1  ;;  %v644_v61 = vadd.f32 %v1454_v13, %v643_v59 }
 0x124   : > { %v804_v62 = vadd.f32 %v1454_v13, %v803_v60  ;;  %860 = vst.msk [vmem:[%s1461_s15 + $0xd8] sm:$0xff] %vm832_vm1, %v649_v57 }
 0x125   : > { %892 = vst.msk [vmem:[%s1461_s15 + $0x1d8] sm:$0xff] %vm832_vm1, %v809_v58  ;;  %859 = vst.msk [vmem:[%s1461_s15 + $0xd0] sm:$0xff] %vm832_vm1, %v644_v61  ;;  %v1164_v63 = vpop.f32.mrb[28].mxu0 }
 0x126   : > { %891 = vst.msk [vmem:[%s1461_s15 + $0x1d0] sm:$0xff] %vm832_vm1, %v804_v62  ;;  %v1212_v0 = vpop.f32.mrb[28].mxu1  ;;  %v659_v1 = vadd.f32 %v1164_v63, %v1454_v13  ;;  %v653_v3 = vpop.f32.mrb[29].mxu0 }
 0x127   : > { %v819_v2 = vadd.f32 %v1212_v0, %v1454_v13  ;;  %v813_v4 = vpop.f32.mrb[29].mxu1  ;;  %v654_v5 = vadd.f32 %v1454_v13, %v653_v3 }
 0x128   : > { %v814_v6 = vadd.f32 %v1454_v13, %v813_v4  ;;  %862 = vst.msk [vmem:[%s1461_s15 + $0xe8] sm:$0xff] %vm832_vm1, %v659_v1 }
 0x129   : > { %894 = vst.msk [vmem:[%s1461_s15 + $0x1e8] sm:$0xff] %vm832_vm1, %v819_v2  ;;  %861 = vst.msk [vmem:[%s1461_s15 + $0xe0] sm:$0xff] %vm832_vm1, %v654_v5  ;;  %v1167_v7 = vpop.f32.mrb[30].mxu0 }
 0x12a   : > { %893 = vst.msk [vmem:[%s1461_s15 + $0x1e0] sm:$0xff] %vm832_vm1, %v814_v6  ;;  %v1215_v8 = vpop.f32.mrb[30].mxu1  ;;  %v669_v9 = vadd.f32 %v1167_v7, %v1454_v13  ;;  %v663_v11 = vpop.f32.mrb[31].mxu0 }
 0x12b   : > { %v829_v10 = vadd.f32 %v1215_v8, %v1454_v13  ;;  %v823_v12 = vpop.f32.mrb[31].mxu1  ;;  %v664_v14 = vadd.f32 %v1454_v13, %v663_v11 }
 0x12c   : > { %v824_v15 = vadd.f32 %v1454_v13, %v823_v12  ;;  %864 = vst.msk [vmem:[%s1461_s15 + $0xf8] sm:$0xff] %vm832_vm1, %v669_v9 }
 0x12d   : > { %896 = vst.msk [vmem:[%s1461_s15 + $0x1f8] sm:$0xff] %vm832_vm1, %v829_v10  ;;  %863 = vst.msk [vmem:[%s1461_s15 + $0xf0] sm:$0xff] %vm832_vm1, %v664_v14 }
 0x12e   : > { %895 = vst.msk [vmem:[%s1461_s15 + $0x1f0] sm:$0xff] %vm832_vm1, %v824_v15 }
 0x12f PF: > { %s13_s12 = sadd.s32 1, %s1256_s12  }
 0x130   : > { %p10_p4 = scmp.ge.s32.totalorder %s13_s12, 4  }
 0x132   :  { %12 = sbr.rel (!%p10_p4) target bundleno = 1 (0x1), region = 62 }

// kernel: double_conv_forward.13
= control target key start
LH: loop header
LB: loop body
LE: loop exit
PB: predicated region body
PF: predicated region fallthrough
CT: control target
= control target key end

     0   :  { %vm46_vm0 = vcmask 588800   ;;  %vm240_vm1 = vcmask 31744   ;;  %s549_s1 = inlined_call_operand.vmem [shape: f32[72,4], index: 1, kind: input, shape index: {}]   ;;  %s550_s0 = inlined_call_operand.vmem [shape: f32[128,72], index: 0, kind: input, shape index: {}]   ;;  %s551_s2 = inlined_call_operand.vmem [shape: f32[1,4], index: 2, kind: input, shape index: {}]   ;;  %s552_s3 = inlined_call_operand.vmem [shape: f32[128,4], index: 3, kind: output, shape index: {}]  }
   0x1   :  { %v30_v0 = vld [vmem:[%s549_s1] sm:$0xff]  ;;  %v31_v1 = vld [vmem:[%s549_s1 + $0x8] sm:$0xff]  ;;  %v32_v2 = vld [vmem:[%s549_s1 + $0x10] sm:$0xff] }
   0x2   :  { %v345_v3 = vpack.c.bf16 %v31_v1, %v30_v0  ;;  %v33_v4 = vld [vmem:[%s549_s1 + $0x18] sm:$0xff]  ;;  %v34_v6 = vld [vmem:[%s549_s1 + $0x20] sm:$0xff]  ;;  %v35_v7 = vld [vmem:[%s549_s1 + $0x28] sm:$0xff] }
   0x3   :  { %v349_v5 = vpack.c.bf16 %v33_v4, %v32_v2  ;;  %v14_v8 = vld [vmem:[%s550_s0] sm:$0xff]  ;;  %v353_v10 = vpack.c.bf16 %v35_v7, %v34_v6  ;;  %v36_v11 = vld [vmem:[%s549_s1 + $0x30] sm:$0xff]  ;;  %v37_v12 = vld [vmem:[%s549_s1 + $0x38] sm:$0xff] }
   0x4   :  { %346 = vmatprep.subr.bf16.mxu0 %v345_v3  ;;  %361 = vmatprep.subr.bf16.mxu1 %v345_v3  ;;  %v22_v9 = vld [vmem:[%s550_s0 + $0x40] sm:$0xff]  ;;  %v357_v13 = vpack.c.bf16 %v37_v12, %v36_v11  ;;  %v15_v15 = vld [vmem:[%s550_s0 + $0x8] sm:$0xff]  ;;  %v16_v17 = vld [vmem:[%s550_s0 + $0x10] sm:$0xff] }
   0x5   :  { %348 = vmatpush3.bf16.msra.mxu0 %v345_v3  ;;  %366 = vmatpush3.bf16.msra.mxu1 %v345_v3  ;;  %v38_v14 = vld [vmem:[%s549_s1 + $0x40] sm:$0xff]  ;;  %v23_v16 = vld [vmem:[%s550_s0 + $0x48] sm:$0xff]  ;;  %v24_v18 = vld [vmem:[%s550_s0 + $0x50] sm:$0xff] }
   0x6   :  { %350 = vmatprep.subr.bf16.mxu0 %v349_v5  ;;  %362 = vmatprep.subr.bf16.mxu1 %v349_v5  ;;  %v17_v19 = vld [vmem:[%s550_s0 + $0x18] sm:$0xff]  ;;  %v18_v21 = vld [vmem:[%s550_s0 + $0x20] sm:$0xff]  ;;  %v19_v23 = vld [vmem:[%s550_s0 + $0x28] sm:$0xff] }
   0x7   :  { %321 = vmatprep.mubr.msk.f32.mxu0 %vm46_vm0, %v14_v8  ;;  %333 = vmatprep.mubr.msk.f32.mxu1 %vm46_vm0, %v22_v9  ;;  %v25_v20 = vld [vmem:[%s550_s0 + $0x58] sm:$0xff]  ;;  %v26_v22 = vld [vmem:[%s550_s0 + $0x60] sm:$0xff]  ;;  %v27_v24 = vld [vmem:[%s550_s0 + $0x68] sm:$0xff] }
   0x8   :  { %v20_v25 = vld [vmem:[%s550_s0 + $0x30] sm:$0xff]  ;;  %v21_v27 = vld [vmem:[%s550_s0 + $0x38] sm:$0xff]  ;;  %v261_v29 = vld [vmem:[%s551_s2] ss:$0 sm:$0xff] }
   0x9   :  { %352 = vmatpush3.bf16.msra.mxu0 %v349_v5  ;;  %367 = vmatpush3.bf16.msra.mxu1 %v349_v5  ;;  %v28_v26 = vld [vmem:[%s550_s0 + $0x70] sm:$0xff]  ;;  %v29_v28 = vld [vmem:[%s550_s0 + $0x78] sm:$0xff] }
   0xa   :  { %354 = vmatprep.subr.bf16.mxu0 %v353_v10  ;;  %363 = vmatprep.subr.bf16.mxu1 %v353_v10 }
   0xd   :  { %356 = vmatpush3.bf16.msra.mxu0 %v353_v10  ;;  %368 = vmatpush3.bf16.msra.mxu1 %v353_v10 }
   0xe   :  { %358 = vmatprep.subr.bf16.mxu0 %v357_v13  ;;  %364 = vmatprep.subr.bf16.mxu1 %v357_v13 }
  0x11   :  { %360 = vmatpush3.bf16.msra.mxu0 %v357_v13  ;;  %369 = vmatpush3.bf16.msra.mxu1 %v357_v13 }
  0x12   :  { %319 = vmatprep.subr.mxu0 %v38_v14  ;;  %365 = vmatprep.subr.mxu1 %v38_v14 }
  0x15   :  { %320 = vmatpush3.msra.mxu0 %v38_v14  ;;  %370 = vmatpush3.msra.mxu1 %v38_v14 }
  0x16   :  { %322 = vmatmul.mubr.msk.f32.vlgmr.msra.gmra.mrb[0].mxu0 %vm46_vm0, %v15_v15  ;;  %334 = vmatmul.mubr.msk.f32.vlgmr.msra.gmra.mrb[0].mxu1 %vm46_vm0, %v23_v16 }
  0x17   :  { %324 = vmatprep.mubr.msk.f32.mxu0 %vm46_vm0, %v16_v17  ;;  %336 = vmatprep.mubr.msk.f32.mxu1 %vm46_vm0, %v24_v18 }
  0x1a   :  { %325 = vmatmul.mubr.msk.f32.gmra.mrb[2].mxu0 %vm46_vm0, %v17_v19  ;;  %337 = vmatmul.mubr.msk.f32.gmra.mrb[2].mxu1 %vm46_vm0, %v25_v20 }
  0x1b   :  { %327 = vmatprep.mubr.msk.f32.mxu0 %vm46_vm0, %v18_v21  ;;  %339 = vmatprep.mubr.msk.f32.mxu1 %vm46_vm0, %v26_v22 }
  0x1e   :  { %328 = vmatmul.mubr.msk.f32.gmra.mrb[4].mxu0 %vm46_vm0, %v19_v23  ;;  %340 = vmatmul.mubr.msk.f32.gmra.mrb[4].mxu1 %vm46_vm0, %v27_v24 }
  0x1f   :  { %330 = vmatprep.mubr.msk.f32.mxu0 %vm46_vm0, %v20_v25  ;;  %342 = vmatprep.mubr.msk.f32.mxu1 %vm46_vm0, %v28_v26 }
  0x22   :  { %331 = vmatmul.mubr.msk.f32.gmra.mrb[6].mxu0 %vm46_vm0, %v21_v27  ;;  %343 = vmatmul.mubr.msk.f32.gmra.mrb[6].mxu1 %vm46_vm0, %v29_v28 }
  0xe9   :  { %v323_v30 = vpop.f32.mrb[0].mxu0  ;;  %v335_v31 = vpop.f32.mrb[0].mxu1 }
  0xea   :  { %v167_v32 = vadd.f32 %v323_v30, %v261_v29  ;;  %v207_v33 = vadd.f32 %v335_v31, %v261_v29  ;;  %v161_v34 = vpop.f32.mrb[1].mxu0  ;;  %v201_v35 = vpop.f32.mrb[1].mxu1 }
  0xeb   :  { %v162_v36 = vadd.f32 %v261_v29, %v161_v34  ;;  %v202_v37 = vadd.f32 %v261_v29, %v201_v35 }
  0xec   :  { %242 = vst.msk [vmem:[%s552_s3 + $0x8] sm:$0xff] %vm240_vm1, %v167_v32  ;;  %250 = vst.msk [vmem:[%s552_s3 + $0x48] sm:$0xff] %vm240_vm1, %v207_v33 }
  0xed   :  { %241 = vst.msk [vmem:[%s552_s3] sm:$0xff] %vm240_vm1, %v162_v36  ;;  %249 = vst.msk [vmem:[%s552_s3 + $0x40] sm:$0xff] %vm240_vm1, %v202_v37  ;;  %v326_v38 = vpop.f32.mrb[2].mxu0  ;;  %v338_v39 = vpop.f32.mrb[2].mxu1 }
  0xee   :  { %v177_v40 = vadd.f32 %v326_v38, %v261_v29  ;;  %v217_v41 = vadd.f32 %v338_v39, %v261_v29  ;;  %v171_v42 = vpop.f32.mrb[3].mxu0  ;;  %v211_v43 = vpop.f32.mrb[3].mxu1 }
  0xef   :  { %v172_v44 = vadd.f32 %v261_v29, %v171_v42  ;;  %v212_v45 = vadd.f32 %v261_v29, %v211_v43 }
  0xf0   :  { %244 = vst.msk [vmem:[%s552_s3 + $0x18] sm:$0xff] %vm240_vm1, %v177_v40  ;;  %252 = vst.msk [vmem:[%s552_s3 + $0x58] sm:$0xff] %vm240_vm1, %v217_v41 }
  0xf1   :  { %243 = vst.msk [vmem:[%s552_s3 + $0x10] sm:$0xff] %vm240_vm1, %v172_v44  ;;  %251 = vst.msk [vmem:[%s552_s3 + $0x50] sm:$0xff] %vm240_vm1, %v212_v45  ;;  %v329_v46 = vpop.f32.mrb[4].mxu0  ;;  %v341_v47 = vpop.f32.mrb[4].mxu1 }
  0xf2   :  { %v187_v48 = vadd.f32 %v329_v46, %v261_v29  ;;  %v227_v49 = vadd.f32 %v341_v47, %v261_v29  ;;  %v181_v50 = vpop.f32.mrb[5].mxu0  ;;  %v221_v51 = vpop.f32.mrb[5].mxu1 }
  0xf3   :  { %v182_v52 = vadd.f32 %v261_v29, %v181_v50  ;;  %v222_v53 = vadd.f32 %v261_v29, %v221_v51 }
  0xf4   :  { %246 = vst.msk [vmem:[%s552_s3 + $0x28] sm:$0xff] %vm240_vm1, %v187_v48  ;;  %254 = vst.msk [vmem:[%s552_s3 + $0x68] sm:$0xff] %vm240_vm1, %v227_v49 }
  0xf5   :  { %245 = vst.msk [vmem:[%s552_s3 + $0x20] sm:$0xff] %vm240_vm1, %v182_v52  ;;  %253 = vst.msk [vmem:[%s552_s3 + $0x60] sm:$0xff] %vm240_vm1, %v222_v53  ;;  %v332_v54 = vpop.f32.mrb[6].mxu0  ;;  %v344_v55 = vpop.f32.mrb[6].mxu1 }
  0xf6   :  { %v197_v56 = vadd.f32 %v332_v54, %v261_v29  ;;  %v237_v57 = vadd.f32 %v344_v55, %v261_v29  ;;  %v191_v58 = vpop.f32.mrb[7].mxu0  ;;  %v231_v59 = vpop.f32.mrb[7].mxu1 }
  0xf7   :  { %v192_v60 = vadd.f32 %v261_v29, %v191_v58  ;;  %v232_v61 = vadd.f32 %v261_v29, %v231_v59 }
  0xf8   :  { %248 = vst.msk [vmem:[%s552_s3 + $0x38] sm:$0xff] %vm240_vm1, %v197_v56  ;;  %256 = vst.msk [vmem:[%s552_s3 + $0x78] sm:$0xff] %vm240_vm1, %v237_v57 }
  0xf9   :  { %247 = vst.msk [vmem:[%s552_s3 + $0x30] sm:$0xff] %vm240_vm1, %v192_v60  ;;  %255 = vst.msk [vmem:[%s552_s3 + $0x70] sm:$0xff] %vm240_vm1, %v232_v61 }

// kernel: double_conv_forward.14
= control target key start
LH: loop header
LB: loop body
LE: loop exit
PB: predicated region body
PF: predicated region fallthrough
CT: control target
= control target key end

     0   :  { %vm30_vm0 = vcmask 293888   ;;  %vm43_vm1 = vcmask 1043456   ;;  %vm132_vm2 = vcmask 31744   ;;  %s252_s1 = inlined_call_operand.vmem [shape: f32[36,4], index: 1, kind: input, shape index: {}]   ;;  %s253_s0 = inlined_call_operand.vmem [shape: f32[32,36], index: 0, kind: input, shape index: {}]   ;;  %s254_s2 = inlined_call_operand.vmem [shape: f32[1,4], index: 2, kind: input, shape index: {}]   ;;  %s255_s3 = inlined_call_operand.vmem [shape: f32[32,4], index: 3, kind: output, shape index: {}]  }
   0x1   :  { %v18_v0 = vld [vmem:[%s252_s1] sm:$0xff]  ;;  %v19_v1 = vld [vmem:[%s252_s1 + $0x8] sm:$0xff]  ;;  %v20_v2 = vld [vmem:[%s252_s1 + $0x10] sm:$0xff] }
   0x2   :  { %v172_v3 = vpack.c.bf16 %v19_v1, %v18_v0  ;;  %v21_v4 = vld [vmem:[%s252_s1 + $0x18] sm:$0xff]  ;;  %v14_v5 = vld [vmem:[%s253_s0] sm:$0xff]  ;;  %v16_v7 = vld [vmem:[%s253_s0 + $0x10] sm:$0xff] }
   0x3   :  { %v176_v6 = vpack.c.bf16 %v21_v4, %v20_v2  ;;  %166 = vmatprep.mubr.msk.f32.mxu0 %vm30_vm0, %v14_v5  ;;  %v22_v8 = vld [vmem:[%s252_s1 + $0x20] sm:$0xf]  ;;  %169 = vmatprep.mubr.msk.f32.mxu1 %vm30_vm0, %v16_v7  ;;  %v15_v9 = vld [vmem:[%s253_s0 + $0x8] sm:$0xff]  ;;  %v17_v10 = vld [vmem:[%s253_s0 + $0x18] sm:$0xff] }
   0x4   :  { %173 = vmatprep.subr.bf16.mxu0 %v172_v3  ;;  %180 = vmatprep.subr.bf16.mxu1 %v172_v3  ;;  %v141_v11 = vld [vmem:[%s254_s2] ss:$0 sm:$0xff] }
   0x5   :  { %175 = vmatpush3.bf16.msra.mxu0 %v172_v3  ;;  %183 = vmatpush3.bf16.msra.mxu1 %v172_v3 }
   0x6   :  { %177 = vmatprep.subr.bf16.mxu0 %v176_v6  ;;  %181 = vmatprep.subr.bf16.mxu1 %v176_v6 }
   0x9   :  { %179 = vmatpush3.bf16.msra.mxu0 %v176_v6  ;;  %184 = vmatpush3.bf16.msra.mxu1 %v176_v6 }
   0xa   :  { %164 = vmatprep.subr.msk.mxu0 %vm43_vm1, %v22_v8  ;;  %182 = vmatprep.subr.msk.mxu1 %vm43_vm1, %v22_v8 }
   0xd   :  { %165 = vmatpush3.msk.msra.mxu0 %vm43_vm1, %v22_v8  ;;  %185 = vmatpush3.msk.msra.mxu1 %vm43_vm1, %v22_v8 }
   0xe   :  { %167 = vmatmul.mubr.msk.f32.vlgmr.msra.gmra.mrb[0].mxu0 %vm30_vm0, %v15_v9  ;;  %170 = vmatmul.mubr.msk.f32.vlgmr.msra.gmra.mrb[0].mxu1 %vm30_vm0, %v17_v10 }
  0xe1   :  { %v168_v12 = vpop.f32.mrb[0].mxu0  ;;  %v171_v13 = vpop.f32.mrb[0].mxu1 }
  0xe2   :  { %v119_v14 = vadd.f32 %v168_v12, %v141_v11  ;;  %v129_v15 = vadd.f32 %v171_v13, %v141_v11  ;;  %v113_v16 = vpop.f32.mrb[1].mxu0  ;;  %v123_v17 = vpop.f32.mrb[1].mxu1 }
  0xe3   :  { %v114_v18 = vadd.f32 %v141_v11, %v113_v16  ;;  %v124_v19 = vadd.f32 %v141_v11, %v123_v17 }
  0xe4   :  { %134 = vst.msk [vmem:[%s255_s3 + $0x8] sm:$0xff] %vm132_vm2, %v119_v14  ;;  %136 = vst.msk [vmem:[%s255_s3 + $0x18] sm:$0xff] %vm132_vm2, %v129_v15 }
  0xe5   :  { %133 = vst.msk [vmem:[%s255_s3] sm:$0xff] %vm132_vm2, %v114_v18  ;;  %135 = vst.msk [vmem:[%s255_s3 + $0x10] sm:$0xff] %vm132_vm2, %v124_v19 }

// kernel: double_conv_forward.15
= control target key start
LH: loop header
LB: loop body
LE: loop exit
PB: predicated region body
PF: predicated region fallthrough
CT: control target
= control target key end

     0   :  { %vm12_vm0 = vcmask 31744   ;;  %vm45_vm1 = vcmask 24576   ;;  %s90_s0 = inlined_call_operand.vmem [shape: f32[2,16,4], index: 0, kind: input, shape index: {}]   ;;  %s91_s1 = inlined_call_operand.vmem [shape: f32[2,1,4], index: 1, kind: output, shape index: {}]  }
   0x1   :  { %v8_v0 = vld [vmem:[%s90_s0] sm:$0xff]  ;;  %v9_v1 = vld [vmem:[%s90_s0 + $0x8] sm:$0xff]  ;;  %v10_v2 = vld [vmem:[%s90_s0 + $0x10] sm:$0xff] }
   0x2   :  { %v13_v3 = vsel %vm12_vm0, %v8_v0, 0.0  ;;  %v14_v4 = vsel %vm12_vm0, %v9_v1, 0.0  ;;  %v11_v5 = vld [vmem:[%s90_s0 + $0x18] sm:$0xff]  ;;  %v22_v6 = vsel %vm12_vm0, %v10_v2, 0.0 }
   0x3   :  { %v15_v7 = vadd.f32 %v14_v4, %v13_v3  ;;  %v23_v8 = vsel %vm12_vm0, %v11_v5, 0.0 }
   0x4   :  { %v24_v9 = vadd.f32 %v23_v8, %v22_v6 }
   0x5   :  { %v16_v10 = vrot.slane %v15_v7, 4 }
   0x6   :  { %v25_v11 = vrot.slane %v24_v9, 4 }
   0x7   :  { %v17_v12 = vadd.f32 %v16_v10, %v15_v7 }
   0x8   :  { %v26_v13 = vadd.f32 %v25_v11, %v24_v9 }
   0x9   :  { %v18_v14 = vrot.slane %v17_v12, 2 }
   0xa   :  { %v27_v15 = vrot.slane %v26_v13, 2 }
   0xb   :  { %v19_v16 = vadd.f32 %v18_v14, %v17_v12 }
   0xc   :  { %v28_v17 = vadd.f32 %v27_v15, %v26_v13 }
   0xd   :  { %v20_v18 = vrot.slane %v19_v16, 1 }
   0xe   :  { %v29_v19 = vrot.slane %v28_v17, 1 }
   0xf   :  { %v21_v20 = vadd.f32 %v20_v18, %v19_v16 }
  0x10   :  { %v30_v21 = vadd.f32 %v29_v19, %v28_v17 }
  0x11   :  { %v52_v22 = vmul.f32 -0.0625, %v21_v20 }
  0x12   :  { %v53_v23 = vmul.f32 -0.0625, %v30_v21 }
  0x13   :  { %v35_v24 = vmul.f32 1.442695, %v52_v22 }
  0x14   :  { %v37_v25 = vmul.f32 1.442695, %v53_v23 }
  0x15   :  { %54 = vpow2.f32 %v35_v24 }
  0x16   :  { %56 = vpow2.f32 %v37_v25 }
  0x1f   :  { %v55_v26 = vpop.eup %54 }
  0x20   :  { %v57_v27 = vpop.eup %56  ;;  %v39_v28 = vadd.f32 1.0, %v55_v26 }
  0x21   :  { %v40_v29 = vadd.f32 1.0, %v57_v27 }
  0x22   :  { %58 = vrcp.f32 %v39_v28 }
  0x23   :  { %60 = vrcp.f32 %v40_v29 }
  0x2c   :  { %v59_v30 = vpop.eup %58 }
  0x2d   :  { %v61_v31 = vpop.eup %60  ;;  %46 = vst.msk [vmem:[%s91_s1] sm:$0x1] %vm45_vm1, %v59_v30 }
  0x2e   :  { %47 = vst.msk [vmem:[%s91_s1 + $0x1] sm:$0x1] %vm45_vm1, %v61_v31 }

// kernel: double_conv_forward.16
= control target key start
LH: loop header
LB: loop body
LE: loop exit
PB: predicated region body
PF: predicated region fallthrough
CT: control target
= control target key end

     0   :  { %vm18_vm0 = vcmask 27648   ;;  %vm21_vm1 = vcmask 25600   ;;  %v1305_v0 = vmov 0.0   ;;  %vm308_vm2 = vcmask 31744   ;;  %s3273_s2 = inlined_call_operand.vmem [shape: f32[4,4], index: 2, kind: output, shape index: {0}]   ;;  %s3274_s3 = inlined_call_operand.vmem [shape: f32[4,4], index: 3, kind: output, shape index: {1}]   ;;  %s3275_s4 = inlined_call_operand.vmem [shape: f32[2,4], index: 4, kind: output, shape index: {2}]   ;;  %s3276_s0 = inlined_call_operand.vmem [shape: f32[4,256,4], index: 0, kind: input, shape index: {}]   ;;  %s3277_s1 = inlined_call_operand.vmem [shape: f32[4,1,4], index: 1, kind: input, shape index: {}]  }
   0x1   :  { %19 = vst.msk [vmem:[%s3273_s2] sm:$0xf] %vm18_vm0, %v1305_v0  ;;  %20 = vst.msk [vmem:[%s3274_s3] sm:$0xf] %vm18_vm0, %v1305_v0  ;;  %v23_v1 = vld [vmem:[%s3276_s0] sm:$0xff]  ;;  %v24_v2 = vld [vmem:[%s3276_s0 + $0x8] sm:$0xff] }
   0x2   :  { %22 = vst.msk [vmem:[%s3275_s4] sm:$0x3] %vm21_vm1, %v1305_v0  ;;  %v25_v3 = vld [vmem:[%s3276_s0 + $0x10] sm:$0xff]  ;;  %v26_v4 = vld [vmem:[%s3276_s0 + $0x18] sm:$0xff]  ;;  %v27_v5 = vld [vmem:[%s3276_s0 + $0x20] sm:$0xff]  ;;  %vm589_vm3 = vcmask 1041409  }
   0x3   :  { %v28_v6 = vld [vmem:[%s3276_s0 + $0x28] sm:$0xff]  ;;  %v29_v7 = vld [vmem:[%s3276_s0 + $0x30] sm:$0xff]  ;;  %v30_v8 = vld [vmem:[%s3276_s0 + $0x38] sm:$0xff]  ;;  %vm591_vm4 = vcmask 1042434   ;;  %vm593_vm5 = vcmask 1043459  }
   0x4   :  { %v31_v9 = vld [vmem:[%s3276_s0 + $0x40] sm:$0xff]  ;;  %v32_v10 = vld [vmem:[%s3276_s0 + $0x48] sm:$0xff]  ;;  %v33_v12 = vld [vmem:[%s3276_s0 + $0x50] sm:$0xff] }
   0x5   :  { %v1376_v11 = vld [vmem:[%s3277_s1] ss:$0 sm:$0xff]  ;;  %v34_v13 = vld [vmem:[%s3276_s0 + $0x58] sm:$0xff]  ;;  %v36_v15 = vld [vmem:[%s3276_s0 + $0x68] sm:$0xff] }
   0x6   :  { %v35_v14 = vld [vmem:[%s3276_s0 + $0x60] sm:$0xff]  ;;  %v37_v16 = vld [vmem:[%s3276_s0 + $0x70] sm:$0xff]  ;;  %v38_v17 = vld [vmem:[%s3276_s0 + $0x78] sm:$0xff]  ;;  %v1415_v24 = vmul.f32 %v1376_v11, %v23_v1  ;;  %v1418_v25 = vmul.f32 %v1376_v11, %v24_v2  ;;  %v1433_v30 = vmul.f32 %v1376_v11, %v25_v3  ;;  %v1436_v31 = vmul.f32 %v1376_v11, %v26_v4 }
   0x7   :  { %v39_v18 = vld [vmem:[%s3276_s0 + $0x80] sm:$0xff]  ;;  %v40_v19 = vld [vmem:[%s3276_s0 + $0x88] sm:$0xff]  ;;  %v41_v20 = vld [vmem:[%s3276_s0 + $0x90] sm:$0xff]  ;;  %v1439_v32 = vmul.f32 %v1376_v11, %v27_v5  ;;  %v1442_v33 = vmul.f32 %v1376_v11, %v28_v6  ;;  %v1457_v38 = vmul.f32 %v1376_v11, %v29_v7  ;;  %v1460_v39 = vmul.f32 %v1376_v11, %v30_v8 }
   0x8   :  { %v42_v21 = vld [vmem:[%s3276_s0 + $0x98] sm:$0xff]  ;;  %v43_v22 = vld [vmem:[%s3276_s0 + $0xa0] sm:$0xff]  ;;  %v44_v23 = vld [vmem:[%s3276_s0 + $0xa8] sm:$0xff]  ;;  %3506 = vst [vmem:[#allocation2_spill] sm:$0xff] %v1415_v24  ;;  %v1463_v40 = vmul.f32 %v1376_v11, %v31_v9  ;;  %v1466_v41 = vmul.f32 %v1376_v11, %v32_v10  ;;  %v1478_v45 = vmul.f32 %v1376_v11, %v33_v12  ;;  %v1481_v46 = vmul.f32 %v1376_v11, %v34_v13 }
   0x9   :  { %3507 = vst [vmem:[#allocation3_spill] sm:$0xff] %v1418_v25  ;;  %v45_v26 = vld [vmem:[%s3276_s0 + $0xb0] sm:$0xff]  ;;  %v46_v27 = vld [vmem:[%s3276_s0 + $0xb8] sm:$0xff]  ;;  %v47_v28 = vld [vmem:[%s3276_s0 + $0xc0] sm:$0xff]  ;;  %v1484_v47 = vmul.f32 %v1376_v11, %v35_v14  ;;  %v1487_v48 = vmul.f32 %v1376_v11, %v36_v15  ;;  %v1499_v52 = vmul.f32 %v1376_v11, %v37_v16  ;;  %v1502_v53 = vmul.f32 %v1376_v11, %v38_v17 }
   0xa   :  { %v48_v29 = vld [vmem:[%s3276_s0 + $0xc8] sm:$0xff]  ;;  %3508 = vst [vmem:[#allocation4_spill] sm:$0xff] %v1433_v30  ;;  %3509 = vst [vmem:[#allocation5_spill] sm:$0xff] %v1436_v31  ;;  %v49_v34 = vld [vmem:[%s3276_s0 + $0xd0] sm:$0xff]  ;;  %v1505_v54 = vmul.f32 %v1376_v11, %v39_v18  ;;  %v1508_v55 = vmul.f32 %v1376_v11, %v40_v19  ;;  %v1522_v59 = vmul.f32 %v1376_v11, %v41_v20 }
   0xb   :  { %3510 = vst [vmem:[#allocation6_spill] sm:$0xff] %v1439_v32  ;;  %3511 = vst [vmem:[#allocation7_spill] sm:$0xff] %v1442_v33  ;;  %v50_v35 = vld [vmem:[%s3276_s0 + $0xd8] sm:$0xff]  ;;  %v51_v36 = vld [vmem:[%s3276_s0 + $0xe0] sm:$0xff]  ;;  %v1525_v60 = vmul.f32 %v1376_v11, %v42_v21  ;;  %v1528_v61 = vmul.f32 %v1376_v11, %v43_v22  ;;  %v1531_v62 = vmul.f32 %v1376_v11, %v44_v23 }
   0xc   :  { %v52_v37 = vld [vmem:[%s3276_s0 + $0xe8] sm:$0xff]  ;;  %3512 = vst [vmem:[#allocation8_spill] sm:$0xff] %v1457_v38  ;;  %3513 = vst [vmem:[#allocation9_spill] sm:$0xff] %v1460_v39  ;;  %v53_v42 = vld [vmem:[%s3276_s0 + $0xf0] sm:$0xff]  ;;  %v1543_v2 = vmul.f32 %v1376_v11, %v45_v26  ;;  %v1546_v3 = vmul.f32 %v1376_v11, %v46_v27  ;;  %v1549_v4 = vmul.f32 %v1376_v11, %v47_v28 }
   0xd   :  { %3514 = vst [vmem:[#allocation10_spill] sm:$0xff] %v1463_v40  ;;  %3515 = vst [vmem:[#allocation11_spill] sm:$0xff] %v1466_v41  ;;  %v54_v43 = vld [vmem:[%s3276_s0 + $0xf8] sm:$0xff]  ;;  %v55_v44 = vld [vmem:[%s3276_s0 + $0x100] sm:$0xff]  ;;  %v1552_v5 = vmul.f32 %v1376_v11, %v48_v29  ;;  %v1564_v9 = vmul.f32 %v1376_v11, %v49_v34  ;;  %v1567_v10 = vmul.f32 %v1376_v11, %v50_v35 }
   0xe   :  { %3516 = vst [vmem:[#allocation12_spill] sm:$0xff] %v1478_v45  ;;  %3517 = vst [vmem:[#allocation13_spill] sm:$0xff] %v1481_v46  ;;  %v56_v49 = vld [vmem:[%s3276_s0 + $0x108] sm:$0xff]  ;;  %v57_v50 = vld [vmem:[%s3276_s0 + $0x110] sm:$0xff]  ;;  %v1570_v12 = vmul.f32 %v1376_v11, %v51_v36  ;;  %v1573_v13 = vmul.f32 %v1376_v11, %v52_v37  ;;  %v1585_v17 = vmul.f32 %v1376_v11, %v53_v42 }
   0xf   :  { %3518 = vst [vmem:[#allocation14_spill] sm:$0xff] %v1484_v47  ;;  %3519 = vst [vmem:[#allocation15_spill] sm:$0xff] %v1487_v48  ;;  %v58_v51 = vld [vmem:[%s3276_s0 + $0x118] sm:$0xff]  ;;  %v59_v56 = vld [vmem:[%s3276_s0 + $0x120] sm:$0xff]  ;;  %v1588_v18 = vmul.f32 %v1376_v11, %v54_v43 }
  0x10   :  { %3520 = vst [vmem:[#allocation16_spill] sm:$0xff] %v1499_v52  ;;  %3521 = vst [vmem:[#allocation17_spill] sm:$0xff] %v1502_v53  ;;  %v60_v57 = vld [vmem:[%s3276_s0 + $0x128] sm:$0xff]  ;;  %v1519_v58 = vld [vmem:[%s3277_s1 + $0x1] ss:$0 sm:$0xff] }
  0x11   :  { %3522 = vst [vmem:[#allocation18_spill] sm:$0xff] %v1505_v54  ;;  %3523 = vst [vmem:[#allocation19_spill] sm:$0xff] %v1508_v55  ;;  %v61_v63 = vld [vmem:[%s3276_s0 + $0x130] sm:$0xff]  ;;  %v62_v0 = vld [vmem:[%s3276_s0 + $0x138] sm:$0xff]  ;;  %v1591_v19 = vmul.f32 %v1519_v58, %v55_v44  ;;  %v1594_v20 = vmul.f32 %v1519_v58, %v56_v49  ;;  %v1606_v11 = vmul.f32 %v1519_v58, %v57_v50 }
  0x12   :  { %3524 = vst [vmem:[#allocation20_spill] sm:$0xff] %v1522_v59  ;;  %3525 = vst [vmem:[#allocation21_spill] sm:$0xff] %v1525_v60  ;;  %v63_v1 = vld [vmem:[%s3276_s0 + $0x140] sm:$0xff]  ;;  %v64_v6 = vld [vmem:[%s3276_s0 + $0x148] sm:$0xff]  ;;  %v1609_v26 = vmul.f32 %v1519_v58, %v58_v51  ;;  %v1612_v27 = vmul.f32 %v1519_v58, %v59_v56  ;;  %v1615_v28 = vmul.f32 %v1519_v58, %v60_v57 }
  0x13   :  { %3526 = vst [vmem:[#allocation22_spill] sm:$0xff] %v1528_v61  ;;  %3527 = vst [vmem:[#allocation23_spill] sm:$0xff] %v1531_v62  ;;  %v65_v7 = vld [vmem:[%s3276_s0 + $0x150] sm:$0xff]  ;;  %v66_v8 = vld [vmem:[%s3276_s0 + $0x158] sm:$0xff]  ;;  %v1624_v35 = vmul.f32 %v1519_v58, %v61_v63  ;;  %v1627_v36 = vmul.f32 %v1519_v58, %v62_v0  ;;  %v1630_v37 = vmul.f32 %v1519_v58, %v63_v1 }
  0x14   :  { %3528 = vst [vmem:[#allocation24_spill] sm:$0xff] %v1543_v2  ;;  %3529 = vst [vmem:[#allocation25_spill] sm:$0xff] %v1546_v3  ;;  %v67_v14 = vld [vmem:[%s3276_s0 + $0x160] sm:$0xff]  ;;  %v68_v15 = vld [vmem:[%s3276_s0 + $0x168] sm:$0xff]  ;;  %v1633_v42 = vmul.f32 %v1519_v58, %v64_v6  ;;  %v1645_v50 = vmul.f32 %v1519_v58, %v65_v7  ;;  %v1648_v51 = vmul.f32 %v1519_v58, %v66_v8 }
  0x15   :  { %3530 = vst [vmem:[#allocation26_spill] sm:$0xff] %v1549_v4  ;;  %3531 = vst [vmem:[#allocation27_spill] sm:$0xff] %v1552_v5  ;;  %v69_v16 = vld [vmem:[%s3276_s0 + $0x170] sm:$0xff]  ;;  %v70_v21 = vld [vmem:[%s3276_s0 + $0x178] sm:$0xff]  ;;  %v1651_v56 = vmul.f32 %v1519_v58, %v67_v14  ;;  %v1654_v57 = vmul.f32 %v1519_v58, %v68_v15 }
  0x16   :  { %3532 = vst [vmem:[#allocation28_spill] sm:$0xff] %v1564_v9  ;;  %3533 = vst [vmem:[#allocation29_spill] sm:$0xff] %v1567_v10  ;;  %v71_v22 = vld [vmem:[%s3276_s0 + $0x180] sm:$0xff]  ;;  %v72_v23 = vld [vmem:[%s3276_s0 + $0x188] sm:$0xff]  ;;  %v1666_v6 = vmul.f32 %v1519_v58, %v69_v16  ;;  %v1669_v7 = vmul.f32 %v1519_v58, %v70_v21 }
  0x17   :  { %3534 = vst [vmem:[#allocation30_spill] sm:$0xff] %v1570_v12  ;;  %3535 = vst [vmem:[#allocation31_spill] sm:$0xff] %v1573_v13  ;;  %v73_v29 = vld [vmem:[%s3276_s0 + $0x190] sm:$0xff]  ;;  %v74_v34 = vld [vmem:[%s3276_s0 + $0x198] sm:$0xff]  ;;  %v1672_v8 = vmul.f32 %v1519_v58, %v71_v22  ;;  %v1675_v14 = vmul.f32 %v1519_v58, %v72_v23  ;;  %v309_v22 = vsel %vm308_vm2, %v1415_v24, 0.0  ;;  %v310_v23 = vsel %vm308_vm2, %v1418_v25, 0.0 }
  0x18   :  { %3536 = vst [vmem:[#allocation32_spill] sm:$0xff] %v1585_v17  ;;  %3537 = vst [vmem:[#allocation33_spill] sm:$0xff] %v1588_v18  ;;  %v75_v43 = vld [vmem:[%s3276_s0 + $0x1a0] sm:$0xff]  ;;  %v76_v44 = vld [vmem:[%s3276_s0 + $0x1a8] sm:$0xff]  ;;  %v1687_v21 = vmul.f32 %v1519_v58, %v73_v29  ;;  %v312_v17 = vsel %vm308_vm2, %v1433_v30, 0.0  ;;  %v1705_v24 = vmul.f32 %v1519_v58, %v74_v34  ;;  %v311_v10 = vadd.f32 %v310_v23, %v309_v22 }
  0x19   :  { %3538 = vst [vmem:[#allocation34_spill] sm:$0xff] %v1591_v19  ;;  %3539 = vst [vmem:[#allocation35_spill] sm:$0xff] %v1594_v20  ;;  %v77_v49 = vld [vmem:[%s3276_s0 + $0x1b0] sm:$0xff]  ;;  %v78_v63 = vld [vmem:[%s3276_s0 + $0x1b8] sm:$0xff]  ;;  %v1708_v25 = vmul.f32 %v1519_v58, %v75_v43  ;;  %v1711_v30 = vmul.f32 %v1519_v58, %v76_v44  ;;  %v314_v23 = vsel %vm308_vm2, %v1436_v31, 0.0 }
  0x1a   :  { %3540 = vst [vmem:[#allocation36_spill] sm:$0xff] %v1606_v11  ;;  %3541 = vst [vmem:[#allocation37_spill] sm:$0xff] %v1609_v26  ;;  %v79_v0 = vld [vmem:[%s3276_s0 + $0x1c0] sm:$0xff]  ;;  %v80_v1 = vld [vmem:[%s3276_s0 + $0x1c8] sm:$0xff]  ;;  %v1725_v43 = vmul.f32 %v1519_v58, %v77_v49  ;;  %v1728_v44 = vmul.f32 %v1519_v58, %v78_v63 }
  0x1b   :  { %3542 = vst [vmem:[#allocation38_spill] sm:$0xff] %v1612_v27  ;;  %3543 = vst [vmem:[#allocation39_spill] sm:$0xff] %v1615_v28  ;;  %v81_v15 = vld [vmem:[%s3276_s0 + $0x1d0] sm:$0xff]  ;;  %v82_v18 = vld [vmem:[%s3276_s0 + $0x1d8] sm:$0xff]  ;;  %v1731_v22 = vmul.f32 %v1519_v58, %v79_v0  ;;  %v1745_v63 = vmul.f32 %v1519_v58, %v80_v1 }
  0x1c   :  { %3544 = vst [vmem:[#allocation40_spill] sm:$0xff] %v1624_v35  ;;  %3545 = vst [vmem:[#allocation41_spill] sm:$0xff] %v1627_v36  ;;  %v83_v16 = vld [vmem:[%s3276_s0 + $0x1e0] sm:$0xff]  ;;  %v84_v13 = vld [vmem:[%s3276_s0 + $0x1e8] sm:$0xff]  ;;  %v1748_v0 = vmul.f32 %v1519_v58, %v81_v15  ;;  %v1751_v31 = vmul.f32 %v1519_v58, %v82_v18 }
  0x1d   :  { %3546 = vst [vmem:[#allocation42_spill] sm:$0xff] %v1630_v37  ;;  %3547 = vst [vmem:[#allocation43_spill] sm:$0xff] %v1633_v42  ;;  %v85_v12 = vld [vmem:[%s3276_s0 + $0x1f0] sm:$0xff]  ;;  %v86_v29 = vld [vmem:[%s3276_s0 + $0x1f8] sm:$0xff]  ;;  %v1766_v15 = vmul.f32 %v1519_v58, %v84_v13 }
  0x1e   :  { %3548 = vst [vmem:[#allocation44_spill] sm:$0xff] %v1645_v50  ;;  %3549 = vst [vmem:[#allocation45_spill] sm:$0xff] %v1648_v51  ;;  %v87_v9 = vld [vmem:[%s3276_s0 + $0x200] sm:$0xff]  ;;  %v88_v5 = vld [vmem:[%s3276_s0 + $0x208] sm:$0xff]  ;;  %v1783_v13 = vmul.f32 %v1519_v58, %v86_v29 }
  0x1f   :  { %3550 = vst [vmem:[#allocation46_spill] sm:$0xff] %v1651_v56  ;;  %3551 = vst [vmem:[#allocation47_spill] sm:$0xff] %v1654_v57  ;;  %v1722_v34 = vld [vmem:[%s3277_s1 + $0x2] ss:$0 sm:$0xff]  ;;  %v94_v1 = vld [vmem:[%s3276_s0 + $0x238] sm:$0xff] }
  0x20   :  { %3552 = vst [vmem:[#allocation48_spill] sm:$0xff] %v1666_v6  ;;  %3553 = vst [vmem:[#allocation49_spill] sm:$0xff] %v1669_v7  ;;  %v91_v49 = vld [vmem:[%s3276_s0 + $0x220] sm:$0xff]  ;;  %v1815_v29 = vmul.f32 %v1722_v34, %v94_v1  ;;  %v320_v1 = vsel %vm308_vm2, %v1457_v38, 0.0  ;;  %v104_v38 = vld [vmem:[%s3276_s0 + $0x288] sm:$0xff] }
  0x21   :  { %3554 = vst [vmem:[#allocation50_spill] sm:$0xff] %v1672_v8  ;;  %3555 = vst [vmem:[#allocation51_spill] sm:$0xff] %v1675_v14  ;;  %v95_v18 = vld [vmem:[%s3276_s0 + $0x240] sm:$0xff]  ;;  %v105_v4 = vld [vmem:[%s3276_s0 + $0x290] sm:$0xff] }
  0x22   :  { %3556 = vst [vmem:[#allocation52_spill] sm:$0xff] %v1687_v21  ;;  %3557 = vst [vmem:[#allocation53_spill] sm:$0xff] %v1705_v24  ;;  %v383_v21 = vsel %vm308_vm2, %v1609_v26, 0.0  ;;  %v111_v26 = vld [vmem:[%s3276_s0 + $0x2c0] sm:$0xff] }
  0x23   :  { %3558 = vst [vmem:[#allocation54_spill] sm:$0xff] %v1708_v25  ;;  %3559 = vst [vmem:[#allocation55_spill] sm:$0xff] %v1711_v30  ;;  %v89_v30 = vld [vmem:[%s3276_s0 + $0x210] sm:$0xff]  ;;  %v90_v25 = vld [vmem:[%s3276_s0 + $0x218] sm:$0xff] }
  0x24   :  { %3560 = vst [vmem:[#allocation56_spill] sm:$0xff] %v1725_v43  ;;  %3561 = vst [vmem:[#allocation57_spill] sm:$0xff] %v1728_v44  ;;  %v92_v44 = vld [vmem:[%s3276_s0 + $0x228] sm:$0xff]  ;;  %v93_v43 = vld [vmem:[%s3276_s0 + $0x230] sm:$0xff] }
  0x25   :  { %3562 = vst [vmem:[#allocation58_spill] sm:$0xff] %v1731_v22  ;;  %3563 = vst [vmem:[#allocation59_spill] sm:$0xff] %v1745_v63  ;;  %v313_v22 = vadd.f32 %v312_v17, %v311_v10  ;;  %v1763_v63 = vmul.f32 %v1519_v58, %v83_v16  ;;  %v1769_v10 = vmul.f32 %v1519_v58, %v85_v12  ;;  %v316_v17 = vsel %vm308_vm2, %v1439_v32, 0.0  ;;  %v97_v16 = vld [vmem:[%s3276_s0 + $0x250] sm:$0xff] }
  0x26   :  { %3564 = vst [vmem:[#allocation60_spill] sm:$0xff] %v1748_v0  ;;  %3565 = vst [vmem:[#allocation61_spill] sm:$0xff] %v1751_v31  ;;  %v96_v31 = vld [vmem:[%s3276_s0 + $0x248] sm:$0xff]  ;;  %v1786_v12 = vmul.f32 %v1722_v34, %v87_v9  ;;  %v1789_v32 = vmul.f32 %v1722_v34, %v88_v5  ;;  %v1798_v0 = vmul.f32 %v1722_v34, %v91_v49  ;;  %v318_v58 = vsel %vm308_vm2, %v1442_v33, 0.0  ;;  %v98_v9 = vld [vmem:[%s3276_s0 + $0x258] sm:$0xff] }
  0x27   :  { %3566 = vst [vmem:[#allocation62_spill] sm:$0xff] %v1763_v63  ;;  %3567 = vst [vmem:[#allocation63_spill] sm:$0xff] %v1766_v15  ;;  %v1792_v15 = vmul.f32 %v1722_v34, %v89_v30  ;;  %v1795_v63 = vmul.f32 %v1722_v34, %v90_v25  ;;  %v99_v5 = vld [vmem:[%s3276_s0 + $0x260] sm:$0xff]  ;;  %v1809_v30 = vmul.f32 %v1722_v34, %v92_v44  ;;  %v101_v49 = vld [vmem:[%s3276_s0 + $0x270] sm:$0xff] }
  0x28   :  { %3568 = vst [vmem:[#allocation64_spill] sm:$0xff] %v1769_v10  ;;  %3569 = vst [vmem:[#allocation65_spill] sm:$0xff] %v1783_v13  ;;  %v315_v10 = vadd.f32 %v314_v23, %v313_v22  ;;  %v1812_v25 = vmul.f32 %v1722_v34, %v93_v43  ;;  %v100_v23 = vld [vmem:[%s3276_s0 + $0x268] sm:$0xff]  ;;  %v1824_v33 = vmul.f32 %v1722_v34, %v95_v18  ;;  %v378_v18 = vsel %vm308_vm2, %v1591_v19, 0.0  ;;  %v107_v19 = vld [vmem:[%s3276_s0 + $0x2a0] sm:$0xff] }
  0x29   :  { %3570 = vst [vmem:[#allocation66_spill] sm:$0xff] %v1786_v12  ;;  %3571 = vst [vmem:[#allocation67_spill] sm:$0xff] %v1789_v32  ;;  %v1827_v44 = vmul.f32 %v1722_v34, %v96_v31  ;;  %v1830_v43 = vmul.f32 %v1722_v34, %v97_v16  ;;  %v379_v31 = vsel %vm308_vm2, %v1594_v20, 0.0  ;;  %v381_v16 = vsel %vm308_vm2, %v1606_v11, 0.0  ;;  %v106_v11 = vld [vmem:[%s3276_s0 + $0x298] sm:$0xff] }
  0x2a   :  { %3572 = vst [vmem:[#allocation68_spill] sm:$0xff] %v1792_v15  ;;  %3573 = vst [vmem:[#allocation69_spill] sm:$0xff] %v1795_v63  ;;  %v317_v22 = vadd.f32 %v316_v17, %v315_v10  ;;  %v102_v10 = vld [vmem:[%s3276_s0 + $0x278] sm:$0xff]  ;;  %v103_v17 = vld [vmem:[%s3276_s0 + $0x280] sm:$0xff]  ;;  %v1853_v24 = vmul.f32 %v1722_v34, %v98_v9  ;;  %v380_v20 = vadd.f32 %v379_v31, %v378_v18 }
  0x2b   :  { %3574 = vst [vmem:[#allocation70_spill] sm:$0xff] %v1798_v0  ;;  %3575 = vst [vmem:[#allocation71_spill] sm:$0xff] %v1809_v30  ;;  %v1867_v3 = vmul.f32 %v1722_v34, %v100_v23  ;;  %v1870_v9 = vmul.f32 %v1722_v34, %v101_v49  ;;  %v108_v18 = vld [vmem:[%s3276_s0 + $0x2a8] sm:$0xff]  ;;  %v109_v31 = vld [vmem:[%s3276_s0 + $0x2b0] sm:$0xff]  ;;  %v1884_v23 = vmul.f32 %v1722_v34, %v103_v17 }
  0x2c   :  { %3576 = vst [vmem:[#allocation72_spill] sm:$0xff] %v1812_v25  ;;  %3577 = vst [vmem:[#allocation73_spill] sm:$0xff] %v1815_v29  ;;  %v319_v13 = vadd.f32 %v318_v58, %v317_v22  ;;  %v1856_v58 = vmul.f32 %v1722_v34, %v99_v5  ;;  %v322_v22 = vsel %vm308_vm2, %v1460_v39, 0.0  ;;  %v1881_v39 = vmul.f32 %v1722_v34, %v102_v10 }
  0x2d   :  { %3578 = vst [vmem:[#allocation74_spill] sm:$0xff] %v1824_v33  ;;  %3579 = vst [vmem:[#allocation75_spill] sm:$0xff] %v1827_v44  ;;  %v382_v49 = vadd.f32 %v381_v16, %v380_v20  ;;  %v1898_v10 = vmul.f32 %v1722_v34, %v105_v4  ;;  %v112_v20 = vld [vmem:[%s3276_s0 + $0x2c8] sm:$0xff]  ;;  %v113_v16 = vld [vmem:[%s3276_s0 + $0x2d0] sm:$0xff]  ;;  %v326_v4 = vsel %vm308_vm2, %v1466_v41, 0.0 }
  0x2e   :  { %3580 = vst [vmem:[#allocation76_spill] sm:$0xff] %v1830_v43  ;;  %3581 = vst [vmem:[#allocation77_spill] sm:$0xff] %v1853_v24  ;;  %v321_v5 = vadd.f32 %v320_v1, %v319_v13  ;;  %v324_v13 = vsel %vm308_vm2, %v1463_v40, 0.0  ;;  %v110_v1 = vld [vmem:[%s3276_s0 + $0x2b8] sm:$0xff]  ;;  %v1909_v40 = vmul.f32 %v1722_v34, %v106_v11  ;;  %v1925_v11 = vld [vmem:[%s3277_s1 + $0x3] ss:$0 sm:$0xff] }
  0x2f   :  { %3582 = vst [vmem:[#allocation78_spill] sm:$0xff] %v1856_v58  ;;  %3583 = vst [vmem:[#allocation79_spill] sm:$0xff] %v1867_v3  ;;  %v121_v41 = vld [vmem:[%s3276_s0 + $0x310] sm:$0xff] }
  0x30   :  { %3584 = vst [vmem:[#allocation80_spill] sm:$0xff] %v1870_v9  ;;  %3585 = vst [vmem:[#allocation81_spill] sm:$0xff] %v1881_v39  ;;  %v1895_v9 = vmul.f32 %v1722_v34, %v104_v38  ;;  %v323_v17 = vadd.f32 %v322_v22, %v321_v5  ;;  %v1912_v38 = vmul.f32 %v1722_v34, %v107_v19  ;;  %v119_v5 = vld [vmem:[%s3276_s0 + $0x300] sm:$0xff] }
  0x31   :  { %3586 = vst [vmem:[#allocation82_spill] sm:$0xff] %v1884_v23  ;;  %3588 = vst [vmem:[#allocation84_spill] sm:$0xff] %v1898_v10  ;;  %v385_v23 = vsel %vm308_vm2, %v1612_v27, 0.0  ;;  %v384_v22 = vadd.f32 %v383_v21, %v382_v49  ;;  %v120_v27 = vld [vmem:[%s3276_s0 + $0x308] sm:$0xff]  ;;  %v1928_v19 = vmul.f32 %v1722_v34, %v108_v18  ;;  %v387_v49 = vsel %vm308_vm2, %v1615_v28, 0.0 }
  0x32   :  { %3587 = vst [vmem:[#allocation83_spill] sm:$0xff] %v1895_v9  ;;  %3589 = vst [vmem:[#allocation85_spill] sm:$0xff] %v1909_v40  ;;  %v325_v21 = vadd.f32 %v324_v13, %v323_v17  ;;  %v1939_v40 = vmul.f32 %v1722_v34, %v110_v1  ;;  %v1942_v10 = vmul.f32 %v1722_v34, %v111_v26  ;;  %v328_v18 = vsel %vm308_vm2, %v1478_v45, 0.0  ;;  %v122_v1 = vld [vmem:[%s3276_s0 + $0x318] sm:$0xff] }
  0x33   :  { %3590 = vst [vmem:[#allocation86_spill] sm:$0xff] %v1912_v38  ;;  %3591 = vst [vmem:[#allocation87_spill] sm:$0xff] %v1928_v19  ;;  %v1931_v38 = vmul.f32 %v1722_v34, %v109_v31  ;;  %v386_v19 = vadd.f32 %v385_v23, %v384_v22  ;;  %v1947_v31 = vmul.f32 %v1722_v34, %v112_v20  ;;  %v389_v28 = vsel %vm308_vm2, %v1624_v35, 0.0 }
  0x34   :  { %3593 = vst [vmem:[#allocation89_spill] sm:$0xff] %v1939_v40  ;;  %3594 = vst [vmem:[#allocation90_spill] sm:$0xff] %v1942_v10  ;;  %v1950_v13 = vmul.f32 %v1722_v34, %v113_v16  ;;  %v327_v17 = vadd.f32 %v326_v4, %v325_v21  ;;  %v1958_v26 = vmul.f32 %v1925_v11, %v119_v5  ;;  %v330_v23 = vsel %vm308_vm2, %v1481_v46, 0.0  ;;  %v123_v16 = vld [vmem:[%s3276_s0 + $0x320] sm:$0xff] }
  0x35   :  { %3592 = vst [vmem:[#allocation88_spill] sm:$0xff] %v1931_v38  ;;  %3595 = vst [vmem:[#allocation91_spill] sm:$0xff] %v1947_v31  ;;  %v1961_v45 = vmul.f32 %v1925_v11, %v120_v27  ;;  %v388_v20 = vadd.f32 %v387_v49, %v386_v19  ;;  %v1969_v4 = vmul.f32 %v1925_v11, %v121_v41  ;;  %v391_v21 = vsel %vm308_vm2, %v1627_v36, 0.0  ;;  %v124_v27 = vld [vmem:[%s3276_s0 + $0x328] sm:$0xff] }
  0x36   :  { %3596 = vst [vmem:[#allocation92_spill] sm:$0xff] %v1950_v13  ;;  %3597 = vst [vmem:[#allocation93_spill] sm:$0xff] %v1958_v26  ;;  %v329_v22 = vadd.f32 %v328_v18, %v327_v17  ;;  %v447_v5 = vsel %vm308_vm2, %v1786_v12, 0.0  ;;  %v332_v19 = vsel %vm308_vm2, %v1484_v47, 0.0  ;;  %v448_v35 = vsel %vm308_vm2, %v1789_v32, 0.0  ;;  %v125_v18 = vld [vmem:[%s3276_s0 + $0x330] sm:$0xff] }
  0x37   :  { %3598 = vst [vmem:[#allocation94_spill] sm:$0xff] %v1961_v45  ;;  %3599 = vst [vmem:[#allocation95_spill] sm:$0xff] %v1969_v4  ;;  %v390_v49 = vadd.f32 %v389_v28, %v388_v20  ;;  %v450_v41 = vsel %vm308_vm2, %v1792_v15, 0.0  ;;  %v1988_v17 = vmul.f32 %v1925_v11, %v122_v1  ;;  %v393_v36 = vsel %vm308_vm2, %v1630_v37, 0.0  ;;  %v126_v28 = vld [vmem:[%s3276_s0 + $0x338] sm:$0xff]  ;;  %v128_v37 = vld [vmem:[%s3276_s0 + $0x348] sm:$0xff] }
  0x38   :  { %v331_v12 = vadd.f32 %v330_v23, %v329_v22  ;;  %v449_v46 = vadd.f32 %v448_v35, %v447_v5  ;;  %v1996_v20 = vmul.f32 %v1925_v11, %v123_v16  ;;  %v334_v15 = vsel %vm308_vm2, %v1487_v48, 0.0  ;;  %v127_v23 = vld [vmem:[%s3276_s0 + $0x340] sm:$0xff] }
  0x39   :  { %3600 = vst [vmem:[#allocation96_spill] sm:$0xff] %v1988_v17  ;;  %v392_v32 = vadd.f32 %v391_v21, %v390_v49  ;;  %v452_v1 = vsel %vm308_vm2, %v1795_v63, 0.0  ;;  %v2006_v35 = vmul.f32 %v1925_v11, %v124_v27  ;;  %v395_v5 = vsel %vm308_vm2, %v1633_v42, 0.0  ;;  %v130_v42 = vld [vmem:[%s3276_s0 + $0x358] sm:$0xff] }
  0x3a   :  { %3601 = vst [vmem:[#allocation97_spill] sm:$0xff] %v1996_v20  ;;  %v333_v22 = vadd.f32 %v332_v19, %v331_v12  ;;  %v451_v16 = vadd.f32 %v450_v41, %v449_v46  ;;  %v2014_v21 = vmul.f32 %v1925_v11, %v125_v18  ;;  %v336_v49 = vsel %vm308_vm2, %v1499_v52, 0.0  ;;  %v129_v12 = vld [vmem:[%s3276_s0 + $0x350] sm:$0xff] }
  0x3b   :  { %3602 = vst [vmem:[#allocation98_spill] sm:$0xff] %v2006_v35  ;;  %v394_v63 = vadd.f32 %v393_v36, %v392_v32  ;;  %v454_v27 = vsel %vm308_vm2, %v1798_v0, 0.0  ;;  %v2024_v46 = vmul.f32 %v1925_v11, %v126_v28  ;;  %v397_v41 = vsel %vm308_vm2, %v1645_v50, 0.0 }
  0x3c   :  { %3603 = vst [vmem:[#allocation99_spill] sm:$0xff] %v2014_v21  ;;  %v335_v19 = vadd.f32 %v334_v15, %v333_v22  ;;  %v453_v18 = vadd.f32 %v452_v1, %v451_v16  ;;  %v2032_v32 = vmul.f32 %v1925_v11, %v127_v23  ;;  %v338_v36 = vsel %vm308_vm2, %v1502_v53, 0.0 }
  0x3d   :  { %3604 = vst [vmem:[#allocation100_spill] sm:$0xff] %v2024_v46  ;;  %v396_v0 = vadd.f32 %v395_v5, %v394_v63  ;;  %v456_v28 = vsel %vm308_vm2, %v1809_v30, 0.0  ;;  %v2039_v15 = vmul.f32 %v1925_v11, %v128_v37  ;;  %v399_v1 = vsel %vm308_vm2, %v1648_v51, 0.0 }
  0x3e   :  { %3605 = vst [vmem:[#allocation101_spill] sm:$0xff] %v2032_v32  ;;  %v337_v22 = vadd.f32 %v336_v49, %v335_v19  ;;  %v455_v16 = vadd.f32 %v454_v27, %v453_v18  ;;  %v2044_v50 = vmul.f32 %v1925_v11, %v129_v12  ;;  %v340_v23 = vsel %vm308_vm2, %v1505_v54, 0.0 }
  0x3f   :  { %3606 = vst [vmem:[#allocation102_spill] sm:$0xff] %v2039_v15  ;;  %v398_v52 = vadd.f32 %v397_v41, %v396_v0  ;;  %v458_v63 = vsel %vm308_vm2, %v1812_v25, 0.0  ;;  %v2051_v5 = vmul.f32 %v1925_v11, %v130_v42  ;;  %v401_v49 = vsel %vm308_vm2, %v1651_v56, 0.0 }
  0x40   :  { %3607 = vst [vmem:[#allocation103_spill] sm:$0xff] %v2044_v50  ;;  %v339_v37 = vadd.f32 %v338_v36, %v337_v22  ;;  %v457_v19 = vadd.f32 %v456_v28, %v455_v16  ;;  %v342_v27 = vsel %vm308_vm2, %v1508_v55, 0.0  ;;  %v344_v12 = vsel %vm308_vm2, %v1522_v59, 0.0 }
  0x41   :  { %3608 = vst [vmem:[#allocation104_spill] sm:$0xff] %v2051_v5  ;;  %v400_v18 = vadd.f32 %v399_v1, %v398_v52  ;;  %v460_v0 = vsel %vm308_vm2, %v1815_v29, 0.0  ;;  %v403_v42 = vsel %vm308_vm2, %v1654_v57, 0.0  ;;  %v405_v36 = vsel %vm308_vm2, %v1666_v6, 0.0 }
  0x42   :  { %v341_v41 = vadd.f32 %v340_v23, %v339_v37  ;;  %v459_v22 = vadd.f32 %v458_v63, %v457_v19  ;;  %v462_v28 = vsel %vm308_vm2, %v1824_v33, 0.0  ;;  %v516_v16 = vsel %vm308_vm2, %v1958_v26, 0.0  ;;  %v3616_v26 = vld [vmem:[#allocation55_spill] sm:$0xff]  ;;  %v3636_v33 = vld [vmem:[#allocation61_spill] sm:$0xff] }
  0x43   :  { %v402_v25 = vadd.f32 %v401_v49, %v400_v18  ;;  %v517_v52 = vsel %vm308_vm2, %v1961_v45, 0.0  ;;  %v519_v37 = vsel %vm308_vm2, %v1969_v4, 0.0  ;;  %v346_v30 = vsel %vm308_vm2, %v1525_v60, 0.0 }
  0x44   :  { %v343_v1 = vadd.f32 %v342_v27, %v341_v41  ;;  %v461_v29 = vadd.f32 %v460_v0, %v459_v22  ;;  %v518_v23 = vadd.f32 %v517_v52, %v516_v16  ;;  %v464_v49 = vsel %vm308_vm2, %v1827_v44, 0.0 }
  0x45   :  { %v404_v63 = vadd.f32 %v403_v42, %v402_v25  ;;  %v521_v19 = vsel %vm308_vm2, %v1988_v17, 0.0  ;;  %v407_v45 = vsel %vm308_vm2, %v1669_v7, 0.0  ;;  %v348_v41 = vsel %vm308_vm2, %v1528_v61, 0.0  ;;  %v3612_v17 = vld [vmem:[#allocation26_spill] sm:$0xff] }
  0x46   :  { %v345_v18 = vadd.f32 %v344_v12, %v343_v1  ;;  %v463_v27 = vadd.f32 %v462_v28, %v461_v29  ;;  %v520_v0 = vadd.f32 %v519_v37, %v518_v23  ;;  %v466_v16 = vsel %vm308_vm2, %v1830_v43, 0.0 }
  0x47   :  { %v406_v22 = vadd.f32 %v405_v36, %v404_v63  ;;  %v523_v25 = vsel %vm308_vm2, %v1996_v20, 0.0  ;;  %v409_v52 = vsel %vm308_vm2, %v1672_v8, 0.0  ;;  %v350_v29 = vsel %vm308_vm2, %v1531_v62, 0.0  ;;  %v3610_v20 = vld [vmem:[#allocation25_spill] sm:$0xff] }
  0x48   :  { %v347_v42 = vadd.f32 %v346_v30, %v345_v18  ;;  %v465_v12 = vadd.f32 %v464_v49, %v463_v27  ;;  %v522_v1 = vadd.f32 %v521_v19, %v520_v0  ;;  %v468_v23 = vsel %vm308_vm2, %v1853_v24, 0.0  ;;  %v3629_v24 = vld [vmem:[#allocation59_spill] sm:$0xff] }
  0x49   :  { %v408_v28 = vadd.f32 %v407_v45, %v406_v22  ;;  %v525_v36 = vsel %vm308_vm2, %v2006_v35, 0.0  ;;  %v411_v63 = vsel %vm308_vm2, %v1675_v14, 0.0  ;;  %v352_v49 = vsel %vm308_vm2, %v1543_v2, 0.0  ;;  %v3609_v22 = vld [vmem:[#allocation52_spill] sm:$0xff] }
  0x4a   :  { %v349_v37 = vadd.f32 %v348_v41, %v347_v42  ;;  %v467_v30 = vadd.f32 %v466_v16, %v465_v12  ;;  %v524_v18 = vadd.f32 %v523_v25, %v522_v1  ;;  %v470_v27 = vsel %vm308_vm2, %v1856_v58, 0.0 }
  0x4b   :  { %v410_v19 = vadd.f32 %v409_v52, %v408_v28  ;;  %v527_v45 = vsel %vm308_vm2, %v2014_v21, 0.0  ;;  %v413_v35 = vsel %vm308_vm2, %v3609_v22, 0.0  ;;  %v354_v16 = vsel %vm308_vm2, %v3610_v20, 0.0  ;;  %v3611_v28 = vld [vmem:[#allocation53_spill] sm:$0xff] }
  0x4c   :  { %v351_v0 = vadd.f32 %v350_v29, %v349_v37  ;;  %v469_v41 = vadd.f32 %v468_v23, %v467_v30  ;;  %v526_v42 = vadd.f32 %v525_v36, %v524_v18  ;;  %v472_v12 = vsel %vm308_vm2, %v1867_v3, 0.0  ;;  %v3613_v30 = vld [vmem:[#allocation80_spill] sm:$0xff] }
  0x4d   :  { %v412_v25 = vadd.f32 %v411_v63, %v410_v19  ;;  %v529_v52 = vsel %vm308_vm2, %v2024_v46, 0.0  ;;  %v415_v21 = vsel %vm308_vm2, %v3611_v28, 0.0  ;;  %v356_v23 = vsel %vm308_vm2, %v3612_v17, 0.0  ;;  %v131_v19 = vld [vmem:[%s3276_s0 + $0x360] sm:$0xff] }
  0x4e   :  { %v353_v1 = vadd.f32 %v352_v49, %v351_v0  ;;  %v471_v29 = vadd.f32 %v470_v27, %v469_v41  ;;  %v528_v37 = vadd.f32 %v527_v45, %v526_v42  ;;  %v474_v18 = vsel %vm308_vm2, %v3613_v30, 0.0  ;;  %v3614_v0 = vld [vmem:[#allocation54_spill] sm:$0xff]  ;;  %v3615_v41 = vld [vmem:[#allocation27_spill] sm:$0xff] }
  0x4f   :  { %v414_v36 = vadd.f32 %v413_v35, %v412_v25  ;;  %v531_v63 = vsel %vm308_vm2, %v2032_v32, 0.0  ;;  %v417_v46 = vsel %vm308_vm2, %v3614_v0, 0.0  ;;  %v358_v42 = vsel %vm308_vm2, %v3615_v41, 0.0 }
  0x50   :  { %v355_v49 = vadd.f32 %v354_v16, %v353_v1  ;;  %v473_v27 = vadd.f32 %v472_v12, %v471_v29  ;;  %v530_v45 = vadd.f32 %v529_v52, %v528_v37  ;;  %v476_v25 = vsel %vm308_vm2, %v1881_v39, 0.0  ;;  %v132_v12 = vld [vmem:[%s3276_s0 + $0x368] sm:$0xff]  ;;  %v3618_v29 = vld [vmem:[#allocation82_spill] sm:$0xff]  ;;  %v3622_v39 = vld [vmem:[#allocation57_spill] sm:$0xff] }
  0x51   :  { %v416_v35 = vadd.f32 %v415_v21, %v414_v36  ;;  %v533_v32 = vsel %vm308_vm2, %v2039_v15, 0.0  ;;  %v419_v30 = vsel %vm308_vm2, %v3616_v26, 0.0  ;;  %v2136_v52 = vmul.f32 %v1925_v11, %v131_v19  ;;  %v3620_v15 = vld [vmem:[#allocation28_spill] sm:$0xff] }
  0x52   :  { %v357_v4 = vadd.f32 %v356_v23, %v355_v49  ;;  %v475_v16 = vadd.f32 %v474_v18, %v473_v27  ;;  %v532_v1 = vadd.f32 %v531_v63, %v530_v45  ;;  %v478_v37 = vsel %vm308_vm2, %v3618_v29, 0.0  ;;  %v133_v23 = vld [vmem:[%s3276_s0 + $0x370] sm:$0xff] }
  0x53   :  { %3617 = vst [vmem:[#allocation105_spill] sm:$0xff] %v2136_v52  ;;  %v418_v21 = vadd.f32 %v417_v46, %v416_v35  ;;  %v535_v36 = vsel %vm308_vm2, %v2044_v50, 0.0  ;;  %v3619_v63 = vld [vmem:[#allocation56_spill] sm:$0xff]  ;;  %v360_v19 = vsel %vm308_vm2, %v3620_v15, 0.0  ;;  %v480_v35 = vsel %vm308_vm2, %v1895_v9, 0.0  ;;  %v3626_v9 = vld [vmem:[#allocation29_spill] sm:$0xff] }
  0x54   :  { %v359_v18 = vadd.f32 %v358_v42, %v357_v4  ;;  %v421_v49 = vsel %vm308_vm2, %v3619_v63, 0.0  ;;  %v477_v27 = vadd.f32 %v476_v25, %v475_v16  ;;  %v534_v45 = vadd.f32 %v533_v32, %v532_v1  ;;  %v134_v32 = vld [vmem:[%s3276_s0 + $0x378] sm:$0xff]  ;;  %v3624_v16 = vld [vmem:[#allocation84_spill] sm:$0xff] }
  0x55   :  { %v420_v46 = vadd.f32 %v419_v30, %v418_v21  ;;  %v537_v50 = vsel %vm308_vm2, %v2051_v5, 0.0  ;;  %v2154_v29 = vmul.f32 %v1925_v11, %v132_v12  ;;  %v423_v4 = vsel %vm308_vm2, %v3622_v39, 0.0  ;;  %v135_v21 = vld [vmem:[%s3276_s0 + $0x380] sm:$0xff] }
  0x56   :  { %v479_v42 = vadd.f32 %v478_v37, %v477_v27  ;;  %v536_v3 = vadd.f32 %v535_v36, %v534_v45  ;;  %v2162_v30 = vmul.f32 %v1925_v11, %v133_v23  ;;  %v482_v1 = vsel %vm308_vm2, %v3624_v16, 0.0  ;;  %v3625_v36 = vld [vmem:[#allocation58_spill] sm:$0xff] }
  0x57   :  { %3621 = vst [vmem:[#allocation106_spill] sm:$0xff] %v2154_v29  ;;  %v422_v25 = vadd.f32 %v421_v49, %v420_v46  ;;  %v539_v12 = vsel %vm308_vm2, %v2136_v52, 0.0  ;;  %v361_v37 = vadd.f32 %v360_v19, %v359_v18  ;;  %v425_v27 = vsel %vm308_vm2, %v3625_v36, 0.0  ;;  %v3627_v46 = vld [vmem:[#allocation85_spill] sm:$0xff] }
  0x58   :  { %3623 = vst [vmem:[#allocation107_spill] sm:$0xff] %v2162_v30  ;;  %v481_v45 = vadd.f32 %v480_v35, %v479_v42  ;;  %v538_v5 = vadd.f32 %v537_v50, %v536_v3  ;;  %v362_v23 = vsel %vm308_vm2, %v3626_v9, 0.0  ;;  %v484_v16 = vsel %vm308_vm2, %v3627_v46, 0.0  ;;  %v136_v3 = vld [vmem:[%s3276_s0 + $0x388] sm:$0xff]  ;;  %v3633_v46 = vld [vmem:[#allocation30_spill] sm:$0xff] }
  0x59   :  { %v424_v49 = vadd.f32 %v423_v4, %v422_v25  ;;  %v541_v52 = vsel %vm308_vm2, %v2154_v29, 0.0  ;;  %v2180_v58 = vmul.f32 %v1925_v11, %v134_v32  ;;  %v427_v18 = vsel %vm308_vm2, %v3629_v24, 0.0  ;;  %v3631_v4 = vld [vmem:[#allocation86_spill] sm:$0xff]  ;;  %v137_v25 = vld [vmem:[%s3276_s0 + $0x390] sm:$0xff] }
  0x5a   :  { %v483_v19 = vadd.f32 %v482_v1, %v481_v45  ;;  %v540_v43 = vadd.f32 %v539_v12, %v538_v5  ;;  %v2188_v50 = vmul.f32 %v1925_v11, %v135_v21  ;;  %v486_v42 = vsel %vm308_vm2, %v3631_v4, 0.0  ;;  %v3632_v5 = vld [vmem:[#allocation60_spill] sm:$0xff] }
  0x5b   :  { %3628 = vst [vmem:[#allocation108_spill] sm:$0xff] %v2180_v58  ;;  %v426_v35 = vadd.f32 %v425_v27, %v424_v49  ;;  %v543_v32 = vsel %vm308_vm2, %v2162_v30, 0.0  ;;  %v363_v1 = vadd.f32 %v362_v23, %v361_v37  ;;  %v429_v12 = vsel %vm308_vm2, %v3632_v5, 0.0  ;;  %v3634_v49 = vld [vmem:[#allocation87_spill] sm:$0xff] }
  0x5c   :  { %3630 = vst [vmem:[#allocation109_spill] sm:$0xff] %v2188_v50  ;;  %v485_v45 = vadd.f32 %v484_v16, %v483_v19  ;;  %v542_v29 = vadd.f32 %v541_v52, %v540_v43  ;;  %v364_v21 = vsel %vm308_vm2, %v3633_v46, 0.0  ;;  %v488_v4 = vsel %vm308_vm2, %v3634_v49, 0.0  ;;  %v138_v43 = vld [vmem:[%s3276_s0 + $0x398] sm:$0xff]  ;;  %v3641_v49 = vld [vmem:[#allocation63_spill] sm:$0xff] }
  0x5d   :  { %v428_v27 = vadd.f32 %v427_v18, %v426_v35  ;;  %v545_v30 = vsel %vm308_vm2, %v2180_v58, 0.0  ;;  %v2206_v44 = vmul.f32 %v1925_v11, %v136_v3  ;;  %v431_v37 = vsel %vm308_vm2, %v3636_v33, 0.0  ;;  %v139_v3 = vld [vmem:[%s3276_s0 + $0x3a0] sm:$0xff]  ;;  %v3639_v58 = vld [vmem:[#allocation31_spill] sm:$0xff] }
  0x5e   :  { %v487_v23 = vadd.f32 %v486_v42, %v485_v45  ;;  %v544_v5 = vadd.f32 %v543_v32, %v542_v29  ;;  %v2214_v52 = vmul.f32 %v1925_v11, %v137_v25  ;;  %v490_v18 = vsel %vm308_vm2, %v1931_v38, 0.0  ;;  %v3638_v29 = vld [vmem:[#allocation62_spill] sm:$0xff] }
  0x5f   :  { %3635 = vst [vmem:[#allocation110_spill] sm:$0xff] %v2206_v44  ;;  %v430_v16 = vadd.f32 %v429_v12, %v428_v27  ;;  %v547_v19 = vsel %vm308_vm2, %v2188_v50, 0.0  ;;  %v365_v35 = vadd.f32 %v364_v21, %v363_v1  ;;  %v433_v42 = vsel %vm308_vm2, %v3638_v29, 0.0 }
  0x60   :  { %3637 = vst [vmem:[#allocation111_spill] sm:$0xff] %v2214_v52  ;;  %v489_v32 = vadd.f32 %v488_v4, %v487_v23  ;;  %v546_v45 = vadd.f32 %v545_v30, %v544_v5  ;;  %v366_v25 = vsel %vm308_vm2, %v3639_v58, 0.0  ;;  %v492_v27 = vsel %vm308_vm2, %v1939_v40, 0.0  ;;  %v114_v30 = vld [vmem:[%s3276_s0 + $0x2d8] sm:$0xff]  ;;  %v115_v4 = vld [vmem:[%s3276_s0 + $0x2e0] sm:$0xff] }
  0x61   :  { %v432_v12 = vadd.f32 %v431_v37, %v430_v16  ;;  %v549_v50 = vsel %vm308_vm2, %v2206_v44, 0.0  ;;  %v2232_v38 = vmul.f32 %v1925_v11, %v138_v43  ;;  %v435_v1 = vsel %vm308_vm2, %v3641_v49, 0.0  ;;  %v140_v16 = vld [vmem:[%s3276_s0 + $0x3a8] sm:$0xff]  ;;  %v3644_v44 = vld [vmem:[#allocation64_spill] sm:$0xff] }
  0x62   :  { %v491_v21 = vadd.f32 %v490_v18, %v489_v32  ;;  %v548_v29 = vadd.f32 %v547_v19, %v546_v45  ;;  %v2243_v5 = vmul.f32 %v1925_v11, %v139_v3  ;;  %v494_v23 = vsel %vm308_vm2, %v1942_v10, 0.0  ;;  %v141_v18 = vld [vmem:[%s3276_s0 + $0x3b0] sm:$0xff] }
  0x63   :  { %3640 = vst [vmem:[#allocation112_spill] sm:$0xff] %v2232_v38  ;;  %v434_v37 = vadd.f32 %v433_v42, %v432_v12  ;;  %v551_v43 = vsel %vm308_vm2, %v2214_v52, 0.0  ;;  %v367_v19 = vadd.f32 %v366_v25, %v365_v35  ;;  %v3643_v32 = vld [vmem:[#allocation32_spill] sm:$0xff]  ;;  %v437_v10 = vsel %vm308_vm2, %v3644_v44, 0.0 }
  0x64   :  { %3642 = vst [vmem:[#allocation113_spill] sm:$0xff] %v2243_v5  ;;  %v368_v3 = vsel %vm308_vm2, %v3643_v32, 0.0  ;;  %v493_v45 = vadd.f32 %v492_v27, %v491_v21  ;;  %v550_v42 = vadd.f32 %v549_v50, %v548_v29  ;;  %v496_v52 = vsel %vm308_vm2, %v1947_v31, 0.0  ;;  %v116_v21 = vld [vmem:[%s3276_s0 + $0x2e8] sm:$0xff]  ;;  %v146_v31 = vld [vmem:[%s3276_s0 + $0x3d8] sm:$0xff] }
  0x65   :  { %v436_v12 = vadd.f32 %v435_v1, %v434_v37  ;;  %v553_v40 = vsel %vm308_vm2, %v2232_v38, 0.0  ;;  %v2264_v49 = vmul.f32 %v1722_v34, %v114_v30  ;;  %v2267_v35 = vmul.f32 %v1722_v34, %v115_v4  ;;  %v142_v30 = vld [vmem:[%s3276_s0 + $0x3b8] sm:$0xff] }
  0x66   :  { %v495_v25 = vadd.f32 %v494_v23, %v493_v45  ;;  %v552_v33 = vadd.f32 %v551_v43, %v550_v42  ;;  %v2270_v50 = vmul.f32 %v1925_v11, %v140_v16  ;;  %v2273_v29 = vmul.f32 %v1925_v11, %v141_v18  ;;  %v3649_v16 = vld [vmem:[#allocation33_spill] sm:$0xff] }
  0x67   :  { %3645 = vst [vmem:[#allocation114_spill] sm:$0xff] %v2264_v49  ;;  %3646 = vst [vmem:[#allocation115_spill] sm:$0xff] %v2267_v35  ;;  %v498_v27 = vsel %vm308_vm2, %v1950_v13, 0.0  ;;  %v555_v1 = vsel %vm308_vm2, %v2243_v5, 0.0  ;;  %v369_v4 = vadd.f32 %v368_v3, %v367_v19  ;;  %v438_v37 = vadd.f32 %v437_v10, %v436_v12  ;;  %v3650_v45 = vld [vmem:[#allocation65_spill] sm:$0xff]  ;;  %v117_v13 = vld [vmem:[%s3276_s0 + $0x2f0] sm:$0xff] }
  0x68   :  { %3647 = vst [vmem:[#allocation116_spill] sm:$0xff] %v2270_v50  ;;  %3648 = vst [vmem:[#allocation117_spill] sm:$0xff] %v2273_v29  ;;  %v497_v23 = vadd.f32 %v496_v52, %v495_v25  ;;  %v554_v43 = vadd.f32 %v553_v40, %v552_v33  ;;  %v370_v18 = vsel %vm308_vm2, %v3649_v16, 0.0  ;;  %v439_v42 = vsel %vm308_vm2, %v3650_v45, 0.0  ;;  %v143_v33 = vld [vmem:[%s3276_s0 + $0x3c0] sm:$0xff]  ;;  %v118_v52 = vld [vmem:[%s3276_s0 + $0x2f8] sm:$0xff] }
  0x69   :  { %v500_v5 = vsel %vm308_vm2, %v2264_v49, 0.0  ;;  %v557_v38 = vsel %vm308_vm2, %v2270_v50, 0.0  ;;  %v2303_v19 = vmul.f32 %v1722_v34, %v116_v21  ;;  %v2306_v3 = vmul.f32 %v1925_v11, %v142_v30  ;;  %v3676_v45 = vld [vmem:[#allocation13_spill] sm:$0xff] }
  0x6a   :  { %v499_v40 = vadd.f32 %v498_v27, %v497_v23  ;;  %v556_v10 = vadd.f32 %v555_v1, %v554_v43  ;;  %v502_v12 = vsel %vm308_vm2, %v2267_v35, 0.0  ;;  %v559_v25 = vsel %vm308_vm2, %v2273_v29, 0.0  ;;  %v144_v27 = vld [vmem:[%s3276_s0 + $0x3c8] sm:$0xff]  ;;  %v145_v1 = vld [vmem:[%s3276_s0 + $0x3d0] sm:$0xff] }
  0x6b   :  { %3651 = vst [vmem:[#allocation118_spill] sm:$0xff] %v2303_v19  ;;  %3652 = vst [vmem:[#allocation119_spill] sm:$0xff] %v2306_v3  ;;  %v371_v23 = vadd.f32 %v370_v18, %v369_v4  ;;  %v440_v21 = vadd.f32 %v439_v42, %v438_v37  ;;  %v2319_v30 = vmul.f32 %v1722_v34, %v117_v13  ;;  %v504_v29 = vsel %vm308_vm2, %v2303_v19, 0.0  ;;  %v148_v37 = vld [vmem:[%s3276_s0 + $0x3e8] sm:$0xff]  ;;  %v149_v18 = vld [vmem:[%s3276_s0 + $0x3f0] sm:$0xff] }
  0x6c   :  { %v501_v43 = vadd.f32 %v500_v5, %v499_v40  ;;  %v558_v50 = vadd.f32 %v557_v38, %v556_v10  ;;  %v2322_v35 = vmul.f32 %v1925_v11, %v143_v33  ;;  %v561_v49 = vsel %vm308_vm2, %v2306_v3, 0.0  ;;  %v147_v38 = vld [vmem:[%s3276_s0 + $0x3e0] sm:$0xff]  ;;  %v150_v40 = vld [vmem:[%s3276_s0 + $0x3f8] sm:$0xff] }
  0x6d   :  { %3653 = vst [vmem:[#allocation120_spill] sm:$0xff] %v2319_v30  ;;  %v2335_v13 = vmul.f32 %v1722_v34, %v118_v52  ;;  %v2344_v42 = vmul.f32 %v1925_v11, %v144_v27  ;;  %v2347_v33 = vmul.f32 %v1925_v11, %v145_v1  ;;  %v506_v34 = vsel %vm308_vm2, %v2319_v30, 0.0 }
  0x6e   :  { %3654 = vst [vmem:[#allocation121_spill] sm:$0xff] %v2322_v35  ;;  %v503_v5 = vadd.f32 %v502_v12, %v501_v43  ;;  %v560_v4 = vadd.f32 %v559_v25, %v558_v50  ;;  %v563_v50 = vsel %vm308_vm2, %v2322_v35, 0.0  ;;  %v372_v10 = vrot.slane %v371_v23, 4 }
  0x6f   :  { %3655 = vst [vmem:[#allocation122_spill] sm:$0xff] %v2335_v13  ;;  %3656 = vst [vmem:[#allocation123_spill] sm:$0xff] %v2344_v42  ;;  %v441_v52 = vrot.slane %v440_v21, 4  ;;  %v2357_v27 = vmul.f32 %v1925_v11, %v146_v31  ;;  %v2360_v1 = vmul.f32 %v1925_v11, %v147_v38  ;;  %v508_v43 = vsel %vm308_vm2, %v2335_v13, 0.0 }
  0x70   :  { %3657 = vst [vmem:[#allocation124_spill] sm:$0xff] %v2347_v33  ;;  %v505_v12 = vadd.f32 %v504_v29, %v503_v5  ;;  %v562_v25 = vadd.f32 %v561_v49, %v560_v4  ;;  %v565_v35 = vsel %vm308_vm2, %v2344_v42, 0.0  ;;  %v2367_v3 = vmul.f32 %v1925_v11, %v148_v37 }
  0x71   :  { %3658 = vst [vmem:[#allocation125_spill] sm:$0xff] %v2357_v27  ;;  %3659 = vst [vmem:[#allocation126_spill] sm:$0xff] %v2360_v1  ;;  %v2370_v30 = vmul.f32 %v1925_v11, %v149_v18  ;;  %v2373_v31 = vmul.f32 %v1925_v11, %v150_v40  ;;  %v567_v38 = vsel %vm308_vm2, %v2347_v33, 0.0  ;;  %v569_v5 = vsel %vm308_vm2, %v2357_v27, 0.0  ;;  %v3673_v27 = vld [vmem:[#allocation10_spill] sm:$0xff]  ;;  %v3674_v33 = vld [vmem:[#allocation11_spill] sm:$0xff] }
  0x72   :  { %3660 = vst [vmem:[#allocation127_spill] sm:$0xff] %v2367_v3  ;;  %v507_v29 = vadd.f32 %v506_v34, %v505_v12  ;;  %v564_v49 = vadd.f32 %v563_v50, %v562_v25  ;;  %v571_v4 = vsel %vm308_vm2, %v2360_v1, 0.0  ;;  %v373_v42 = vadd.f32 %v372_v10, %v371_v23  ;;  %v3663_v50 = vld [vmem:[#allocation2_spill] sm:$0xff]  ;;  %v3664_v1 = vld [vmem:[#allocation3_spill] sm:$0xff]  ;;  %v3666_v10 = vld [vmem:[#allocation5_spill] sm:$0xff] }
  0x73   :  { %3661 = vst [vmem:[#allocation128_spill] sm:$0xff] %v2370_v30  ;;  %3662 = vst [vmem:[#allocation129_spill] sm:$0xff] %v2373_v31  ;;  %v442_v37 = vadd.f32 %v441_v52, %v440_v21  ;;  %v573_v18 = vsel %vm308_vm2, %v2367_v3, 0.0  ;;  %v575_v11 = vsel %vm308_vm2, %v2370_v30, 0.0  ;;  %v577_v34 = vsel %vm308_vm2, %v2373_v31, 0.0  ;;  %v3672_v3 = vld [vmem:[#allocation9_spill] sm:$0xff] }
  0x74   :  { %v509_v13 = vadd.f32 %v508_v43, %v507_v29  ;;  %v566_v19 = vadd.f32 %v565_v35, %v564_v49  ;;  %v2389_v40 = vmul.f32 %v3663_v50, %v3663_v50  ;;  %v2393_v23 = vmul.f32 %v3664_v1, %v3664_v1  ;;  %v3665_v35 = vld [vmem:[#allocation4_spill] sm:$0xff]  ;;  %v3667_v43 = vld [vmem:[#allocation6_spill] sm:$0xff]  ;;  %v3668_v49 = vld [vmem:[#allocation7_spill] sm:$0xff] }
  0x75   :  { %v2397_v21 = vmul.f32 %v3665_v35, %v3665_v35  ;;  %v2401_v52 = vmul.f32 %v3666_v10, %v3666_v10  ;;  %v2405_v29 = vmul.f32 %v3667_v43, %v3667_v43  ;;  %v2409_v50 = vmul.f32 %v3668_v49, %v3668_v49 }
  0x76   :  { %v510_v12 = vrot.slane %v509_v13, 4  ;;  %v568_v25 = vadd.f32 %v567_v38, %v566_v19  ;;  %v3670_v19 = vld [vmem:[#allocation8_spill] sm:$0xff]  ;;  %v374_v1 = vrot.slane %v373_v42, 2  ;;  %v443_v31 = vrot.slane %v442_v37, 2 }
  0x77   :  { %3669 = vst [vmem:[#allocation130_spill] sm:$0xff] %v2409_v50  ;;  %v2413_v38 = vmul.f32 %v3670_v19, %v3670_v19  ;;  %v2417_v10 = vmul.f32 %v3672_v3, %v3672_v3  ;;  %v2421_v43 = vmul.f32 %v3673_v27, %v3673_v27  ;;  %v2425_v49 = vmul.f32 %v3674_v33, %v3674_v33  ;;  %v3675_v50 = vld [vmem:[#allocation12_spill] sm:$0xff] }
  0x78   :  { %v511_v35 = vadd.f32 %v510_v12, %v509_v13  ;;  %v570_v30 = vadd.f32 %v569_v5, %v568_v25  ;;  %v2429_v19 = vmul.f32 %v3675_v50, %v3675_v50  ;;  %v2433_v13 = vmul.f32 %v3676_v45, %v3676_v45  ;;  %v3677_v33 = vld [vmem:[#allocation16_spill] sm:$0xff] }
  0x79   :  { %3671 = vst [vmem:[#allocation131_spill] sm:$0xff] %v2413_v38  ;;  %v2437_v5 = vmul.f32 %v1484_v47, %v1484_v47  ;;  %v2441_v12 = vmul.f32 %v1487_v48, %v1487_v48  ;;  %v2445_v27 = vmul.f32 %v3677_v33, %v3677_v33  ;;  %v375_v45 = vadd.f32 %v374_v1, %v373_v42 }
  0x7a   :  { %v572_v38 = vadd.f32 %v571_v4, %v570_v30  ;;  %v512_v25 = vrot.slane %v511_v35, 2  ;;  %v2449_v30 = vmul.f32 %v1502_v53, %v1502_v53  ;;  %v2453_v4 = vmul.f32 %v1505_v54, %v1505_v54 }
  0x7b   :  { %v444_v47 = vadd.f32 %v443_v31, %v442_v37  ;;  %v2457_v48 = vmul.f32 %v1508_v55, %v1508_v55  ;;  %v2461_v33 = vmul.f32 %v1522_v59, %v1522_v59  ;;  %v2465_v53 = vmul.f32 %v1525_v60, %v1525_v60  ;;  %v3689_v60 = vld [vmem:[#allocation36_spill] sm:$0xff]  ;;  %v3690_v59 = vld [vmem:[#allocation37_spill] sm:$0xff] }
  0x7c   :  { %v574_v50 = vadd.f32 %v573_v18, %v572_v38  ;;  %v2469_v54 = vmul.f32 %v1528_v61, %v1528_v61  ;;  %v2473_v42 = vmul.f32 %v1531_v62, %v1531_v62  ;;  %v2477_v31 = vmul.f32 %v1543_v2, %v1543_v2 }
  0x7d   :  { %v2481_v37 = vmul.f32 %v3610_v20, %v3610_v20  ;;  %v2485_v18 = vmul.f32 %v3612_v17, %v3612_v17  ;;  %v513_v38 = vadd.f32 %v512_v25, %v511_v35  ;;  %v2489_v61 = vmul.f32 %v3615_v41, %v3615_v41  ;;  %v3688_v41 = vld [vmem:[#allocation35_spill] sm:$0xff] }
  0x7e   :  { %v576_v1 = vadd.f32 %v575_v11, %v574_v50  ;;  %v2493_v11 = vmul.f32 %v3620_v15, %v3620_v15  ;;  %v2497_v50 = vmul.f32 %v3626_v9, %v3626_v9  ;;  %v376_v2 = vrot.slane %v375_v45, 1  ;;  %v3687_v15 = vld [vmem:[#allocation34_spill] sm:$0xff] }
  0x7f   :  { %3678 = vst [vmem:[#allocation132_spill] sm:$0xff] %v2481_v37  ;;  %3679 = vst [vmem:[#allocation133_spill] sm:$0xff] %v2485_v18  ;;  %v445_v20 = vrot.slane %v444_v47, 1  ;;  %v2501_v17 = vmul.f32 %v3633_v46, %v3633_v46  ;;  %v2505_v35 = vmul.f32 %v3639_v58, %v3639_v58  ;;  %v2509_v25 = vmul.f32 %v3643_v32, %v3643_v32 }
  0x80   :  { %3680 = vst [vmem:[#allocation134_spill] sm:$0xff] %v2489_v61  ;;  %3681 = vst [vmem:[#allocation135_spill] sm:$0xff] %v2493_v11  ;;  %v578_v62 = vadd.f32 %v577_v34, %v576_v1  ;;  %v2513_v9 = vmul.f32 %v3649_v16, %v3649_v16  ;;  %v2517_v34 = vmul.f32 %v3687_v15, %v3687_v15  ;;  %v514_v55 = vrot.slane %v513_v38, 1  ;;  %v3691_v16 = vld [vmem:[#allocation38_spill] sm:$0xff]  ;;  %v3692_v15 = vld [vmem:[#allocation39_spill] sm:$0xff] }
  0x81   :  { %3682 = vst [vmem:[#allocation136_spill] sm:$0xff] %v2497_v50  ;;  %3683 = vst [vmem:[#allocation137_spill] sm:$0xff] %v2501_v17  ;;  %v2521_v46 = vmul.f32 %v3688_v41, %v3688_v41  ;;  %v2525_v58 = vmul.f32 %v3689_v60, %v3689_v60  ;;  %v2529_v32 = vmul.f32 %v3690_v59, %v3690_v59  ;;  %v3693_v41 = vld [vmem:[#allocation40_spill] sm:$0xff]  ;;  %v3694_v50 = vld [vmem:[#allocation41_spill] sm:$0xff] }
  0x82   :  { %3684 = vst [vmem:[#allocation138_spill] sm:$0xff] %v2505_v35  ;;  %3685 = vst [vmem:[#allocation139_spill] sm:$0xff] %v2509_v25  ;;  %v579_v1 = vrot.slane %v578_v62, 4  ;;  %v2533_v3 = vmul.f32 %v3691_v16, %v3691_v16  ;;  %v2541_v25 = vmul.f32 %v3693_v41, %v3693_v41  ;;  %v377_v60 = vadd.f32 %v376_v2, %v375_v45  ;;  %v3695_v11 = vld [vmem:[#allocation42_spill] sm:$0xff]  ;;  %v3696_v16 = vld [vmem:[#allocation43_spill] sm:$0xff] }
  0x83   :  { %3686 = vst [vmem:[#allocation140_spill] sm:$0xff] %v2513_v9  ;;  %v2537_v9 = vmul.f32 %v3692_v15, %v3692_v15  ;;  %v446_v35 = vadd.f32 %v445_v20, %v444_v47  ;;  %v2545_v59 = vmul.f32 %v3694_v50, %v3694_v50  ;;  %v2549_v61 = vmul.f32 %v3695_v11, %v3695_v11  ;;  %v3697_v15 = vld [vmem:[#allocation44_spill] sm:$0xff]  ;;  %v3714_v11 = vld [vmem:[#allocation66_spill] sm:$0xff] }
  0x84   :  { %v580_v17 = vadd.f32 %v579_v1, %v578_v62  ;;  %v2553_v18 = vmul.f32 %v3696_v16, %v3696_v16  ;;  %v2557_v37 = vmul.f32 %v3697_v15, %v3697_v15  ;;  %v2561_v47 = vmul.f32 %v1648_v51, %v1648_v51 }
  0x85   :  { %v2565_v2 = vmul.f32 %v1651_v56, %v1651_v56  ;;  %v2569_v20 = vmul.f32 %v1654_v57, %v1654_v57  ;;  %v2573_v45 = vmul.f32 %v1666_v6, %v1666_v6  ;;  %v515_v1 = vadd.f32 %v514_v55, %v513_v38 }
  0x86   :  { %v581_v62 = vrot.slane %v580_v17, 2  ;;  %v2577_v15 = vmul.f32 %v1669_v7, %v1669_v7  ;;  %v2581_v51 = vmul.f32 %v1672_v8, %v1672_v8  ;;  %v2585_v56 = vmul.f32 %v1675_v14, %v1675_v14  ;;  %v3707_v14 = vld [vmem:[#allocation62_spill] sm:$0xff]  ;;  %v3709_v7 = vld [vmem:[#allocation63_spill] sm:$0xff] }
  0x87   :  { %v590_v57 = vsel %vm589_vm3, %v446_v35, %v377_v60  ;;  %v2590_v6 = vmul.f32 %v3609_v22, %v3609_v22  ;;  %v728_v55 = vsel %vm308_vm2, %v2389_v40, 0.0  ;;  %v2596_v38 = vmul.f32 %v3611_v28, %v3611_v28 }
  0x88   :  { %v582_v16 = vadd.f32 %v581_v62, %v580_v17  ;;  %v2600_v8 = vmul.f32 %v3614_v0, %v3614_v0  ;;  %v729_v17 = vsel %vm308_vm2, %v2393_v23, 0.0  ;;  %v731_v60 = vsel %vm308_vm2, %v2397_v21, 0.0 }
  0x89   :  { %v2608_v62 = vmul.f32 %v3616_v26, %v3616_v26  ;;  %v2612_v40 = vmul.f32 %v3619_v63, %v3619_v63  ;;  %v730_v28 = vadd.f32 %v729_v17, %v728_v55  ;;  %v592_v22 = vsel %vm591_vm4, %v515_v1, %v590_v57  ;;  %v307_v26 = vld [vmem:[%s3273_s2] sm:$0xf]  ;;  %v3703_v57 = vld [vmem:[#allocation60_spill] sm:$0xff] }
  0x8a   :  { %v583_v35 = vrot.slane %v582_v16, 1  ;;  %v2617_v0 = vmul.f32 %v3622_v39, %v3622_v39  ;;  %v2621_v23 = vmul.f32 %v3625_v36, %v3625_v36  ;;  %v733_v21 = vsel %vm308_vm2, %v2401_v52, 0.0  ;;  %v3705_v39 = vld [vmem:[#allocation61_spill] sm:$0xff] }
  0x8b   :  { %3698 = vst [vmem:[#allocation141_spill] sm:$0xff] %v2608_v62  ;;  %3699 = vst [vmem:[#allocation142_spill] sm:$0xff] %v2612_v40  ;;  %v2630_v55 = vmul.f32 %v3629_v24, %v3629_v24  ;;  %v2634_v1 = vmul.f32 %v3703_v57, %v3703_v57  ;;  %v732_v17 = vadd.f32 %v731_v60, %v730_v28  ;;  %v3712_v60 = vld [vmem:[#allocation65_spill] sm:$0xff]  ;;  %v3734_v40 = vld [vmem:[#allocation84_spill] sm:$0xff] }
  0x8c   :  { %3700 = vst [vmem:[#allocation143_spill] sm:$0xff] %v2617_v0  ;;  %3701 = vst [vmem:[#allocation144_spill] sm:$0xff] %v2621_v23  ;;  %v584_v63 = vadd.f32 %v583_v35, %v582_v16  ;;  %v2638_v36 = vmul.f32 %v3705_v39, %v3705_v39  ;;  %v2642_v52 = vmul.f32 %v3707_v14, %v3707_v14  ;;  %v735_v35 = vsel %vm308_vm2, %v2405_v29, 0.0  ;;  %v3731_v0 = vld [vmem:[#allocation81_spill] sm:$0xff] }
  0x8d   :  { %3702 = vst [vmem:[#allocation145_spill] sm:$0xff] %v2630_v55  ;;  %3704 = vst [vmem:[#allocation146_spill] sm:$0xff] %v2634_v1  ;;  %v2646_v16 = vmul.f32 %v3709_v7, %v3709_v7  ;;  %v2653_v28 = vmul.f32 %v3644_v44, %v3644_v44  ;;  %v2657_v39 = vmul.f32 %v3712_v60, %v3712_v60  ;;  %v3715_v7 = vld [vmem:[#allocation67_spill] sm:$0xff]  ;;  %v3718_v44 = vld [vmem:[#allocation69_spill] sm:$0xff] }
  0x8e   :  { %3706 = vst [vmem:[#allocation147_spill] sm:$0xff] %v2638_v36  ;;  %3708 = vst [vmem:[#allocation148_spill] sm:$0xff] %v2642_v52  ;;  %v594_v24 = vsel %vm593_vm5, %v584_v63, %v592_v22  ;;  %v734_v57 = vadd.f32 %v733_v21, %v732_v17  ;;  %v664_v50 = vmul.f32 %v3714_v11, %v3714_v11  ;;  %v3717_v22 = vld [vmem:[#allocation68_spill] sm:$0xff]  ;;  %v3719_v60 = vld [vmem:[#allocation70_spill] sm:$0xff]  ;;  %v797_v36 = vsel %vm308_vm2, %v2517_v34, 0.0 }
  0x8f   :  { %3710 = vst [vmem:[#allocation149_spill] sm:$0xff] %v2646_v16  ;;  %3711 = vst [vmem:[#allocation150_spill] sm:$0xff] %v2653_v28  ;;  %v596_v14 = vadd.f32 %v594_v24, %v307_v26  ;;  %v665_v41 = vmul.f32 %v3715_v7, %v3715_v7  ;;  %v3716_v16 = vld [vmem:[#allocation130_spill] sm:$0xff]  ;;  %v666_v63 = vmul.f32 %v3717_v22, %v3717_v22  ;;  %v3720_v26 = vld [vmem:[#allocation71_spill] sm:$0xff] }
  0x90   :  { %3713 = vst [vmem:[#allocation151_spill] sm:$0xff] %v2657_v39  ;;  %v737_v29 = vsel %vm308_vm2, %v3716_v16, 0.0  ;;  %v2669_v28 = vmul.f32 %v3718_v44, %v3718_v44  ;;  %v2673_v21 = vmul.f32 %v3719_v60, %v3719_v60  ;;  %v736_v24 = vadd.f32 %v735_v35, %v734_v57  ;;  %v3721_v16 = vld [vmem:[#allocation72_spill] sm:$0xff]  ;;  %v3722_v44 = vld [vmem:[#allocation73_spill] sm:$0xff]  ;;  %v3723_v60 = vld [vmem:[#allocation131_spill] sm:$0xff] }
  0x91   :  { %598 = vst.msk [vmem:[%s3273_s2] sm:$0xf] %vm18_vm0, %v596_v14  ;;  %v2681_v17 = vmul.f32 %v3720_v26, %v3720_v26  ;;  %v2685_v22 = vmul.f32 %v3721_v16, %v3721_v16  ;;  %v2689_v7 = vmul.f32 %v3722_v44, %v3722_v44  ;;  %v739_v57 = vsel %vm308_vm2, %v3723_v60, 0.0  ;;  %v3724_v35 = vld [vmem:[#allocation74_spill] sm:$0xff]  ;;  %v3725_v14 = vld [vmem:[#allocation75_spill] sm:$0xff]  ;;  %v3726_v26 = vld [vmem:[#allocation76_spill] sm:$0xff] }
  0x92   :  { %v2695_v11 = vmul.f32 %v3724_v35, %v3724_v35  ;;  %v2699_v39 = vmul.f32 %v3725_v14, %v3725_v14  ;;  %v2703_v52 = vmul.f32 %v3726_v26, %v3726_v26  ;;  %v738_v16 = vadd.f32 %v737_v29, %v736_v24  ;;  %v3727_v1 = vld [vmem:[#allocation77_spill] sm:$0xff]  ;;  %v3728_v55 = vld [vmem:[#allocation78_spill] sm:$0xff]  ;;  %v3730_v34 = vld [vmem:[#allocation80_spill] sm:$0xff] }
  0x93   :  { %v741_v44 = vsel %vm308_vm2, %v2417_v10, 0.0  ;;  %v798_v60 = vsel %vm308_vm2, %v2521_v46, 0.0  ;;  %v800_v35 = vsel %vm308_vm2, %v2525_v58, 0.0  ;;  %v2715_v14 = vmul.f32 %v3727_v1, %v3727_v1  ;;  %v3729_v10 = vld [vmem:[#allocation79_spill] sm:$0xff]  ;;  %v3736_v62 = vld [vmem:[#allocation85_spill] sm:$0xff] }
  0x94   :  { %v2719_v26 = vmul.f32 %v3728_v55, %v3728_v55  ;;  %v740_v29 = vadd.f32 %v739_v57, %v738_v16  ;;  %v799_v24 = vadd.f32 %v798_v60, %v797_v36  ;;  %v2723_v23 = vmul.f32 %v3729_v10, %v3729_v10  ;;  %v3732_v16 = vld [vmem:[#allocation82_spill] sm:$0xff]  ;;  %v3733_v10 = vld [vmem:[#allocation83_spill] sm:$0xff] }
  0x95   :  { %v2727_v46 = vmul.f32 %v3730_v34, %v3730_v34  ;;  %v743_v58 = vsel %vm308_vm2, %v2421_v43, 0.0  ;;  %v802_v1 = vsel %vm308_vm2, %v2529_v32, 0.0  ;;  %v2735_v55 = vmul.f32 %v3731_v0, %v3731_v0 }
  0x96   :  { %v2739_v36 = vmul.f32 %v3732_v16, %v3732_v16  ;;  %v742_v57 = vadd.f32 %v741_v44, %v740_v29  ;;  %v801_v60 = vadd.f32 %v800_v35, %v799_v24  ;;  %v2743_v34 = vmul.f32 %v3733_v10, %v3733_v10  ;;  %v3738_v44 = vld [vmem:[#allocation86_spill] sm:$0xff]  ;;  %v3739_v10 = vld [vmem:[#allocation87_spill] sm:$0xff] }
  0x97   :  { %v2747_v43 = vmul.f32 %v3734_v40, %v3734_v40  ;;  %v745_v32 = vsel %vm308_vm2, %v2425_v49, 0.0  ;;  %v804_v0 = vsel %vm308_vm2, %v2533_v3, 0.0  ;;  %v2755_v16 = vmul.f32 %v3736_v62, %v3736_v62 }
  0x98   :  { %v2759_v35 = vmul.f32 %v3738_v44, %v3738_v44  ;;  %v744_v29 = vadd.f32 %v743_v58, %v742_v57  ;;  %v803_v24 = vadd.f32 %v802_v1, %v801_v60  ;;  %v2763_v40 = vmul.f32 %v3739_v10, %v3739_v10  ;;  %v3744_v58 = vld [vmem:[#allocation90_spill] sm:$0xff]  ;;  %v3746_v10 = vld [vmem:[#allocation91_spill] sm:$0xff] }
  0x99   :  { %3735 = vst [vmem:[#allocation130_spill] sm:$0xff] %v2747_v43  ;;  %3737 = vst [vmem:[#allocation131_spill] sm:$0xff] %v2755_v16  ;;  %v3740_v43 = vld [vmem:[#allocation88_spill] sm:$0xff]  ;;  %v747_v3 = vsel %vm308_vm2, %v2429_v19, 0.0  ;;  %v806_v62 = vsel %vm308_vm2, %v2537_v9, 0.0  ;;  %v3742_v16 = vld [vmem:[#allocation89_spill] sm:$0xff]  ;;  %v2779_v1 = vmul.f32 %v3744_v58, %v3744_v58 }
  0x9a   :  { %v2767_v49 = vmul.f32 %v3740_v43, %v3740_v43  ;;  %v2775_v44 = vmul.f32 %v3742_v16, %v3742_v16  ;;  %v746_v57 = vadd.f32 %v745_v32, %v744_v29  ;;  %v805_v60 = vadd.f32 %v804_v0, %v803_v24  ;;  %v3752_v32 = vld [vmem:[#allocation93_spill] sm:$0xff] }
  0x9b   :  { %3745 = vst [vmem:[#allocation154_spill] sm:$0xff] %v2779_v1  ;;  %v2783_v43 = vmul.f32 %v3746_v10, %v3746_v10  ;;  %v749_v9 = vsel %vm308_vm2, %v2433_v13, 0.0  ;;  %v808_v16 = vsel %vm308_vm2, %v2541_v25, 0.0  ;;  %v696_v0 = vmul.f32 %v3752_v32, %v3752_v32 }
  0x9c   :  { %3741 = vst [vmem:[#allocation152_spill] sm:$0xff] %v2767_v49  ;;  %3743 = vst [vmem:[#allocation153_spill] sm:$0xff] %v2775_v44  ;;  %v3748_v49 = vld [vmem:[#allocation92_spill] sm:$0xff]  ;;  %v3750_v44 = vld [vmem:[#allocation114_spill] sm:$0xff]  ;;  %v748_v29 = vadd.f32 %v747_v3, %v746_v57  ;;  %v807_v24 = vadd.f32 %v806_v62, %v805_v60  ;;  %v751_v10 = vsel %vm308_vm2, %v2437_v5, 0.0  ;;  %v866_v13 = vsel %vm308_vm2, %v664_v50, 0.0 }
  0x9d   :  { %3747 = vst [vmem:[#allocation155_spill] sm:$0xff] %v2783_v43  ;;  %v2787_v19 = vmul.f32 %v3748_v49, %v3748_v49  ;;  %v2795_v58 = vmul.f32 %v3750_v44, %v3750_v44  ;;  %v810_v49 = vsel %vm308_vm2, %v2545_v59, 0.0  ;;  %v869_v44 = vsel %vm308_vm2, %v666_v63, 0.0  ;;  %v3754_v50 = vld [vmem:[#allocation95_spill] sm:$0xff]  ;;  %v3755_v60 = vld [vmem:[#allocation96_spill] sm:$0xff] }
  0x9e   :  { %v750_v25 = vadd.f32 %v749_v9, %v748_v29  ;;  %v809_v43 = vadd.f32 %v808_v16, %v807_v24  ;;  %v753_v62 = vsel %vm308_vm2, %v2441_v12, 0.0  ;;  %v812_v5 = vsel %vm308_vm2, %v2549_v61, 0.0  ;;  %v3756_v9 = vld [vmem:[#allocation97_spill] sm:$0xff] }
  0x9f   :  { %3749 = vst [vmem:[#allocation156_spill] sm:$0xff] %v2787_v19  ;;  %3751 = vst [vmem:[#allocation157_spill] sm:$0xff] %v2795_v58  ;;  %v867_v19 = vsel %vm308_vm2, %v665_v41, 0.0  ;;  %v3753_v58 = vld [vmem:[#allocation94_spill] sm:$0xff]  ;;  %v871_v59 = vsel %vm308_vm2, %v2669_v28, 0.0  ;;  %v698_v41 = vmul.f32 %v3754_v50, %v3754_v50  ;;  %v699_v63 = vmul.f32 %v3755_v60, %v3755_v60 }
  0xa0   :  { %v868_v1 = vadd.f32 %v867_v19, %v866_v13  ;;  %v697_v32 = vmul.f32 %v3753_v58, %v3753_v58  ;;  %v752_v3 = vadd.f32 %v751_v10, %v750_v25  ;;  %v811_v16 = vadd.f32 %v810_v49, %v809_v43  ;;  %v3757_v43 = vld [vmem:[#allocation98_spill] sm:$0xff] }
  0xa1   :  { %v755_v19 = vsel %vm308_vm2, %v2445_v27, 0.0  ;;  %v814_v12 = vsel %vm308_vm2, %v2553_v18, 0.0  ;;  %v873_v61 = vsel %vm308_vm2, %v2673_v21, 0.0  ;;  %v700_v28 = vmul.f32 %v3756_v9, %v3756_v9 }
  0xa2   :  { %v870_v57 = vadd.f32 %v869_v44, %v868_v1  ;;  %v754_v29 = vadd.f32 %v753_v62, %v752_v3  ;;  %v813_v24 = vadd.f32 %v812_v5, %v811_v16  ;;  %v701_v44 = vmul.f32 %v3757_v43, %v3757_v43  ;;  %v3758_v1 = vld [vmem:[#allocation99_spill] sm:$0xff]  ;;  %v3759_v5 = vld [vmem:[#allocation100_spill] sm:$0xff]  ;;  %v3760_v3 = vld [vmem:[#allocation101_spill] sm:$0xff] }
  0xa3   :  { %v757_v49 = vsel %vm308_vm2, %v2449_v30, 0.0  ;;  %v816_v27 = vsel %vm308_vm2, %v2557_v37, 0.0  ;;  %v875_v18 = vsel %vm308_vm2, %v2681_v17, 0.0  ;;  %v2836_v21 = vmul.f32 %v3758_v1, %v3758_v1 }
  0xa4   :  { %v872_v10 = vadd.f32 %v871_v59, %v870_v57  ;;  %v756_v13 = vadd.f32 %v755_v19, %v754_v29  ;;  %v815_v25 = vadd.f32 %v814_v12, %v813_v24  ;;  %v2840_v59 = vmul.f32 %v3759_v5, %v3759_v5  ;;  %v3762_v24 = vld [vmem:[#allocation103_spill] sm:$0xff] }
  0xa5   :  { %v759_v30 = vsel %vm308_vm2, %v2453_v4, 0.0  ;;  %v818_v37 = vsel %vm308_vm2, %v2561_v47, 0.0  ;;  %v877_v17 = vsel %vm308_vm2, %v2685_v22, 0.0  ;;  %v2850_v16 = vmul.f32 %v3760_v3, %v3760_v3 }
  0xa6   :  { %v874_v62 = vadd.f32 %v873_v61, %v872_v10  ;;  %v758_v57 = vadd.f32 %v757_v49, %v756_v13  ;;  %v817_v19 = vadd.f32 %v816_v27, %v815_v25  ;;  %v3761_v61 = vld [vmem:[#allocation102_spill] sm:$0xff]  ;;  %v761_v4 = vsel %vm308_vm2, %v2457_v48, 0.0 }
  0xa7   :  { %v2854_v29 = vmul.f32 %v3761_v61, %v3761_v61  ;;  %v820_v47 = vsel %vm308_vm2, %v2565_v2, 0.0  ;;  %v879_v22 = vsel %vm308_vm2, %v2689_v7, 0.0  ;;  %v2864_v10 = vmul.f32 %v3762_v24, %v3762_v24 }
  0xa8   :  { %v876_v12 = vadd.f32 %v875_v18, %v874_v62  ;;  %v760_v49 = vadd.f32 %v759_v30, %v758_v57  ;;  %v819_v27 = vadd.f32 %v818_v37, %v817_v19  ;;  %v763_v13 = vsel %vm308_vm2, %v2461_v33, 0.0 }
  0xa9   :  { %v765_v25 = vsel %vm308_vm2, %v2465_v53, 0.0  ;;  %v822_v48 = vsel %vm308_vm2, %v2569_v20, 0.0  ;;  %v881_v2 = vsel %vm308_vm2, %v2695_v11, 0.0  ;;  %v935_v24 = vsel %vm308_vm2, %v696_v0, 0.0 }
  0xaa   :  { %v878_v18 = vadd.f32 %v877_v17, %v876_v12  ;;  %v762_v7 = vadd.f32 %v761_v4, %v760_v49  ;;  %v821_v62 = vadd.f32 %v820_v47, %v819_v27  ;;  %v824_v30 = vsel %vm308_vm2, %v2573_v45, 0.0 }
  0xab   :  { %v883_v33 = vsel %vm308_vm2, %v2699_v39, 0.0  ;;  %v936_v37 = vsel %vm308_vm2, %v697_v32, 0.0  ;;  %v938_v53 = vsel %vm308_vm2, %v698_v41, 0.0  ;;  %v767_v11 = vsel %vm308_vm2, %v2469_v54, 0.0 }
  0xac   :  { %v880_v61 = vadd.f32 %v879_v22, %v878_v18  ;;  %v764_v17 = vadd.f32 %v763_v13, %v762_v7  ;;  %v823_v20 = vadd.f32 %v822_v48, %v821_v62  ;;  %v937_v19 = vadd.f32 %v936_v37, %v935_v24 }
  0xad   :  { %v826_v0 = vsel %vm308_vm2, %v2577_v15, 0.0  ;;  %v885_v45 = vsel %vm308_vm2, %v2703_v52, 0.0  ;;  %v940_v12 = vsel %vm308_vm2, %v699_v63, 0.0  ;;  %v769_v41 = vsel %vm308_vm2, %v2473_v42, 0.0 }
  0xae   :  { %v882_v57 = vadd.f32 %v881_v2, %v880_v61  ;;  %v766_v39 = vadd.f32 %v765_v25, %v764_v17  ;;  %v825_v4 = vadd.f32 %v824_v30, %v823_v20  ;;  %v939_v47 = vadd.f32 %v938_v53, %v937_v19  ;;  %v3764_v30 = vld [vmem:[#allocation133_spill] sm:$0xff] }
  0xaf   :  { %v828_v61 = vsel %vm308_vm2, %v2581_v51, 0.0  ;;  %v887_v54 = vsel %vm308_vm2, %v2715_v14, 0.0  ;;  %v942_v15 = vsel %vm308_vm2, %v700_v28, 0.0  ;;  %v771_v63 = vsel %vm308_vm2, %v2477_v31, 0.0  ;;  %v3763_v28 = vld [vmem:[#allocation132_spill] sm:$0xff] }
  0xb0   :  { %v884_v32 = vadd.f32 %v883_v33, %v882_v57  ;;  %v768_v22 = vadd.f32 %v767_v11, %v766_v39  ;;  %v827_v24 = vadd.f32 %v826_v0, %v825_v4  ;;  %v941_v49 = vadd.f32 %v940_v12, %v939_v47  ;;  %v3765_v57 = vld [vmem:[#allocation104_spill] sm:$0xff]  ;;  %v3766_v39 = vld [vmem:[#allocation134_spill] sm:$0xff] }
  0xb1   :  { %v830_v27 = vsel %vm308_vm2, %v2585_v56, 0.0  ;;  %v889_v42 = vsel %vm308_vm2, %v2719_v26, 0.0  ;;  %v944_v51 = vsel %vm308_vm2, %v701_v44, 0.0  ;;  %v773_v48 = vsel %vm308_vm2, %v3763_v28, 0.0  ;;  %v3773_v28 = vld [vmem:[#allocation130_spill] sm:$0xff] }
  0xb2   :  { %v886_v52 = vadd.f32 %v885_v45, %v884_v32  ;;  %v770_v18 = vadd.f32 %v769_v41, %v768_v22  ;;  %v829_v13 = vadd.f32 %v828_v61, %v827_v24  ;;  %v943_v25 = vadd.f32 %v942_v15, %v941_v49  ;;  %v3767_v32 = vld [vmem:[#allocation141_spill] sm:$0xff]  ;;  %v3769_v22 = vld [vmem:[#allocation106_spill] sm:$0xff] }
  0xb3   :  { %v832_v2 = vsel %vm308_vm2, %v2590_v6, 0.0  ;;  %v891_v31 = vsel %vm308_vm2, %v2723_v23, 0.0  ;;  %v946_v56 = vsel %vm308_vm2, %v2836_v21, 0.0  ;;  %v775_v33 = vsel %vm308_vm2, %v3764_v30, 0.0 }
  0xb4   :  { %v888_v14 = vadd.f32 %v887_v54, %v886_v52  ;;  %v772_v7 = vadd.f32 %v771_v63, %v770_v18  ;;  %v831_v26 = vadd.f32 %v830_v27, %v829_v13  ;;  %v945_v44 = vadd.f32 %v944_v51, %v943_v25  ;;  %v3770_v52 = vld [vmem:[#allocation142_spill] sm:$0xff]  ;;  %v3771_v18 = vld [vmem:[#allocation135_spill] sm:$0xff] }
  0xb5   :  { %v834_v37 = vsel %vm308_vm2, %v2596_v38, 0.0  ;;  %v893_v53 = vsel %vm308_vm2, %v2727_v46, 0.0  ;;  %v948_v6 = vsel %vm308_vm2, %v2840_v59, 0.0  ;;  %v707_v19 = vmul.f32 %v3765_v57, %v3765_v57 }
  0xb6   :  { %v890_v62 = vadd.f32 %v889_v42, %v888_v14  ;;  %v774_v23 = vadd.f32 %v773_v48, %v772_v7  ;;  %v833_v17 = vadd.f32 %v832_v2, %v831_v26  ;;  %v947_v21 = vadd.f32 %v946_v56, %v945_v44  ;;  %v3772_v14 = vld [vmem:[#allocation143_spill] sm:$0xff]  ;;  %v3775_v26 = vld [vmem:[#allocation108_spill] sm:$0xff] }
  0xb7   :  { %v836_v11 = vsel %vm308_vm2, %v2600_v8, 0.0  ;;  %v895_v0 = vsel %vm308_vm2, %v2735_v55, 0.0  ;;  %v950_v38 = vsel %vm308_vm2, %v2850_v16, 0.0  ;;  %v777_v4 = vsel %vm308_vm2, %v3766_v39, 0.0  ;;  %v3768_v55 = vld [vmem:[#allocation105_spill] sm:$0xff]  ;;  %v3776_v44 = vld [vmem:[#allocation144_spill] sm:$0xff] }
  0xb8   :  { %v892_v20 = vadd.f32 %v891_v31, %v890_v62  ;;  %v776_v46 = vadd.f32 %v775_v33, %v774_v23  ;;  %v835_v45 = vadd.f32 %v834_v37, %v833_v17  ;;  %v949_v59 = vadd.f32 %v948_v6, %v947_v21  ;;  %v3774_v31 = vld [vmem:[#allocation107_spill] sm:$0xff]  ;;  %v3778_v21 = vld [vmem:[#allocation136_spill] sm:$0xff] }
  0xb9   :  { %v838_v47 = vsel %vm308_vm2, %v3767_v32, 0.0  ;;  %v897_v41 = vsel %vm308_vm2, %v2739_v36, 0.0  ;;  %v952_v8 = vsel %vm308_vm2, %v2854_v29, 0.0  ;;  %v708_v61 = vmul.f32 %v3768_v55, %v3768_v55  ;;  %v3777_v33 = vld [vmem:[#allocation131_spill] sm:$0xff]  ;;  %v3781_v32 = vld [vmem:[#allocation110_spill] sm:$0xff] }
  0xba   :  { %v894_v12 = vadd.f32 %v893_v53, %v892_v20  ;;  %v837_v16 = vadd.f32 %v836_v11, %v835_v45  ;;  %v951_v15 = vadd.f32 %v950_v38, %v949_v59  ;;  %v709_v24 = vmul.f32 %v3769_v22, %v3769_v22  ;;  %v3779_v11 = vld [vmem:[#allocation145_spill] sm:$0xff] }
  0xbb   :  { %v840_v49 = vsel %vm308_vm2, %v3770_v52, 0.0  ;;  %v899_v63 = vsel %vm308_vm2, %v2743_v34, 0.0  ;;  %v954_v36 = vsel %vm308_vm2, %v2864_v10, 0.0  ;;  %v778_v27 = vadd.f32 %v777_v4, %v776_v46  ;;  %v3780_v45 = vld [vmem:[#allocation109_spill] sm:$0xff] }
  0xbc   :  { %v896_v54 = vadd.f32 %v895_v0, %v894_v12  ;;  %v839_v29 = vadd.f32 %v838_v47, %v837_v16  ;;  %v953_v51 = vadd.f32 %v952_v8, %v951_v15  ;;  %v779_v13 = vsel %vm308_vm2, %v3771_v18, 0.0  ;;  %v3783_v52 = vld [vmem:[#allocation137_spill] sm:$0xff] }
  0xbd   :  { %v842_v25 = vsel %vm308_vm2, %v3772_v14, 0.0  ;;  %v901_v48 = vsel %vm308_vm2, %v3773_v28, 0.0  ;;  %v956_v2 = vsel %vm308_vm2, %v707_v19, 0.0  ;;  %v710_v34 = vmul.f32 %v3774_v31, %v3774_v31 }
  0xbe   :  { %v898_v42 = vadd.f32 %v897_v41, %v896_v54  ;;  %v841_v56 = vadd.f32 %v840_v49, %v839_v29  ;;  %v955_v7 = vadd.f32 %v954_v36, %v953_v51  ;;  %v711_v62 = vmul.f32 %v3775_v26, %v3775_v26  ;;  %v3782_v41 = vld [vmem:[#allocation146_spill] sm:$0xff]  ;;  %v3786_v51 = vld [vmem:[#allocation111_spill] sm:$0xff] }
  0xbf   :  { %v844_v30 = vsel %vm308_vm2, %v3776_v44, 0.0  ;;  %v903_v37 = vsel %vm308_vm2, %v3777_v33, 0.0  ;;  %v958_v53 = vsel %vm308_vm2, %v708_v61, 0.0  ;;  %v780_v6 = vadd.f32 %v779_v13, %v778_v27  ;;  %v3785_v27 = vld [vmem:[#allocation152_spill] sm:$0xff]  ;;  %v3790_v33 = vld [vmem:[#allocation138_spill] sm:$0xff] }
  0xc0   :  { %v900_v10 = vadd.f32 %v899_v63, %v898_v42  ;;  %v843_v23 = vadd.f32 %v842_v25, %v841_v56  ;;  %v957_v20 = vadd.f32 %v956_v2, %v955_v7  ;;  %v781_v19 = vsel %vm308_vm2, %v3778_v21, 0.0  ;;  %v3784_v63 = vld [vmem:[#allocation147_spill] sm:$0xff]  ;;  %v3787_v25 = vld [vmem:[#allocation112_spill] sm:$0xff] }
  0xc1   :  { %v846_v0 = vsel %vm308_vm2, %v3779_v11, 0.0  ;;  %v905_v38 = vsel %vm308_vm2, %v2759_v35, 0.0  ;;  %v960_v46 = vsel %vm308_vm2, %v709_v24, 0.0  ;;  %v712_v12 = vmul.f32 %v3780_v45, %v3780_v45  ;;  %v3793_v21 = vld [vmem:[#allocation115_spill] sm:$0xff] }
  0xc2   :  { %v902_v17 = vadd.f32 %v901_v48, %v900_v10  ;;  %v845_v59 = vadd.f32 %v844_v30, %v843_v23  ;;  %v959_v4 = vadd.f32 %v958_v53, %v957_v20  ;;  %v713_v47 = vmul.f32 %v3781_v32, %v3781_v32  ;;  %v3788_v48 = vld [vmem:[#allocation148_spill] sm:$0xff]  ;;  %v3791_v53 = vld [vmem:[#allocation149_spill] sm:$0xff]  ;;  %v3792_v23 = vld [vmem:[#allocation154_spill] sm:$0xff] }
  0xc3   :  { %v848_v8 = vsel %vm308_vm2, %v3782_v41, 0.0  ;;  %v907_v61 = vsel %vm308_vm2, %v2763_v40, 0.0  ;;  %v962_v16 = vsel %vm308_vm2, %v710_v34, 0.0  ;;  %v782_v35 = vadd.f32 %v781_v19, %v780_v6  ;;  %v3789_v34 = vld [vmem:[#allocation153_spill] sm:$0xff] }
  0xc4   :  { %v904_v39 = vadd.f32 %v903_v37, %v902_v17  ;;  %v847_v54 = vadd.f32 %v846_v0, %v845_v59  ;;  %v961_v24 = vadd.f32 %v960_v46, %v959_v4  ;;  %v783_v49 = vsel %vm308_vm2, %v3783_v52, 0.0  ;;  %v3794_v46 = vld [vmem:[#allocation113_spill] sm:$0xff]  ;;  %v3795_v59 = vld [vmem:[#allocation116_spill] sm:$0xff]  ;;  %v3796_v4 = vld [vmem:[#allocation155_spill] sm:$0xff] }
  0xc5   :  { %v850_v36 = vsel %vm308_vm2, %v3784_v63, 0.0  ;;  %v909_v29 = vsel %vm308_vm2, %v3785_v27, 0.0  ;;  %v964_v42 = vsel %vm308_vm2, %v711_v62, 0.0  ;;  %v714_v40 = vmul.f32 %v3786_v51, %v3786_v51  ;;  %v3800_v27 = vld [vmem:[#allocation118_spill] sm:$0xff] }
  0xc6   :  { %v906_v15 = vadd.f32 %v905_v38, %v904_v39  ;;  %v849_v18 = vadd.f32 %v848_v8, %v847_v54  ;;  %v963_v14 = vadd.f32 %v962_v16, %v961_v24  ;;  %v715_v28 = vmul.f32 %v3787_v25, %v3787_v25  ;;  %v3797_v54 = vld [vmem:[#allocation139_spill] sm:$0xff]  ;;  %v3798_v24 = vld [vmem:[#allocation150_spill] sm:$0xff] }
  0xc7   :  { %v852_v2 = vsel %vm308_vm2, %v3788_v48, 0.0  ;;  %v911_v56 = vsel %vm308_vm2, %v3789_v34, 0.0  ;;  %v966_v10 = vsel %vm308_vm2, %v712_v12, 0.0  ;;  %v784_v7 = vadd.f32 %v783_v49, %v782_v35  ;;  %v3799_v49 = vld [vmem:[#allocation156_spill] sm:$0xff] }
  0xc8   :  { %v908_v13 = vadd.f32 %v907_v61, %v906_v15  ;;  %v851_v44 = vadd.f32 %v850_v36, %v849_v18  ;;  %v965_v30 = vadd.f32 %v964_v42, %v963_v14  ;;  %v785_v37 = vsel %vm308_vm2, %v3790_v33, 0.0  ;;  %v3801_v42 = vld [vmem:[#allocation120_spill] sm:$0xff]  ;;  %v3802_v14 = vld [vmem:[#allocation117_spill] sm:$0xff] }
  0xc9   :  { %v854_v6 = vsel %vm308_vm2, %v3791_v53, 0.0  ;;  %v913_v17 = vsel %vm308_vm2, %v3792_v23, 0.0  ;;  %v968_v20 = vsel %vm308_vm2, %v713_v47, 0.0  ;;  %v692_v19 = vmul.f32 %v3793_v21, %v3793_v21  ;;  %v3805_v33 = vld [vmem:[#allocation140_spill] sm:$0xff]  ;;  %v3806_v53 = vld [vmem:[#allocation151_spill] sm:$0xff] }
  0xca   :  { %v910_v62 = vadd.f32 %v909_v29, %v908_v13  ;;  %v853_v11 = vadd.f32 %v852_v2, %v851_v44  ;;  %v967_v38 = vadd.f32 %v966_v10, %v965_v30  ;;  %v716_v12 = vmul.f32 %v3794_v46, %v3794_v46  ;;  %v3803_v2 = vld [vmem:[#allocation119_spill] sm:$0xff] }
  0xcb   :  { %v717_v39 = vmul.f32 %v3795_v59, %v3795_v59  ;;  %v915_v41 = vsel %vm308_vm2, %v3796_v4, 0.0  ;;  %v970_v8 = vsel %vm308_vm2, %v714_v40, 0.0  ;;  %v786_v61 = vadd.f32 %v785_v37, %v784_v7 }
  0xcc   :  { %v912_v0 = vadd.f32 %v911_v56, %v910_v62  ;;  %v855_v16 = vadd.f32 %v854_v6, %v853_v11  ;;  %v969_v35 = vadd.f32 %v968_v20, %v967_v38  ;;  %v787_v15 = vsel %vm308_vm2, %v3797_v54, 0.0  ;;  %v3804_v56 = vld [vmem:[#allocation157_spill] sm:$0xff]  ;;  %v3809_v54 = vld [vmem:[#allocation123_spill] sm:$0xff] }
  0xcd   :  { %v856_v52 = vsel %vm308_vm2, %v3798_v24, 0.0  ;;  %v917_v63 = vsel %vm308_vm2, %v3799_v49, 0.0  ;;  %v972_v36 = vsel %vm308_vm2, %v715_v28, 0.0  ;;  %v693_v29 = vmul.f32 %v3800_v27, %v3800_v27  ;;  %v3810_v49 = vld [vmem:[#allocation124_spill] sm:$0xff] }
  0xce   :  { %v914_v47 = vadd.f32 %v913_v17, %v912_v0  ;;  %v694_v40 = vmul.f32 %v3801_v42, %v3801_v42  ;;  %v971_v13 = vadd.f32 %v970_v8, %v969_v35  ;;  %v718_v48 = vmul.f32 %v3802_v14, %v3802_v14  ;;  %v3807_v0 = vld [vmem:[#allocation122_spill] sm:$0xff] }
  0xcf   :  { %v719_v34 = vmul.f32 %v3803_v2, %v3803_v2  ;;  %v919_v10 = vsel %vm308_vm2, %v3804_v56, 0.0  ;;  %v974_v7 = vsel %vm308_vm2, %v716_v12, 0.0  ;;  %v788_v28 = vadd.f32 %v787_v15, %v786_v61  ;;  %v3808_v12 = vld [vmem:[#allocation121_spill] sm:$0xff] }
  0xd0   :  { %v916_v18 = vadd.f32 %v915_v41, %v914_v47  ;;  %v857_v44 = vadd.f32 %v856_v52, %v855_v16  ;;  %v973_v30 = vadd.f32 %v972_v36, %v971_v13  ;;  %v789_v37 = vsel %vm308_vm2, %v3805_v33, 0.0 }
  0xd1   :  { %v858_v6 = vsel %vm308_vm2, %v3806_v53, 0.0  ;;  %v921_v23 = vsel %vm308_vm2, %v692_v19, 0.0  ;;  %v976_v17 = vsel %vm308_vm2, %v717_v39, 0.0  ;;  %v695_v38 = vmul.f32 %v3807_v0, %v3807_v0 }
  0xd2   :  { %v918_v62 = vadd.f32 %v917_v63, %v916_v18  ;;  %v975_v11 = vadd.f32 %v974_v7, %v973_v30  ;;  %v720_v4 = vmul.f32 %v3808_v12, %v3808_v12  ;;  %v923_v41 = vsel %vm308_vm2, %v693_v29, 0.0 }
  0xd3   :  { %v978_v8 = vsel %vm308_vm2, %v718_v48, 0.0  ;;  %v790_v61 = vadd.f32 %v789_v37, %v788_v28  ;;  %v859_v16 = vadd.f32 %v858_v6, %v857_v44  ;;  %v721_v19 = vmul.f32 %v3809_v54, %v3809_v54  ;;  %v3812_v44 = vld [vmem:[#allocation126_spill] sm:$0xff] }
  0xd4   :  { %v920_v20 = vadd.f32 %v919_v10, %v918_v62  ;;  %v977_v35 = vadd.f32 %v976_v17, %v975_v11  ;;  %v925_v39 = vsel %vm308_vm2, %v694_v40, 0.0  ;;  %v980_v15 = vsel %vm308_vm2, %v719_v34, 0.0  ;;  %v3811_v10 = vld [vmem:[#allocation125_spill] sm:$0xff] }
  0xd5   :  { %v722_v63 = vmul.f32 %v3810_v49, %v3810_v49  ;;  %v927_v36 = vsel %vm308_vm2, %v695_v38, 0.0  ;;  %v982_v29 = vsel %vm308_vm2, %v720_v4, 0.0  ;;  %v791_v18 = vrot.slane %v790_v61, 4  ;;  %v3814_v38 = vld [vmem:[#allocation128_spill] sm:$0xff] }
  0xd6   :  { %v922_v47 = vadd.f32 %v921_v23, %v920_v20  ;;  %v979_v52 = vadd.f32 %v978_v8, %v977_v35  ;;  %v860_v13 = vrot.slane %v859_v16, 4  ;;  %v723_v7 = vmul.f32 %v3811_v10, %v3811_v10  ;;  %v3813_v23 = vld [vmem:[#allocation127_spill] sm:$0xff] }
  0xd7   :  { %v984_v40 = vsel %vm308_vm2, %v721_v19, 0.0  ;;  %v724_v62 = vmul.f32 %v3812_v44, %v3812_v44  ;;  %v986_v30 = vsel %vm308_vm2, %v722_v63, 0.0  ;;  %v792_v33 = vadd.f32 %v791_v18, %v790_v61  ;;  %v3816_v18 = vld [vmem:[#allocation66_spill] sm:$0xff] }
  0xd8   :  { %v924_v24 = vadd.f32 %v923_v41, %v922_v47  ;;  %v981_v56 = vadd.f32 %v980_v15, %v979_v52  ;;  %v861_v37 = vadd.f32 %v860_v13, %v859_v16  ;;  %v725_v17 = vmul.f32 %v3813_v23, %v3813_v23  ;;  %v3817_v13 = vld [vmem:[#allocation2_spill] sm:$0xff] }
  0xd9   :  { %v988_v20 = vsel %vm308_vm2, %v723_v7, 0.0  ;;  %v726_v4 = vmul.f32 %v3814_v38, %v3814_v38  ;;  %v990_v8 = vsel %vm308_vm2, %v724_v62, 0.0  ;;  %v793_v47 = vrot.slane %v792_v33, 2 }
  0xda   :  { %v926_v48 = vadd.f32 %v925_v39, %v924_v24  ;;  %v983_v34 = vadd.f32 %v982_v29, %v981_v56  ;;  %v862_v35 = vrot.slane %v861_v37, 2  ;;  %v3815_v39 = vld [vmem:[#allocation129_spill] sm:$0xff]  ;;  %v992_v16 = vsel %vm308_vm2, %v725_v17, 0.0 }
  0xdb   :  { %v727_v61 = vmul.f32 %v3815_v39, %v3815_v39  ;;  %v994_v52 = vsel %vm308_vm2, %v726_v4, 0.0  ;;  %v794_v63 = vadd.f32 %v793_v47, %v792_v33  ;;  %v3821_v4 = vld [vmem:[#allocation4_spill] sm:$0xff]  ;;  %v3822_v47 = vld [vmem:[#allocation69_spill] sm:$0xff] }
  0xdc   :  { %v928_v28 = vadd.f32 %v927_v36, %v926_v48  ;;  %v985_v6 = vadd.f32 %v984_v40, %v983_v34  ;;  %v863_v36 = vadd.f32 %v862_v35, %v861_v37  ;;  %v1014_v48 = vsub.f32 %v3817_v13, %v3816_v18  ;;  %v3818_v40 = vld [vmem:[#allocation67_spill] sm:$0xff]  ;;  %v3823_v35 = vld [vmem:[#allocation5_spill] sm:$0xff] }
  0xdd   :  { %v996_v56 = vsel %vm308_vm2, %v727_v61, 0.0  ;;  %v3825_v61 = vld [vmem:[#allocation6_spill] sm:$0xff]  ;;  %v3826_v13 = vld [vmem:[#allocation71_spill] sm:$0xff] }
  0xde   :  { %v929_v53 = vrot.slane %v928_v28, 4  ;;  %v987_v11 = vadd.f32 %v986_v30, %v985_v6  ;;  %v795_v30 = vrot.slane %v794_v63, 1  ;;  %v1078_v17 = vand.u32 2147483647, %v1014_v48  ;;  %v3827_v48 = vld [vmem:[#allocation7_spill] sm:$0xff] }
  0xe0   :  { %v930_v41 = vadd.f32 %v929_v53, %v928_v28  ;;  %v989_v19 = vadd.f32 %v988_v20, %v987_v11  ;;  %v3819_v28 = vld [vmem:[#allocation3_spill] sm:$0xff]  ;;  %v864_v53 = vrot.slane %v863_v36, 1  ;;  %v3820_v11 = vld [vmem:[#allocation68_spill] sm:$0xff] }
  0xe1   :  { %v1015_v34 = vsub.f32 %v3819_v28, %v3818_v40  ;;  %v1016_v33 = vsub.f32 %v3821_v4, %v3820_v11 }
  0xe2   :  { %v991_v15 = vadd.f32 %v990_v8, %v989_v19  ;;  %v931_v24 = vrot.slane %v930_v41, 2  ;;  %v1017_v19 = vsub.f32 %v3823_v35, %v3822_v47  ;;  %v3828_v35 = vld [vmem:[#allocation72_spill] sm:$0xff] }
  0xe3   :  { %v1079_v37 = vand.u32 2147483647, %v1015_v34 }
  0xe4   :  { %v993_v29 = vadd.f32 %v992_v16, %v991_v15  ;;  %v932_v62 = vadd.f32 %v931_v24, %v930_v41  ;;  %v3824_v16 = vld [vmem:[#allocation70_spill] sm:$0xff]  ;;  %v1143_v41 = vsel %vm308_vm2, %v1078_v17, 0.0  ;;  %v1081_v34 = vand.u32 2147483647, %v1017_v19 }
  0xe5   :  { %v1018_v15 = vsub.f32 %v3825_v61, %v3824_v16  ;;  %v1144_v40 = vsel %vm308_vm2, %v1079_v37, 0.0  ;;  %v3829_v16 = vld [vmem:[#allocation8_spill] sm:$0xff]  ;;  %v3832_v17 = vld [vmem:[#allocation74_spill] sm:$0xff] }
  0xe6   :  { %v995_v7 = vadd.f32 %v994_v52, %v993_v29  ;;  %v933_v8 = vrot.slane %v932_v62, 1  ;;  %v796_v52 = vadd.f32 %v795_v30, %v794_v63  ;;  %v865_v29 = vadd.f32 %v864_v53, %v863_v36  ;;  %v3830_v30 = vld [vmem:[#allocation73_spill] sm:$0xff] }
  0xe7   :  { %v1145_v11 = vadd.f32 %v1144_v40, %v1143_v41  ;;  %v1020_v63 = vsub.f32 %v3829_v16, %v3828_v35  ;;  %v1082_v36 = vand.u32 2147483647, %v1018_v15  ;;  %v3831_v53 = vld [vmem:[#allocation9_spill] sm:$0xff]  ;;  %v1148_v15 = vsel %vm308_vm2, %v1081_v34, 0.0  ;;  %v599_v41 = vld [vmem:[%s3274_s3] sm:$0xf] }
  0xe8   :  { %v997_v6 = vadd.f32 %v996_v56, %v995_v7  ;;  %v1019_v56 = vsub.f32 %v3827_v48, %v3826_v13  ;;  %v1080_v7 = vand.u32 2147483647, %v1016_v33  ;;  %v934_v28 = vadd.f32 %v933_v8, %v932_v62  ;;  %v3834_v33 = vld [vmem:[#allocation93_spill] sm:$0xff]  ;;  %v3835_v48 = vld [vmem:[#allocation34_spill] sm:$0xff]  ;;  %v3837_v40 = vld [vmem:[#allocation36_spill] sm:$0xff] }
  0xe9   :  { %v1008_v47 = vsel %vm589_vm3, %v865_v29, %v796_v52  ;;  %v1046_v37 = vsub.f32 %v3835_v48, %v3834_v33  ;;  %v3836_v52 = vld [vmem:[#allocation35_spill] sm:$0xff]  ;;  %v1048_v35 = vsub.f32 %v3837_v40, %v3754_v50  ;;  %v1084_v16 = vand.u32 2147483647, %v1020_v63 }
  0xea   :  { %v998_v20 = vrot.slane %v997_v6, 4  ;;  %v1083_v62 = vand.u32 2147483647, %v1019_v56  ;;  %v1146_v8 = vsel %vm308_vm2, %v1080_v7, 0.0  ;;  %v1009_v19 = vsel %vm591_vm4, %v934_v28, %v1008_v47  ;;  %v3838_v7 = vld [vmem:[#allocation75_spill] sm:$0xff]  ;;  %v3840_v47 = vld [vmem:[#allocation76_spill] sm:$0xff] }
  0xeb   :  { %v1047_v29 = vsub.f32 %v3836_v52, %v3753_v58  ;;  %v1150_v56 = vsel %vm308_vm2, %v1082_v36, 0.0  ;;  %v1110_v48 = vand.u32 2147483647, %v1046_v37  ;;  %v1112_v40 = vand.u32 2147483647, %v1048_v35  ;;  %v3849_v35 = vld [vmem:[#allocation40_spill] sm:$0xff] }
  0xec   :  { %v999_v18 = vadd.f32 %v998_v20, %v997_v6  ;;  %v1021_v6 = vsub.f32 %v3831_v53, %v3830_v30  ;;  %v3833_v20 = vld [vmem:[#allocation10_spill] sm:$0xff]  ;;  %v3839_v30 = vld [vmem:[#allocation11_spill] sm:$0xff]  ;;  %v3841_v53 = vld [vmem:[#allocation12_spill] sm:$0xff]  ;;  %v1152_v50 = vsel %vm308_vm2, %v1083_v62, 0.0 }
  0xed   :  { %v1022_v61 = vsub.f32 %v3833_v20, %v3832_v17  ;;  %v1023_v28 = vsub.f32 %v3839_v30, %v3838_v7  ;;  %v1024_v58 = vsub.f32 %v3841_v53, %v3840_v47  ;;  %v1111_v52 = vand.u32 2147483647, %v1047_v29 }
  0xee   :  { %v1000_v24 = vrot.slane %v999_v18, 2  ;;  %v1085_v33 = vand.u32 2147483647, %v1021_v6  ;;  %v1154_v7 = vsel %vm308_vm2, %v1084_v16, 0.0  ;;  %v3847_v6 = vld [vmem:[#allocation14_spill] sm:$0xff]  ;;  %v1052_v16 = vsub.f32 %v3849_v35, %v3758_v1 }
  0xef   :  { %v1086_v36 = vand.u32 2147483647, %v1022_v61  ;;  %v3848_v61 = vld [vmem:[#allocation39_spill] sm:$0xff] }
  0xf0   :  { %v1001_v4 = vadd.f32 %v1000_v24, %v999_v18  ;;  %v1147_v18 = vadd.f32 %v1146_v8, %v1145_v11  ;;  %v3842_v11 = vld [vmem:[#allocation37_spill] sm:$0xff]  ;;  %v1051_v37 = vsub.f32 %v3848_v61, %v3757_v43  ;;  %v3851_v43 = vld [vmem:[#allocation15_spill] sm:$0xff] }
  0xf1   :  { %v1049_v34 = vsub.f32 %v3842_v11, %v3755_v60  ;;  %v3844_v60 = vld [vmem:[#allocation77_spill] sm:$0xff]  ;;  %v1158_v53 = vsel %vm308_vm2, %v1086_v36, 0.0  ;;  %v1212_v11 = vsel %vm308_vm2, %v1110_v48, 0.0  ;;  %v3854_v48 = vld [vmem:[#allocation16_spill] sm:$0xff] }
  0xf2   :  { %v1002_v13 = vrot.slane %v1001_v4, 1  ;;  %v1149_v17 = vadd.f32 %v1148_v15, %v1147_v18  ;;  %v3857_v61 = vld [vmem:[#allocation17_spill] sm:$0xff] }
  0xf3   :  { %v1113_v29 = vand.u32 2147483647, %v1049_v34  ;;  %v3852_v34 = vld [vmem:[#allocation41_spill] sm:$0xff] }
  0xf4   :  { %v1003_v24 = vadd.f32 %v1002_v13, %v1001_v4  ;;  %v3843_v4 = vld [vmem:[#allocation38_spill] sm:$0xff]  ;;  %v1151_v8 = vadd.f32 %v1150_v56, %v1149_v17  ;;  %v1088_v56 = vand.u32 2147483647, %v1024_v58  ;;  %v1213_v17 = vsel %vm308_vm2, %v1111_v52, 0.0 }
  0xf5   :  { %v1050_v13 = vsub.f32 %v3843_v4, %v3756_v9  ;;  %v3846_v9 = vld [vmem:[#allocation78_spill] sm:$0xff]  ;;  %v3850_v4 = vld [vmem:[#allocation79_spill] sm:$0xff]  ;;  %v1115_v58 = vand.u32 2147483647, %v1051_v37  ;;  %v1217_v36 = vsel %vm308_vm2, %v1113_v29, 0.0 }
  0xf6   :  { %v1010_v20 = vsel %vm593_vm5, %v1003_v24, %v1009_v19  ;;  %v3845_v19 = vld [vmem:[#allocation13_spill] sm:$0xff]  ;;  %v1026_v15 = vsub.f32 %v3847_v6, %v3846_v9  ;;  %v1153_v62 = vadd.f32 %v1152_v50, %v1151_v8  ;;  %v1156_v24 = vsel %vm308_vm2, %v1085_v33, 0.0  ;;  %v3853_v8 = vld [vmem:[#allocation80_spill] sm:$0xff]  ;;  %v3855_v52 = vld [vmem:[#allocation42_spill] sm:$0xff] }
  0xf7   :  { %v1012_v63 = vadd.f32 %v1010_v20, %v599_v41  ;;  %v1025_v18 = vsub.f32 %v3845_v19, %v3844_v60  ;;  %v1087_v41 = vand.u32 2147483647, %v1023_v28  ;;  %v1114_v30 = vand.u32 2147483647, %v1050_v13 }
  0xf8   :  { %v1155_v47 = vadd.f32 %v1154_v7, %v1153_v62  ;;  %v1215_v20 = vsel %vm308_vm2, %v1112_v40, 0.0  ;;  %v1027_v28 = vsub.f32 %v3851_v43, %v3850_v4  ;;  %v1053_v33 = vsub.f32 %v3852_v34, %v3759_v5  ;;  %v3863_v4 = vld [vmem:[#allocation44_spill] sm:$0xff] }
  0xf9   :  { %1013 = vst.msk [vmem:[%s3274_s3] sm:$0xf] %vm18_vm0, %v1012_v63  ;;  %v1214_v63 = vadd.f32 %v1213_v17, %v1212_v11  ;;  %v1089_v1 = vand.u32 2147483647, %v1025_v18  ;;  %v1160_v13 = vsel %vm308_vm2, %v1087_v41, 0.0  ;;  %v1028_v7 = vsub.f32 %v3854_v48, %v3853_v8  ;;  %v3856_v18 = vld [vmem:[#allocation81_spill] sm:$0xff] }
  0xfa   :  { %v1157_v50 = vadd.f32 %v1156_v24, %v1155_v47  ;;  %v1054_v40 = vsub.f32 %v3855_v52, %v3760_v3  ;;  %v1090_v9 = vand.u32 2147483647, %v1026_v15  ;;  %v1116_v6 = vand.u32 2147483647, %v1052_v16  ;;  %v3858_v41 = vld [vmem:[#allocation102_spill] sm:$0xff]  ;;  %v3859_v24 = vld [vmem:[#allocation43_spill] sm:$0xff] }
  0xfb   :  { %v1216_v19 = vadd.f32 %v1215_v20, %v1214_v63  ;;  %v1162_v5 = vsel %vm308_vm2, %v1088_v56, 0.0  ;;  %v1219_v62 = vsel %vm308_vm2, %v1114_v30, 0.0  ;;  %v1029_v37 = vsub.f32 %v3857_v61, %v3856_v18  ;;  %v3860_v15 = vld [vmem:[#allocation82_spill] sm:$0xff]  ;;  %v3862_v56 = vld [vmem:[#allocation103_spill] sm:$0xff] }
  0xfc   :  { %v1159_v60 = vadd.f32 %v1158_v53, %v1157_v50  ;;  %v1055_v29 = vsub.f32 %v3859_v24, %v3858_v41  ;;  %v1091_v11 = vand.u32 2147483647, %v1027_v28  ;;  %v1117_v17 = vand.u32 2147483647, %v1053_v33  ;;  %v3861_v16 = vld [vmem:[#allocation18_spill] sm:$0xff]  ;;  %v3864_v28 = vld [vmem:[#allocation83_spill] sm:$0xff] }
  0xfd   :  { %v1218_v47 = vadd.f32 %v1217_v36, %v1216_v19  ;;  %v1164_v3 = vsel %vm308_vm2, %v1089_v1, 0.0  ;;  %v1221_v53 = vsel %vm308_vm2, %v1115_v58, 0.0  ;;  %v1030_v20 = vsub.f32 %v3861_v16, %v3860_v15  ;;  %v3865_v33 = vld [vmem:[#allocation19_spill] sm:$0xff]  ;;  %v3866_v1 = vld [vmem:[#allocation45_spill] sm:$0xff] }
  0xfe   :  { %v1161_v35 = vadd.f32 %v1160_v13, %v1159_v60  ;;  %v1056_v30 = vsub.f32 %v3863_v4, %v3862_v56  ;;  %v1092_v50 = vand.u32 2147483647, %v1028_v7  ;;  %v1118_v63 = vand.u32 2147483647, %v1054_v40  ;;  %v3867_v7 = vld [vmem:[#allocation84_spill] sm:$0xff] }
  0xff   :  { %v1220_v34 = vadd.f32 %v1219_v62, %v1218_v47  ;;  %v1166_v8 = vsel %vm308_vm2, %v1090_v9, 0.0  ;;  %v1223_v13 = vsel %vm308_vm2, %v1116_v6, 0.0  ;;  %v1031_v36 = vsub.f32 %v3865_v33, %v3864_v28  ;;  %v3868_v40 = vld [vmem:[#allocation20_spill] sm:$0xff]  ;;  %v3869_v9 = vld [vmem:[#allocation46_spill] sm:$0xff] }
 0x100   :  { %v1163_v43 = vadd.f32 %v1162_v5, %v1161_v35  ;;  %v1057_v58 = vsub.f32 %v3866_v1, %v3765_v57  ;;  %v1093_v60 = vand.u32 2147483647, %v1029_v37  ;;  %v1119_v19 = vand.u32 2147483647, %v1055_v29  ;;  %v3870_v37 = vld [vmem:[#allocation85_spill] sm:$0xff]  ;;  %v3877_v1 = vld [vmem:[#allocation23_spill] sm:$0xff] }
 0x101   :  { %v1222_v52 = vadd.f32 %v1221_v53, %v1220_v34  ;;  %v1168_v18 = vsel %vm308_vm2, %v1091_v11, 0.0  ;;  %v1225_v5 = vsel %vm308_vm2, %v1117_v17, 0.0  ;;  %v1032_v62 = vsub.f32 %v3868_v40, %v3867_v7  ;;  %v3871_v29 = vld [vmem:[#allocation21_spill] sm:$0xff]  ;;  %v3872_v11 = vld [vmem:[#allocation47_spill] sm:$0xff]  ;;  %v3875_v34 = vld [vmem:[#allocation48_spill] sm:$0xff] }
 0x102   :  { %v1165_v48 = vadd.f32 %v1164_v3, %v1163_v43  ;;  %v1058_v6 = vsub.f32 %v3869_v9, %v3768_v55  ;;  %v1094_v24 = vand.u32 2147483647, %v1030_v20  ;;  %v1120_v35 = vand.u32 2147483647, %v1056_v30  ;;  %v3873_v20 = vld [vmem:[#allocation86_spill] sm:$0xff]  ;;  %v3879_v40 = vld [vmem:[#allocation88_spill] sm:$0xff] }
 0x103   :  { %v1224_v41 = vadd.f32 %v1223_v13, %v1222_v52  ;;  %v1170_v57 = vsel %vm308_vm2, %v1092_v50, 0.0  ;;  %v1227_v47 = vsel %vm308_vm2, %v1118_v63, 0.0  ;;  %v1033_v3 = vsub.f32 %v3871_v29, %v3870_v37  ;;  %v3874_v30 = vld [vmem:[#allocation22_spill] sm:$0xff]  ;;  %v3882_v37 = vld [vmem:[#allocation89_spill] sm:$0xff] }
 0x104   :  { %v1167_v61 = vadd.f32 %v1166_v8, %v1165_v48  ;;  %v1059_v17 = vsub.f32 %v3872_v11, %v3769_v22  ;;  %v1095_v16 = vand.u32 2147483647, %v1031_v36  ;;  %v1121_v56 = vand.u32 2147483647, %v1057_v58  ;;  %v3876_v36 = vld [vmem:[#allocation87_spill] sm:$0xff]  ;;  %v3878_v48 = vld [vmem:[#allocation49_spill] sm:$0xff] }
 0x105   :  { %v1226_v15 = vadd.f32 %v1225_v5, %v1224_v41  ;;  %v1172_v55 = vsel %vm308_vm2, %v1093_v60, 0.0  ;;  %v1229_v4 = vsel %vm308_vm2, %v1119_v19, 0.0  ;;  %v1034_v43 = vsub.f32 %v3874_v30, %v3873_v20  ;;  %v3883_v29 = vld [vmem:[#allocation25_spill] sm:$0xff]  ;;  %v3884_v11 = vld [vmem:[#allocation51_spill] sm:$0xff]  ;;  %v3886_v20 = vld [vmem:[#allocation26_spill] sm:$0xff] }
 0x106   :  { %v1169_v53 = vadd.f32 %v1168_v18, %v1167_v61  ;;  %v1060_v50 = vsub.f32 %v3875_v34, %v3774_v31  ;;  %v1096_v13 = vand.u32 2147483647, %v1032_v62  ;;  %v1122_v28 = vand.u32 2147483647, %v1058_v6  ;;  %v3880_v62 = vld [vmem:[#allocation24_spill] sm:$0xff]  ;;  %v3881_v6 = vld [vmem:[#allocation50_spill] sm:$0xff] }
 0x107   :  { %v1228_v8 = vadd.f32 %v1227_v47, %v1226_v15  ;;  %v1174_v22 = vsel %vm308_vm2, %v1094_v24, 0.0  ;;  %v1231_v33 = vsel %vm308_vm2, %v1120_v35, 0.0  ;;  %v1035_v58 = vsub.f32 %v3877_v1, %v3876_v36  ;;  %v3890_v1 = vld [vmem:[#allocation53_spill] sm:$0xff] }
 0x108   :  { %v1171_v63 = vadd.f32 %v1170_v57, %v1169_v53  ;;  %v1061_v52 = vsub.f32 %v3878_v48, %v3775_v26  ;;  %v1097_v18 = vand.u32 2147483647, %v1033_v3  ;;  %v1123_v5 = vand.u32 2147483647, %v1059_v17 }
 0x109   :  { %v1230_v19 = vadd.f32 %v1229_v4, %v1228_v8  ;;  %v1176_v31 = vsel %vm308_vm2, %v1095_v16, 0.0  ;;  %v1233_v7 = vsel %vm308_vm2, %v1121_v56, 0.0  ;;  %v1036_v9 = vsub.f32 %v3880_v62, %v3879_v40  ;;  %v3885_v4 = vld [vmem:[#allocation90_spill] sm:$0xff] }
 0x10a   :  { %v1173_v60 = vadd.f32 %v1172_v55, %v1171_v63  ;;  %v1062_v61 = vsub.f32 %v3881_v6, %v3780_v45  ;;  %v1098_v35 = vand.u32 2147483647, %v1034_v43  ;;  %v1124_v57 = vand.u32 2147483647, %v1060_v50  ;;  %v3887_v43 = vld [vmem:[#allocation52_spill] sm:$0xff]  ;;  %v3893_v40 = vld [vmem:[#allocation54_spill] sm:$0xff] }
 0x10b   :  { %v1232_v24 = vadd.f32 %v1231_v33, %v1230_v19  ;;  %v1178_v26 = vsel %vm308_vm2, %v1096_v13, 0.0  ;;  %v1235_v47 = vsel %vm308_vm2, %v1122_v28, 0.0  ;;  %v1037_v3 = vsub.f32 %v3883_v29, %v3882_v37  ;;  %v3889_v33 = vld [vmem:[#allocation27_spill] sm:$0xff] }
 0x10c   :  { %v1175_v41 = vadd.f32 %v1174_v22, %v1173_v60  ;;  %v1063_v17 = vsub.f32 %v3884_v11, %v3781_v32  ;;  %v1099_v16 = vand.u32 2147483647, %v1035_v58  ;;  %v1125_v56 = vand.u32 2147483647, %v1061_v52  ;;  %v3888_v22 = vld [vmem:[#allocation91_spill] sm:$0xff] }
 0x10d   :  { %v1234_v15 = vadd.f32 %v1233_v7, %v1232_v24  ;;  %v1180_v45 = vsel %vm308_vm2, %v1097_v18, 0.0  ;;  %v1237_v55 = vsel %vm308_vm2, %v1123_v5, 0.0  ;;  %v1038_v30 = vsub.f32 %v3886_v20, %v3885_v4  ;;  %v3891_v5 = vld [vmem:[#allocation92_spill] sm:$0xff] }
 0x10e   :  { %v1177_v53 = vadd.f32 %v1176_v31, %v1175_v41  ;;  %v1064_v34 = vsub.f32 %v3887_v43, %v3786_v51  ;;  %v1100_v8 = vand.u32 2147483647, %v1036_v9  ;;  %v1126_v13 = vand.u32 2147483647, %v1062_v61  ;;  %v3892_v31 = vld [vmem:[#allocation28_spill] sm:$0xff] }
 0x10f   :  { %v1236_v63 = vadd.f32 %v1235_v47, %v1234_v15  ;;  %v1182_v32 = vsel %vm308_vm2, %v1098_v35, 0.0  ;;  %v1239_v28 = vsel %vm308_vm2, %v1124_v57, 0.0  ;;  %v1039_v36 = vsub.f32 %v3889_v33, %v3888_v22  ;;  %v3894_v35 = vld [vmem:[#allocation114_spill] sm:$0xff]  ;;  %v3895_v57 = vld [vmem:[#allocation29_spill] sm:$0xff]  ;;  %v3896_v47 = vld [vmem:[#allocation55_spill] sm:$0xff] }
 0x110   :  { %v1179_v50 = vadd.f32 %v1178_v26, %v1177_v53  ;;  %v1065_v58 = vsub.f32 %v3890_v1, %v3787_v25  ;;  %v1101_v60 = vand.u32 2147483647, %v1037_v3  ;;  %v1127_v19 = vand.u32 2147483647, %v1063_v17  ;;  %v3897_v15 = vld [vmem:[#allocation30_spill] sm:$0xff]  ;;  %v3901_v33 = vld [vmem:[#allocation32_spill] sm:$0xff] }
 0x111   :  { %v1238_v52 = vadd.f32 %v1237_v55, %v1236_v63  ;;  %v1184_v51 = vsel %vm308_vm2, %v1099_v16, 0.0  ;;  %v1241_v18 = vsel %vm308_vm2, %v1125_v56, 0.0  ;;  %v1040_v7 = vsub.f32 %v3892_v31, %v3891_v5  ;;  %v3898_v56 = vld [vmem:[#allocation56_spill] sm:$0xff]  ;;  %v3900_v63 = vld [vmem:[#allocation57_spill] sm:$0xff]  ;;  %v3902_v1 = vld [vmem:[#allocation58_spill] sm:$0xff] }
 0x112   :  { %v1181_v48 = vadd.f32 %v1180_v45, %v1179_v50  ;;  %v1066_v62 = vsub.f32 %v3893_v40, %v3794_v46  ;;  %v1102_v61 = vand.u32 2147483647, %v1038_v30  ;;  %v1128_v41 = vand.u32 2147483647, %v1064_v34  ;;  %v3899_v34 = vld [vmem:[#allocation31_spill] sm:$0xff] }
 0x113   :  { %v1240_v6 = vadd.f32 %v1239_v28, %v1238_v52  ;;  %v1186_v25 = vsel %vm308_vm2, %v1100_v8, 0.0  ;;  %v1243_v24 = vsel %vm308_vm2, %v1126_v13, 0.0  ;;  %v1041_v26 = vsub.f32 %v3895_v57, %v3894_v35  ;;  %v3904_v5 = vld [vmem:[#allocation59_spill] sm:$0xff] }
 0x114   :  { %v1183_v9 = vadd.f32 %v1182_v32, %v1181_v48  ;;  %v1067_v37 = vsub.f32 %v3896_v47, %v3795_v59  ;;  %v1103_v11 = vand.u32 2147483647, %v1039_v36  ;;  %v1129_v17 = vand.u32 2147483647, %v1065_v58 }
 0x115   :  { %v1242_v3 = vadd.f32 %v1241_v18, %v1240_v6  ;;  %v1188_v46 = vsel %vm308_vm2, %v1101_v60, 0.0  ;;  %v1245_v53 = vsel %vm308_vm2, %v1127_v19, 0.0  ;;  %v1042_v16 = vsub.f32 %v3897_v15, %v3793_v21  ;;  %v3905_v6 = vld [vmem:[#allocation60_spill] sm:$0xff] }
 0x116   :  { %v1185_v29 = vadd.f32 %v1184_v51, %v1183_v9  ;;  %v1068_v45 = vsub.f32 %v3898_v56, %v3802_v14  ;;  %v1104_v20 = vand.u32 2147483647, %v1040_v7  ;;  %v1130_v30 = vand.u32 2147483647, %v1066_v62  ;;  %v3903_v51 = vld [vmem:[#allocation33_spill] sm:$0xff] }
 0x117   :  { %v1244_v4 = vadd.f32 %v1243_v24, %v1242_v3  ;;  %v1190_v59 = vsel %vm308_vm2, %v1102_v61, 0.0  ;;  %v1247_v43 = vsel %vm308_vm2, %v1128_v41, 0.0  ;;  %v1043_v50 = vsub.f32 %v3899_v34, %v3800_v27 }
 0x118   :  { %v1187_v55 = vadd.f32 %v1186_v25, %v1185_v29  ;;  %v1069_v8 = vsub.f32 %v3900_v63, %v3803_v2  ;;  %v1105_v21 = vand.u32 2147483647, %v1041_v26  ;;  %v1131_v28 = vand.u32 2147483647, %v1067_v37  ;;  %v3909_v63 = vld [vmem:[#allocation64_spill] sm:$0xff] }
 0x119   :  { %v1246_v32 = vadd.f32 %v1245_v53, %v1244_v4  ;;  %v1192_v14 = vsel %vm308_vm2, %v1103_v11, 0.0  ;;  %v1249_v22 = vsel %vm308_vm2, %v1129_v17, 0.0  ;;  %v1044_v36 = vsub.f32 %v3901_v33, %v3801_v42  ;;  %v3907_v53 = vld [vmem:[#allocation62_spill] sm:$0xff]  ;;  %v3908_v4 = vld [vmem:[#allocation63_spill] sm:$0xff] }
 0x11a   :  { %v1189_v13 = vadd.f32 %v1188_v46, %v1187_v55  ;;  %v1070_v58 = vsub.f32 %v3902_v1, %v3808_v12  ;;  %v1106_v27 = vand.u32 2147483647, %v1042_v16  ;;  %v1132_v60 = vand.u32 2147483647, %v1068_v45 }
 0x11b   :  { %v1248_v52 = vadd.f32 %v1247_v43, %v1246_v32  ;;  %v1194_v2 = vsel %vm308_vm2, %v1104_v20, 0.0  ;;  %v1251_v19 = vsel %vm308_vm2, %v1130_v30, 0.0  ;;  %v1045_v18 = vsub.f32 %v3903_v51, %v3807_v0 }
 0x11c   :  { %v1191_v48 = vadd.f32 %v1190_v59, %v1189_v13  ;;  %v1071_v31 = vsub.f32 %v3904_v5, %v3809_v54  ;;  %v1107_v42 = vand.u32 2147483647, %v1043_v50  ;;  %v1133_v62 = vand.u32 2147483647, %v1069_v8  ;;  %v3906_v54 = vld [vmem:[#allocation61_spill] sm:$0xff] }
 0x11d   :  { %v1250_v40 = vadd.f32 %v1249_v22, %v1248_v52  ;;  %v1196_v12 = vsel %vm308_vm2, %v1105_v21, 0.0  ;;  %v1253_v9 = vsel %vm308_vm2, %v1131_v28, 0.0  ;;  %v1072_v61 = vsub.f32 %v3905_v6, %v3810_v49  ;;  %v3910_v28 = vld [vmem:[#allocation65_spill] sm:$0xff] }
 0x11e   :  { %v1193_v7 = vadd.f32 %v1192_v14, %v1191_v48  ;;  %v1108_v24 = vand.u32 2147483647, %v1044_v36  ;;  %v1134_v35 = vand.u32 2147483647, %v1070_v58  ;;  %v1198_v0 = vsel %vm308_vm2, %v1106_v27, 0.0 }
 0x11f   :  { %v1252_v25 = vadd.f32 %v1251_v19, %v1250_v40  ;;  %v1255_v57 = vsel %vm308_vm2, %v1132_v60, 0.0  ;;  %v1073_v26 = vsub.f32 %v3906_v54, %v3811_v10  ;;  %v1109_v29 = vand.u32 2147483647, %v1045_v18 }
 0x120   :  { %v1195_v41 = vadd.f32 %v1194_v2, %v1193_v7  ;;  %v1135_v3 = vand.u32 2147483647, %v1071_v31  ;;  %v1200_v11 = vsel %vm308_vm2, %v1107_v42, 0.0  ;;  %v1257_v17 = vsel %vm308_vm2, %v1133_v62, 0.0 }
 0x121   :  { %v1254_v37 = vadd.f32 %v1253_v9, %v1252_v25  ;;  %v1074_v15 = vsub.f32 %v3907_v53, %v3812_v44  ;;  %v1136_v16 = vand.u32 2147483647, %v1072_v61  ;;  %v1202_v56 = vsel %vm308_vm2, %v1108_v24, 0.0  ;;  %v1142_v61 = vld [vmem:[%s3275_s4] sm:$0x3] }
 0x122   :  { %v1197_v47 = vadd.f32 %v1196_v12, %v1195_v41  ;;  %v1259_v45 = vsel %vm308_vm2, %v1134_v35, 0.0  ;;  %v1075_v20 = vsub.f32 %v3908_v4, %v3813_v23  ;;  %v1137_v30 = vand.u32 2147483647, %v1073_v26 }
 0x123   :  { %v1256_v46 = vadd.f32 %v1255_v57, %v1254_v37  ;;  %v1204_v59 = vsel %vm308_vm2, %v1109_v29, 0.0  ;;  %v1261_v43 = vsel %vm308_vm2, %v1135_v3, 0.0  ;;  %v1076_v44 = vsub.f32 %v3909_v63, %v3814_v38 }
 0x124   :  { %v1199_v49 = vadd.f32 %v1198_v0, %v1197_v47  ;;  %v1138_v8 = vand.u32 2147483647, %v1074_v15  ;;  %v1263_v13 = vsel %vm308_vm2, %v1136_v16, 0.0  ;;  %v1077_v14 = vsub.f32 %v3910_v28, %v3815_v39 }
 0x125   :  { %v1258_v10 = vadd.f32 %v1257_v17, %v1256_v46  ;;  %v1139_v22 = vand.u32 2147483647, %v1075_v20  ;;  %v1265_v23 = vsel %vm308_vm2, %v1137_v30, 0.0  ;;  %v1140_v1 = vand.u32 2147483647, %v1076_v44 }
 0x126   :  { %v1201_v55 = vadd.f32 %v1200_v11, %v1199_v49  ;;  %v1267_v58 = vsel %vm308_vm2, %v1138_v8, 0.0  ;;  %v1141_v52 = vand.u32 2147483647, %v1077_v14 }
 0x127   :  { %v1260_v50 = vadd.f32 %v1259_v45, %v1258_v10  ;;  %v1269_v38 = vsel %vm308_vm2, %v1139_v22, 0.0  ;;  %v1271_v2 = vsel %vm308_vm2, %v1140_v1, 0.0 }
 0x128   :  { %v1203_v34 = vadd.f32 %v1202_v56, %v1201_v55  ;;  %v1273_v51 = vsel %vm308_vm2, %v1141_v52, 0.0 }
 0x129   :  { %v1262_v21 = vadd.f32 %v1261_v43, %v1260_v50 }
 0x12a   :  { %v1205_v32 = vadd.f32 %v1204_v59, %v1203_v34 }
 0x12b   :  { %v1264_v36 = vadd.f32 %v1263_v13, %v1262_v21 }
 0x12c   :  { %v1206_v33 = vrot.slane %v1205_v32, 4 }
 0x12d   :  { %v1266_v48 = vadd.f32 %v1265_v23, %v1264_v36 }
 0x12e   :  { %v1207_v27 = vadd.f32 %v1206_v33, %v1205_v32 }
 0x12f   :  { %v1268_v60 = vadd.f32 %v1267_v58, %v1266_v48 }
 0x130   :  { %v1208_v39 = vrot.slane %v1207_v27, 2 }
 0x131   :  { %v1270_v19 = vadd.f32 %v1269_v38, %v1268_v60 }
 0x132   :  { %v1209_v31 = vadd.f32 %v1208_v39, %v1207_v27 }
 0x133   :  { %v1272_v18 = vadd.f32 %v1271_v2, %v1270_v19 }
 0x134   :  { %v1210_v42 = vrot.slane %v1209_v31, 1 }
 0x135   :  { %v1274_v5 = vadd.f32 %v1273_v51, %v1272_v18 }
 0x136   :  { %v1211_v9 = vadd.f32 %v1210_v42, %v1209_v31 }
 0x137   :  { %v1275_v7 = vrot.slane %v1274_v5, 4 }
 0x139   :  { %v1276_v40 = vadd.f32 %v1275_v7, %v1274_v5 }
 0x13b   :  { %v1277_v62 = vrot.slane %v1276_v40, 2 }
 0x13d   :  { %v1278_v12 = vadd.f32 %v1277_v62, %v1276_v40 }
 0x13f   :  { %v1279_v6 = vrot.slane %v1278_v12, 1 }
 0x141   :  { %v1280_v41 = vadd.f32 %v1279_v6, %v1278_v12 }
 0x143   :  { %v1283_v25 = vsel %vm589_vm3, %v1280_v41, %v1211_v9 }
 0x144   :  { %v1285_v24 = vadd.f32 %v1283_v25, %v1142_v61 }
 0x146   :  { %1287 = vst.msk [vmem:[%s3275_s4] sm:$0x3] %vm21_vm1, %v1285_v24 }

// kernel: double_conv_forward.17
= control target key start
LH: loop header
LB: loop body
LE: loop exit
PB: predicated region body
PF: predicated region fallthrough
CT: control target
= control target key end

     0   :  { %vm582_vm0 = vcmask 31744   ;;  %s1935_s0 = inlined_call_operand.vmem [shape: f32[4,256,4], index: 0, kind: input, shape index: {}]   ;;  %s1936_s1 = inlined_call_operand.vmem [shape: f32[4,1,4], index: 1, kind: input, shape index: {}]   ;;  %s1937_s2 = inlined_call_operand.vmem [shape: f32[4,1,4], index: 2, kind: input, shape index: {}]   ;;  %s1938_s3 = inlined_call_operand.vmem [shape: f32[4,256,4], index: 3, kind: output, shape index: {}]  }
   0x1   :  { %v14_v0 = vld [vmem:[%s1935_s0] sm:$0xff]  ;;  %v15_v4 = vld [vmem:[%s1935_s0 + $0x8] sm:$0xff]  ;;  %v16_v5 = vld [vmem:[%s1935_s0 + $0x10] sm:$0xff] }
   0x2   :  { %v749_v1 = vld [vmem:[%s1936_s1] ss:$0 sm:$0xff]  ;;  %v17_v6 = vld [vmem:[%s1935_s0 + $0x18] sm:$0xff]  ;;  %v19_v11 = vld [vmem:[%s1935_s0 + $0x28] sm:$0xff] }
   0x3   :  { %v754_v2 = vld [vmem:[%s1937_s2] ss:$0 sm:$0xff]  ;;  %v170_v3 = vmul.f32 %v749_v1, %v14_v0  ;;  %v171_v7 = vmul.f32 %v749_v1, %v15_v4  ;;  %v172_v8 = vmul.f32 %v749_v1, %v16_v5  ;;  %v173_v9 = vmul.f32 %v749_v1, %v17_v6  ;;  %v20_v12 = vld [vmem:[%s1935_s0 + $0x30] sm:$0xff]  ;;  %v21_v17 = vld [vmem:[%s1935_s0 + $0x38] sm:$0xff] }
   0x4   :  { %v18_v10 = vld [vmem:[%s1935_s0 + $0x20] sm:$0xff]  ;;  %v175_v15 = vmul.f32 %v749_v1, %v19_v11  ;;  %v176_v16 = vmul.f32 %v749_v1, %v20_v12  ;;  %v177_v21 = vmul.f32 %v749_v1, %v21_v17  ;;  %v23_v27 = vld [vmem:[%s1935_s0 + $0x48] sm:$0xff]  ;;  %v24_v28 = vld [vmem:[%s1935_s0 + $0x50] sm:$0xff] }
   0x5   :  { %v326_v13 = vadd.f32 %v754_v2, %v170_v3  ;;  %v174_v14 = vmul.f32 %v749_v1, %v18_v10  ;;  %v327_v18 = vadd.f32 %v754_v2, %v171_v7  ;;  %v328_v19 = vadd.f32 %v754_v2, %v172_v8  ;;  %v22_v22 = vld [vmem:[%s1935_s0 + $0x40] sm:$0xff]  ;;  %v25_v29 = vld [vmem:[%s1935_s0 + $0x58] sm:$0xff]  ;;  %v27_v35 = vld [vmem:[%s1935_s0 + $0x68] sm:$0xff] }
   0x6   :  { %v329_v20 = vadd.f32 %v754_v2, %v173_v9  ;;  %v331_v25 = vadd.f32 %v754_v2, %v175_v15  ;;  %v332_v26 = vadd.f32 %v754_v2, %v176_v16  ;;  %v333_v33 = vadd.f32 %v754_v2, %v177_v21  ;;  %v26_v34 = vld [vmem:[%s1935_s0 + $0x60] sm:$0xff]  ;;  %v28_v36 = vld [vmem:[%s1935_s0 + $0x70] sm:$0xff]  ;;  %v29_v41 = vld [vmem:[%s1935_s0 + $0x78] sm:$0xff] }
   0x7   :  { %v454_v23 = vmax.f32 %v326_v13, 0.0  ;;  %v330_v24 = vadd.f32 %v754_v2, %v174_v14  ;;  %v455_v30 = vmax.f32 %v327_v18, 0.0  ;;  %v456_v31 = vmax.f32 %v328_v19, 0.0  ;;  %v30_v54 = vld [vmem:[%s1935_s0 + $0x80] sm:$0xff]  ;;  %v31_v59 = vld [vmem:[%s1935_s0 + $0x88] sm:$0xff]  ;;  %v32_v60 = vld [vmem:[%s1935_s0 + $0x90] sm:$0xff] }
   0x8   :  { %v457_v32 = vmax.f32 %v329_v20, 0.0  ;;  %v459_v38 = vmax.f32 %v331_v25, 0.0  ;;  %v460_v39 = vmax.f32 %v332_v26, 0.0  ;;  %v178_v40 = vmul.f32 %v749_v1, %v22_v22  ;;  %v33_v61 = vld [vmem:[%s1935_s0 + $0x98] sm:$0xff]  ;;  %v34_v4 = vld [vmem:[%s1935_s0 + $0xa0] sm:$0xff]  ;;  %v35_v5 = vld [vmem:[%s1935_s0 + $0xa8] sm:$0xff] }
   0x9   :  { %583 = vst.msk [vmem:[%s1938_s3] sm:$0xff] %vm582_vm0, %v454_v23  ;;  %v458_v37 = vmax.f32 %v330_v24, 0.0  ;;  %584 = vst.msk [vmem:[%s1938_s3 + $0x8] sm:$0xff] %vm582_vm0, %v455_v30  ;;  %v461_v42 = vmax.f32 %v333_v33, 0.0  ;;  %v179_v43 = vmul.f32 %v749_v1, %v23_v27  ;;  %v180_v44 = vmul.f32 %v749_v1, %v24_v28  ;;  %v36_v6 = vld [vmem:[%s1935_s0 + $0xb0] sm:$0xff]  ;;  %v37_v11 = vld [vmem:[%s1935_s0 + $0xb8] sm:$0xff] }
   0xa   :  { %585 = vst.msk [vmem:[%s1938_s3 + $0x10] sm:$0xff] %vm582_vm0, %v456_v31  ;;  %586 = vst.msk [vmem:[%s1938_s3 + $0x18] sm:$0xff] %vm582_vm0, %v457_v32  ;;  %v181_v45 = vmul.f32 %v749_v1, %v25_v29  ;;  %v334_v46 = vadd.f32 %v754_v2, %v178_v40  ;;  %v182_v47 = vmul.f32 %v749_v1, %v26_v34  ;;  %v38_v24 = vld [vmem:[%s1935_s0 + $0xc0] sm:$0xff]  ;;  %v39_v29 = vld [vmem:[%s1935_s0 + $0xc8] sm:$0xff] }
   0xb   :  { %587 = vst.msk [vmem:[%s1938_s3 + $0x20] sm:$0xff] %vm582_vm0, %v458_v37  ;;  %588 = vst.msk [vmem:[%s1938_s3 + $0x28] sm:$0xff] %vm582_vm0, %v459_v38  ;;  %v183_v48 = vmul.f32 %v749_v1, %v27_v35  ;;  %v184_v49 = vmul.f32 %v749_v1, %v28_v36  ;;  %v335_v50 = vadd.f32 %v754_v2, %v179_v43  ;;  %v40_v30 = vld [vmem:[%s1935_s0 + $0xd0] sm:$0xff]  ;;  %v41_v31 = vld [vmem:[%s1935_s0 + $0xd8] sm:$0xff] }
   0xc   :  { %589 = vst.msk [vmem:[%s1938_s3 + $0x30] sm:$0xff] %vm582_vm0, %v460_v39  ;;  %590 = vst.msk [vmem:[%s1938_s3 + $0x38] sm:$0xff] %vm582_vm0, %v461_v42  ;;  %v336_v51 = vadd.f32 %v754_v2, %v180_v44  ;;  %v337_v52 = vadd.f32 %v754_v2, %v181_v45  ;;  %v185_v53 = vmul.f32 %v749_v1, %v29_v41  ;;  %v462_v55 = vmax.f32 %v334_v46, 0.0  ;;  %v42_v36 = vld [vmem:[%s1935_s0 + $0xe0] sm:$0xff]  ;;  %v43_v37 = vld [vmem:[%s1935_s0 + $0xe8] sm:$0xff] }
   0xd   :  { %v338_v56 = vadd.f32 %v754_v2, %v182_v47  ;;  %v339_v57 = vadd.f32 %v754_v2, %v183_v48  ;;  %v340_v58 = vadd.f32 %v754_v2, %v184_v49  ;;  %v463_v62 = vmax.f32 %v335_v50, 0.0  ;;  %v44_v38 = vld [vmem:[%s1935_s0 + $0xf0] sm:$0xff]  ;;  %v45_v43 = vld [vmem:[%s1935_s0 + $0xf8] sm:$0xff] }
   0xe   :  { %v464_v63 = vmax.f32 %v336_v51, 0.0  ;;  %v465_v0 = vmax.f32 %v337_v52, 0.0  ;;  %v341_v3 = vadd.f32 %v754_v2, %v185_v53  ;;  %591 = vst.msk [vmem:[%s1938_s3 + $0x40] sm:$0xff] %vm582_vm0, %v462_v55  ;;  %v186_v10 = vmul.f32 %v749_v1, %v30_v54 }
   0xf   :  { %v466_v7 = vmax.f32 %v338_v56, 0.0  ;;  %v467_v8 = vmax.f32 %v339_v57, 0.0  ;;  %v468_v9 = vmax.f32 %v340_v58, 0.0  ;;  %592 = vst.msk [vmem:[%s1938_s3 + $0x48] sm:$0xff] %vm582_vm0, %v463_v62  ;;  %v187_v13 = vmul.f32 %v749_v1, %v31_v59  ;;  %v46_v56 = vld [vmem:[%s1935_s0 + $0x100] sm:$0xff]  ;;  %v47_v62 = vld [vmem:[%s1935_s0 + $0x108] sm:$0xff] }
  0x10   :  { %593 = vst.msk [vmem:[%s1938_s3 + $0x50] sm:$0xff] %vm582_vm0, %v464_v63  ;;  %594 = vst.msk [vmem:[%s1938_s3 + $0x58] sm:$0xff] %vm582_vm0, %v465_v0  ;;  %v469_v12 = vmax.f32 %v341_v3, 0.0  ;;  %v188_v14 = vmul.f32 %v749_v1, %v32_v60  ;;  %v189_v15 = vmul.f32 %v749_v1, %v33_v61  ;;  %v342_v16 = vadd.f32 %v754_v2, %v186_v10  ;;  %v1011_v57 = vld [vmem:[%s1936_s1 + $0x1] ss:$0 sm:$0xff]  ;;  %v48_v63 = vld [vmem:[%s1935_s0 + $0x110] sm:$0xff] }
  0x11   :  { %595 = vst.msk [vmem:[%s1938_s3 + $0x60] sm:$0xff] %vm582_vm0, %v466_v7  ;;  %596 = vst.msk [vmem:[%s1938_s3 + $0x68] sm:$0xff] %vm582_vm0, %v467_v8  ;;  %v190_v17 = vmul.f32 %v749_v1, %v34_v4  ;;  %v191_v18 = vmul.f32 %v749_v1, %v35_v5  ;;  %v192_v19 = vmul.f32 %v749_v1, %v36_v6  ;;  %v1016_v58 = vld [vmem:[%s1937_s2 + $0x1] ss:$0 sm:$0xff]  ;;  %v49_v0 = vld [vmem:[%s1935_s0 + $0x118] sm:$0xff] }
  0x12   :  { %597 = vst.msk [vmem:[%s1938_s3 + $0x70] sm:$0xff] %vm582_vm0, %v468_v9  ;;  %598 = vst.msk [vmem:[%s1938_s3 + $0x78] sm:$0xff] %vm582_vm0, %v469_v12  ;;  %v343_v20 = vadd.f32 %v754_v2, %v187_v13  ;;  %v344_v21 = vadd.f32 %v754_v2, %v188_v14  ;;  %v345_v22 = vadd.f32 %v754_v2, %v189_v15  ;;  %v470_v25 = vmax.f32 %v342_v16, 0.0  ;;  %v50_v7 = vld [vmem:[%s1935_s0 + $0x120] sm:$0xff]  ;;  %v51_v8 = vld [vmem:[%s1935_s0 + $0x128] sm:$0xff] }
  0x13   :  { %v193_v23 = vmul.f32 %v749_v1, %v37_v11  ;;  %v346_v26 = vadd.f32 %v754_v2, %v190_v17  ;;  %v347_v27 = vadd.f32 %v754_v2, %v191_v18  ;;  %v348_v28 = vadd.f32 %v754_v2, %v192_v19  ;;  %v52_v9 = vld [vmem:[%s1935_s0 + $0x130] sm:$0xff]  ;;  %v53_v13 = vld [vmem:[%s1935_s0 + $0x138] sm:$0xff] }
  0x14   :  { %v471_v32 = vmax.f32 %v343_v20, 0.0  ;;  %v472_v33 = vmax.f32 %v344_v21, 0.0  ;;  %v473_v34 = vmax.f32 %v345_v22, 0.0  ;;  %599 = vst.msk [vmem:[%s1938_s3 + $0x80] sm:$0xff] %vm582_vm0, %v470_v25  ;;  %v194_v42 = vmul.f32 %v749_v1, %v38_v24 }
  0x15   :  { %v349_v35 = vadd.f32 %v754_v2, %v193_v23  ;;  %v474_v39 = vmax.f32 %v346_v26, 0.0  ;;  %v475_v40 = vmax.f32 %v347_v27, 0.0  ;;  %v476_v41 = vmax.f32 %v348_v28, 0.0  ;;  %v54_v26 = vld [vmem:[%s1935_s0 + $0x140] sm:$0xff] }
  0x16   :  { %600 = vst.msk [vmem:[%s1938_s3 + $0x88] sm:$0xff] %vm582_vm0, %v471_v32  ;;  %601 = vst.msk [vmem:[%s1938_s3 + $0x90] sm:$0xff] %vm582_vm0, %v472_v33  ;;  %v195_v45 = vmul.f32 %v749_v1, %v39_v29  ;;  %v196_v46 = vmul.f32 %v749_v1, %v40_v30  ;;  %v197_v47 = vmul.f32 %v749_v1, %v41_v31  ;;  %v55_v31 = vld [vmem:[%s1935_s0 + $0x148] sm:$0xff]  ;;  %v56_v32 = vld [vmem:[%s1935_s0 + $0x150] sm:$0xff] }
  0x17   :  { %602 = vst.msk [vmem:[%s1938_s3 + $0x98] sm:$0xff] %vm582_vm0, %v473_v34  ;;  %v477_v44 = vmax.f32 %v349_v35, 0.0  ;;  %603 = vst.msk [vmem:[%s1938_s3 + $0xa0] sm:$0xff] %vm582_vm0, %v474_v39  ;;  %v350_v48 = vadd.f32 %v754_v2, %v194_v42  ;;  %v198_v49 = vmul.f32 %v749_v1, %v42_v36  ;;  %v199_v50 = vmul.f32 %v749_v1, %v43_v37  ;;  %v57_v33 = vld [vmem:[%s1935_s0 + $0x158] sm:$0xff]  ;;  %v59_v39 = vld [vmem:[%s1935_s0 + $0x168] sm:$0xff] }
  0x18   :  { %604 = vst.msk [vmem:[%s1938_s3 + $0xa8] sm:$0xff] %vm582_vm0, %v475_v40  ;;  %605 = vst.msk [vmem:[%s1938_s3 + $0xb0] sm:$0xff] %vm582_vm0, %v476_v41  ;;  %v200_v51 = vmul.f32 %v749_v1, %v44_v38  ;;  %v351_v52 = vadd.f32 %v754_v2, %v195_v45  ;;  %v352_v53 = vadd.f32 %v754_v2, %v196_v46  ;;  %v58_v38 = vld [vmem:[%s1935_s0 + $0x160] sm:$0xff]  ;;  %v60_v40 = vld [vmem:[%s1935_s0 + $0x170] sm:$0xff] }
  0x19   :  { %606 = vst.msk [vmem:[%s1938_s3 + $0xb8] sm:$0xff] %vm582_vm0, %v477_v44  ;;  %v353_v54 = vadd.f32 %v754_v2, %v197_v47  ;;  %v201_v55 = vmul.f32 %v749_v1, %v45_v43  ;;  %v478_v59 = vmax.f32 %v350_v48, 0.0  ;;  %v354_v60 = vadd.f32 %v754_v2, %v198_v49  ;;  %v61_v45 = vld [vmem:[%s1935_s0 + $0x178] sm:$0xff] }
  0x1a   :  { %v355_v61 = vadd.f32 %v754_v2, %v199_v50  ;;  %v356_v1 = vadd.f32 %v754_v2, %v200_v51  ;;  %v479_v3 = vmax.f32 %v351_v52, 0.0  ;;  %v480_v4 = vmax.f32 %v352_v53, 0.0 }
  0x1b   :  { %v481_v5 = vmax.f32 %v353_v54, 0.0  ;;  %v357_v6 = vadd.f32 %v754_v2, %v201_v55  ;;  %607 = vst.msk [vmem:[%s1938_s3 + $0xc0] sm:$0xff] %vm582_vm0, %v478_v59  ;;  %v482_v10 = vmax.f32 %v354_v60, 0.0  ;;  %v202_v12 = vmul.f32 %v1011_v57, %v46_v56  ;;  %v62_v60 = vld [vmem:[%s1935_s0 + $0x180] sm:$0xff] }
  0x1c   :  { %v483_v11 = vmax.f32 %v355_v61, 0.0  ;;  %v484_v2 = vmax.f32 %v356_v1, 0.0  ;;  %608 = vst.msk [vmem:[%s1938_s3 + $0xc8] sm:$0xff] %vm582_vm0, %v479_v3  ;;  %609 = vst.msk [vmem:[%s1938_s3 + $0xd0] sm:$0xff] %vm582_vm0, %v480_v4  ;;  %v203_v15 = vmul.f32 %v1011_v57, %v47_v62  ;;  %v204_v16 = vmul.f32 %v1011_v57, %v48_v63  ;;  %v64_v3 = vld [vmem:[%s1935_s0 + $0x190] sm:$0xff]  ;;  %v65_v4 = vld [vmem:[%s1935_s0 + $0x198] sm:$0xff] }
  0x1d   :  { %610 = vst.msk [vmem:[%s1938_s3 + $0xd8] sm:$0xff] %vm582_vm0, %v481_v5  ;;  %v485_v14 = vmax.f32 %v357_v6, 0.0  ;;  %v205_v17 = vmul.f32 %v1011_v57, %v49_v0  ;;  %611 = vst.msk [vmem:[%s1938_s3 + $0xe0] sm:$0xff] %vm582_vm0, %v482_v10  ;;  %v358_v18 = vadd.f32 %v1016_v58, %v202_v12  ;;  %v206_v19 = vmul.f32 %v1011_v57, %v50_v7  ;;  %v63_v0 = vld [vmem:[%s1935_s0 + $0x188] sm:$0xff] }
  0x1e   :  { %612 = vst.msk [vmem:[%s1938_s3 + $0xe8] sm:$0xff] %vm582_vm0, %v483_v11  ;;  %613 = vst.msk [vmem:[%s1938_s3 + $0xf0] sm:$0xff] %vm582_vm0, %v484_v2  ;;  %v207_v20 = vmul.f32 %v1011_v57, %v51_v8  ;;  %v208_v21 = vmul.f32 %v1011_v57, %v52_v9  ;;  %v359_v22 = vadd.f32 %v1016_v58, %v203_v15  ;;  %v66_v9 = vld [vmem:[%s1935_s0 + $0x1a0] sm:$0xff]  ;;  %v67_v10 = vld [vmem:[%s1935_s0 + $0x1a8] sm:$0xff] }
  0x1f   :  { %614 = vst.msk [vmem:[%s1938_s3 + $0xf8] sm:$0xff] %vm582_vm0, %v485_v14  ;;  %v360_v23 = vadd.f32 %v1016_v58, %v204_v16  ;;  %v361_v24 = vadd.f32 %v1016_v58, %v205_v17  ;;  %v209_v25 = vmul.f32 %v1011_v57, %v53_v13  ;;  %v486_v27 = vmax.f32 %v358_v18, 0.0  ;;  %v68_v11 = vld [vmem:[%s1935_s0 + $0x1b0] sm:$0xff]  ;;  %v69_v15 = vld [vmem:[%s1935_s0 + $0x1b8] sm:$0xff] }
  0x20   :  { %v362_v28 = vadd.f32 %v1016_v58, %v206_v19  ;;  %v363_v29 = vadd.f32 %v1016_v58, %v207_v20  ;;  %v364_v30 = vadd.f32 %v1016_v58, %v208_v21  ;;  %v487_v34 = vmax.f32 %v359_v22, 0.0 }
  0x21   :  { %v488_v35 = vmax.f32 %v360_v23, 0.0  ;;  %v489_v36 = vmax.f32 %v361_v24, 0.0  ;;  %v365_v37 = vadd.f32 %v1016_v58, %v209_v25  ;;  %615 = vst.msk [vmem:[%s1938_s3 + $0x100] sm:$0xff] %vm582_vm0, %v486_v27  ;;  %v210_v44 = vmul.f32 %v1011_v57, %v54_v26 }
  0x22   :  { %v490_v41 = vmax.f32 %v362_v28, 0.0  ;;  %v491_v42 = vmax.f32 %v363_v29, 0.0  ;;  %v492_v43 = vmax.f32 %v364_v30, 0.0  ;;  %616 = vst.msk [vmem:[%s1938_s3 + $0x108] sm:$0xff] %vm582_vm0, %v487_v34  ;;  %v211_v47 = vmul.f32 %v1011_v57, %v55_v31  ;;  %v70_v28 = vld [vmem:[%s1935_s0 + $0x1c0] sm:$0xff]  ;;  %v72_v34 = vld [vmem:[%s1935_s0 + $0x1d0] sm:$0xff] }
  0x23   :  { %617 = vst.msk [vmem:[%s1938_s3 + $0x110] sm:$0xff] %vm582_vm0, %v488_v35  ;;  %618 = vst.msk [vmem:[%s1938_s3 + $0x118] sm:$0xff] %vm582_vm0, %v489_v36  ;;  %v493_v46 = vmax.f32 %v365_v37, 0.0  ;;  %v212_v48 = vmul.f32 %v1011_v57, %v56_v32  ;;  %v213_v49 = vmul.f32 %v1011_v57, %v57_v33  ;;  %v366_v50 = vadd.f32 %v1016_v58, %v210_v44  ;;  %v71_v33 = vld [vmem:[%s1935_s0 + $0x1c8] sm:$0xff]  ;;  %v73_v35 = vld [vmem:[%s1935_s0 + $0x1d8] sm:$0xff] }
  0x24   :  { %619 = vst.msk [vmem:[%s1938_s3 + $0x120] sm:$0xff] %vm582_vm0, %v490_v41  ;;  %620 = vst.msk [vmem:[%s1938_s3 + $0x128] sm:$0xff] %vm582_vm0, %v491_v42  ;;  %v214_v51 = vmul.f32 %v1011_v57, %v58_v38  ;;  %v215_v52 = vmul.f32 %v1011_v57, %v59_v39  ;;  %v216_v53 = vmul.f32 %v1011_v57, %v60_v40  ;;  %v74_v40 = vld [vmem:[%s1935_s0 + $0x1e0] sm:$0xff]  ;;  %v75_v41 = vld [vmem:[%s1935_s0 + $0x1e8] sm:$0xff] }
  0x25   :  { %621 = vst.msk [vmem:[%s1938_s3 + $0x130] sm:$0xff] %vm582_vm0, %v492_v43  ;;  %622 = vst.msk [vmem:[%s1938_s3 + $0x138] sm:$0xff] %vm582_vm0, %v493_v46  ;;  %v367_v54 = vadd.f32 %v1016_v58, %v211_v47  ;;  %v368_v55 = vadd.f32 %v1016_v58, %v212_v48  ;;  %v369_v56 = vadd.f32 %v1016_v58, %v213_v49  ;;  %v494_v61 = vmax.f32 %v366_v50, 0.0  ;;  %v76_v42 = vld [vmem:[%s1935_s0 + $0x1f0] sm:$0xff]  ;;  %v77_v47 = vld [vmem:[%s1935_s0 + $0x1f8] sm:$0xff] }
  0x26   :  { %v217_v59 = vmul.f32 %v1011_v57, %v61_v45  ;;  %v370_v1 = vadd.f32 %v1016_v58, %v214_v51  ;;  %v371_v62 = vadd.f32 %v1016_v58, %v215_v52  ;;  %v372_v63 = vadd.f32 %v1016_v58, %v216_v53 }
  0x27   :  { %v495_v5 = vmax.f32 %v367_v54, 0.0  ;;  %v496_v6 = vmax.f32 %v368_v55, 0.0  ;;  %v497_v7 = vmax.f32 %v369_v56, 0.0  ;;  %623 = vst.msk [vmem:[%s1938_s3 + $0x140] sm:$0xff] %vm582_vm0, %v494_v61  ;;  %v218_v14 = vmul.f32 %v1011_v57, %v62_v60 }
  0x28   :  { %v373_v8 = vadd.f32 %v1016_v58, %v217_v59  ;;  %v498_v2 = vmax.f32 %v370_v1, 0.0  ;;  %v499_v12 = vmax.f32 %v371_v62, 0.0  ;;  %v500_v13 = vmax.f32 %v372_v63, 0.0  ;;  %v78_v1 = vld [vmem:[%s1935_s0 + $0x200] sm:$0xff] }
  0x29   :  { %624 = vst.msk [vmem:[%s1938_s3 + $0x148] sm:$0xff] %vm582_vm0, %v495_v5  ;;  %625 = vst.msk [vmem:[%s1938_s3 + $0x150] sm:$0xff] %vm582_vm0, %v496_v6  ;;  %v219_v17 = vmul.f32 %v1011_v57, %v63_v0  ;;  %v220_v18 = vmul.f32 %v1011_v57, %v64_v3  ;;  %v221_v19 = vmul.f32 %v1011_v57, %v65_v4  ;;  %v1309_v62 = vld [vmem:[%s1936_s1 + $0x2] ss:$0 sm:$0xff]  ;;  %v79_v5 = vld [vmem:[%s1935_s0 + $0x208] sm:$0xff] }
  0x2a   :  { %626 = vst.msk [vmem:[%s1938_s3 + $0x158] sm:$0xff] %vm582_vm0, %v497_v7  ;;  %v501_v16 = vmax.f32 %v373_v8, 0.0  ;;  %627 = vst.msk [vmem:[%s1938_s3 + $0x160] sm:$0xff] %vm582_vm0, %v498_v2  ;;  %v374_v20 = vadd.f32 %v1016_v58, %v218_v14  ;;  %v222_v21 = vmul.f32 %v1011_v57, %v66_v9  ;;  %v223_v22 = vmul.f32 %v1011_v57, %v67_v10  ;;  %v1314_v63 = vld [vmem:[%s1937_s2 + $0x2] ss:$0 sm:$0xff]  ;;  %v80_v6 = vld [vmem:[%s1935_s0 + $0x210] sm:$0xff] }
  0x2b   :  { %628 = vst.msk [vmem:[%s1938_s3 + $0x168] sm:$0xff] %vm582_vm0, %v499_v12  ;;  %629 = vst.msk [vmem:[%s1938_s3 + $0x170] sm:$0xff] %vm582_vm0, %v500_v13  ;;  %v224_v23 = vmul.f32 %v1011_v57, %v68_v11  ;;  %v375_v24 = vadd.f32 %v1016_v58, %v219_v17  ;;  %v376_v25 = vadd.f32 %v1016_v58, %v220_v18  ;;  %v81_v7 = vld [vmem:[%s1935_s0 + $0x218] sm:$0xff]  ;;  %v82_v2 = vld [vmem:[%s1935_s0 + $0x220] sm:$0xff] }
  0x2c   :  { %630 = vst.msk [vmem:[%s1938_s3 + $0x178] sm:$0xff] %vm582_vm0, %v501_v16  ;;  %v377_v26 = vadd.f32 %v1016_v58, %v221_v19  ;;  %v225_v27 = vmul.f32 %v1011_v57, %v69_v15  ;;  %v502_v29 = vmax.f32 %v374_v20, 0.0  ;;  %v378_v30 = vadd.f32 %v1016_v58, %v222_v21  ;;  %v83_v12 = vld [vmem:[%s1935_s0 + $0x228] sm:$0xff]  ;;  %v84_v13 = vld [vmem:[%s1935_s0 + $0x230] sm:$0xff]  ;;  %v85_v17 = vld [vmem:[%s1935_s0 + $0x238] sm:$0xff] }
  0x2d   :  { %v379_v31 = vadd.f32 %v1016_v58, %v223_v22  ;;  %v380_v32 = vadd.f32 %v1016_v58, %v224_v23  ;;  %v503_v36 = vmax.f32 %v375_v24, 0.0  ;;  %v504_v37 = vmax.f32 %v376_v25, 0.0 }
  0x2e   :  { %v505_v38 = vmax.f32 %v377_v26, 0.0  ;;  %v381_v39 = vadd.f32 %v1016_v58, %v225_v27  ;;  %631 = vst.msk [vmem:[%s1938_s3 + $0x180] sm:$0xff] %vm582_vm0, %v502_v29  ;;  %v506_v43 = vmax.f32 %v378_v30, 0.0  ;;  %v226_v46 = vmul.f32 %v1011_v57, %v70_v28  ;;  %v86_v30 = vld [vmem:[%s1935_s0 + $0x240] sm:$0xff] }
  0x2f   :  { %v507_v44 = vmax.f32 %v379_v31, 0.0  ;;  %v508_v45 = vmax.f32 %v380_v32, 0.0  ;;  %632 = vst.msk [vmem:[%s1938_s3 + $0x188] sm:$0xff] %vm582_vm0, %v503_v36  ;;  %633 = vst.msk [vmem:[%s1938_s3 + $0x190] sm:$0xff] %vm582_vm0, %v504_v37  ;;  %v227_v49 = vmul.f32 %v1011_v57, %v71_v33  ;;  %v228_v50 = vmul.f32 %v1011_v57, %v72_v34  ;;  %v88_v36 = vld [vmem:[%s1935_s0 + $0x250] sm:$0xff]  ;;  %v89_v37 = vld [vmem:[%s1935_s0 + $0x258] sm:$0xff] }
  0x30   :  { %634 = vst.msk [vmem:[%s1938_s3 + $0x198] sm:$0xff] %vm582_vm0, %v505_v38  ;;  %v509_v48 = vmax.f32 %v381_v39, 0.0  ;;  %v229_v51 = vmul.f32 %v1011_v57, %v73_v35  ;;  %635 = vst.msk [vmem:[%s1938_s3 + $0x1a0] sm:$0xff] %vm582_vm0, %v506_v43  ;;  %v382_v52 = vadd.f32 %v1016_v58, %v226_v46  ;;  %v230_v53 = vmul.f32 %v1011_v57, %v74_v40  ;;  %v87_v35 = vld [vmem:[%s1935_s0 + $0x248] sm:$0xff] }
  0x31   :  { %636 = vst.msk [vmem:[%s1938_s3 + $0x1a8] sm:$0xff] %vm582_vm0, %v507_v44  ;;  %637 = vst.msk [vmem:[%s1938_s3 + $0x1b0] sm:$0xff] %vm582_vm0, %v508_v45  ;;  %v231_v54 = vmul.f32 %v1011_v57, %v75_v41  ;;  %v232_v55 = vmul.f32 %v1011_v57, %v76_v42  ;;  %v383_v56 = vadd.f32 %v1016_v58, %v227_v49  ;;  %v90_v42 = vld [vmem:[%s1935_s0 + $0x260] sm:$0xff]  ;;  %v91_v43 = vld [vmem:[%s1935_s0 + $0x268] sm:$0xff] }
  0x32   :  { %638 = vst.msk [vmem:[%s1938_s3 + $0x1b8] sm:$0xff] %vm582_vm0, %v509_v48  ;;  %v384_v59 = vadd.f32 %v1016_v58, %v228_v50  ;;  %v385_v60 = vadd.f32 %v1016_v58, %v229_v51  ;;  %v233_v61 = vmul.f32 %v1011_v57, %v77_v47  ;;  %v510_v0 = vmax.f32 %v382_v52, 0.0  ;;  %v92_v44 = vld [vmem:[%s1935_s0 + $0x270] sm:$0xff]  ;;  %v93_v49 = vld [vmem:[%s1935_s0 + $0x278] sm:$0xff] }
  0x33   :  { %v386_v3 = vadd.f32 %v1016_v58, %v230_v53  ;;  %v387_v4 = vadd.f32 %v1016_v58, %v231_v54  ;;  %v388_v57 = vadd.f32 %v1016_v58, %v232_v55  ;;  %v511_v8 = vmax.f32 %v383_v56, 0.0 }
  0x34   :  { %v512_v9 = vmax.f32 %v384_v59, 0.0  ;;  %v513_v10 = vmax.f32 %v385_v60, 0.0  ;;  %v389_v11 = vadd.f32 %v1016_v58, %v233_v61  ;;  %639 = vst.msk [vmem:[%s1938_s3 + $0x1c0] sm:$0xff] %vm582_vm0, %v510_v0  ;;  %v234_v16 = vmul.f32 %v1309_v62, %v78_v1 }
  0x35   :  { %v514_v14 = vmax.f32 %v386_v3, 0.0  ;;  %v515_v15 = vmax.f32 %v387_v4, 0.0  ;;  %v516_v58 = vmax.f32 %v388_v57, 0.0  ;;  %640 = vst.msk [vmem:[%s1938_s3 + $0x1c8] sm:$0xff] %vm582_vm0, %v511_v8  ;;  %v235_v19 = vmul.f32 %v1309_v62, %v79_v5  ;;  %v94_v3 = vld [vmem:[%s1935_s0 + $0x280] sm:$0xff]  ;;  %v96_v8 = vld [vmem:[%s1935_s0 + $0x290] sm:$0xff] }
  0x36   :  { %641 = vst.msk [vmem:[%s1938_s3 + $0x1d0] sm:$0xff] %vm582_vm0, %v512_v9  ;;  %642 = vst.msk [vmem:[%s1938_s3 + $0x1d8] sm:$0xff] %vm582_vm0, %v513_v10  ;;  %v517_v18 = vmax.f32 %v389_v11, 0.0  ;;  %v236_v20 = vmul.f32 %v1309_v62, %v80_v6  ;;  %v237_v21 = vmul.f32 %v1309_v62, %v81_v7  ;;  %v390_v22 = vadd.f32 %v1314_v63, %v234_v16  ;;  %v95_v7 = vld [vmem:[%s1935_s0 + $0x288] sm:$0xff]  ;;  %v97_v9 = vld [vmem:[%s1935_s0 + $0x298] sm:$0xff] }
  0x37   :  { %643 = vst.msk [vmem:[%s1938_s3 + $0x1e0] sm:$0xff] %vm582_vm0, %v514_v14  ;;  %644 = vst.msk [vmem:[%s1938_s3 + $0x1e8] sm:$0xff] %vm582_vm0, %v515_v15  ;;  %v238_v23 = vmul.f32 %v1309_v62, %v82_v2  ;;  %v239_v24 = vmul.f32 %v1309_v62, %v83_v12  ;;  %v240_v25 = vmul.f32 %v1309_v62, %v84_v13  ;;  %v98_v13 = vld [vmem:[%s1935_s0 + $0x2a0] sm:$0xff]  ;;  %v99_v14 = vld [vmem:[%s1935_s0 + $0x2a8] sm:$0xff] }
  0x38   :  { %645 = vst.msk [vmem:[%s1938_s3 + $0x1f0] sm:$0xff] %vm582_vm0, %v516_v58  ;;  %646 = vst.msk [vmem:[%s1938_s3 + $0x1f8] sm:$0xff] %vm582_vm0, %v517_v18  ;;  %v391_v26 = vadd.f32 %v1314_v63, %v235_v19  ;;  %v392_v27 = vadd.f32 %v1314_v63, %v236_v20  ;;  %v393_v28 = vadd.f32 %v1314_v63, %v237_v21  ;;  %v518_v31 = vmax.f32 %v390_v22, 0.0  ;;  %v100_v15 = vld [vmem:[%s1935_s0 + $0x2b0] sm:$0xff]  ;;  %v101_v19 = vld [vmem:[%s1935_s0 + $0x2b8] sm:$0xff] }
  0x39   :  { %v241_v29 = vmul.f32 %v1309_v62, %v85_v17  ;;  %v394_v32 = vadd.f32 %v1314_v63, %v238_v23  ;;  %v395_v33 = vadd.f32 %v1314_v63, %v239_v24  ;;  %v396_v34 = vadd.f32 %v1314_v63, %v240_v25 }
  0x3a   :  { %v519_v38 = vmax.f32 %v391_v26, 0.0  ;;  %v520_v39 = vmax.f32 %v392_v27, 0.0  ;;  %v521_v40 = vmax.f32 %v393_v28, 0.0  ;;  %647 = vst.msk [vmem:[%s1938_s3 + $0x200] sm:$0xff] %vm582_vm0, %v518_v31  ;;  %v242_v48 = vmul.f32 %v1309_v62, %v86_v30 }
  0x3b   :  { %v397_v41 = vadd.f32 %v1314_v63, %v241_v29  ;;  %v522_v45 = vmax.f32 %v394_v32, 0.0  ;;  %v523_v46 = vmax.f32 %v395_v33, 0.0  ;;  %v524_v47 = vmax.f32 %v396_v34, 0.0  ;;  %v102_v32 = vld [vmem:[%s1935_s0 + $0x2c0] sm:$0xff] }
  0x3c   :  { %648 = vst.msk [vmem:[%s1938_s3 + $0x208] sm:$0xff] %vm582_vm0, %v519_v38  ;;  %649 = vst.msk [vmem:[%s1938_s3 + $0x210] sm:$0xff] %vm582_vm0, %v520_v39  ;;  %v243_v51 = vmul.f32 %v1309_v62, %v87_v35  ;;  %v244_v52 = vmul.f32 %v1309_v62, %v88_v36  ;;  %v245_v53 = vmul.f32 %v1309_v62, %v89_v37  ;;  %v103_v37 = vld [vmem:[%s1935_s0 + $0x2c8] sm:$0xff]  ;;  %v104_v38 = vld [vmem:[%s1935_s0 + $0x2d0] sm:$0xff] }
  0x3d   :  { %650 = vst.msk [vmem:[%s1938_s3 + $0x218] sm:$0xff] %vm582_vm0, %v521_v40  ;;  %v525_v50 = vmax.f32 %v397_v41, 0.0  ;;  %651 = vst.msk [vmem:[%s1938_s3 + $0x220] sm:$0xff] %vm582_vm0, %v522_v45  ;;  %v398_v54 = vadd.f32 %v1314_v63, %v242_v48  ;;  %v246_v55 = vmul.f32 %v1309_v62, %v90_v42  ;;  %v247_v56 = vmul.f32 %v1309_v62, %v91_v43  ;;  %v105_v39 = vld [vmem:[%s1935_s0 + $0x2d8] sm:$0xff]  ;;  %v107_v45 = vld [vmem:[%s1935_s0 + $0x2e8] sm:$0xff] }
  0x3e   :  { %652 = vst.msk [vmem:[%s1938_s3 + $0x228] sm:$0xff] %vm582_vm0, %v523_v46  ;;  %653 = vst.msk [vmem:[%s1938_s3 + $0x230] sm:$0xff] %vm582_vm0, %v524_v47  ;;  %v248_v59 = vmul.f32 %v1309_v62, %v92_v44  ;;  %v399_v60 = vadd.f32 %v1314_v63, %v243_v51  ;;  %v400_v61 = vadd.f32 %v1314_v63, %v244_v52  ;;  %v106_v44 = vld [vmem:[%s1935_s0 + $0x2e0] sm:$0xff]  ;;  %v108_v46 = vld [vmem:[%s1935_s0 + $0x2f0] sm:$0xff] }
  0x3f   :  { %654 = vst.msk [vmem:[%s1938_s3 + $0x238] sm:$0xff] %vm582_vm0, %v525_v50  ;;  %v401_v1 = vadd.f32 %v1314_v63, %v245_v53  ;;  %v249_v0 = vmul.f32 %v1309_v62, %v93_v49  ;;  %v526_v4 = vmax.f32 %v398_v54, 0.0  ;;  %v402_v57 = vadd.f32 %v1314_v63, %v246_v55  ;;  %v109_v51 = vld [vmem:[%s1935_s0 + $0x2f8] sm:$0xff] }
  0x40   :  { %v403_v5 = vadd.f32 %v1314_v63, %v247_v56  ;;  %v404_v6 = vadd.f32 %v1314_v63, %v248_v59  ;;  %v527_v10 = vmax.f32 %v399_v60, 0.0  ;;  %v528_v11 = vmax.f32 %v400_v61, 0.0 }
  0x41   :  { %v529_v2 = vmax.f32 %v401_v1, 0.0  ;;  %v405_v12 = vadd.f32 %v1314_v63, %v249_v0  ;;  %655 = vst.msk [vmem:[%s1938_s3 + $0x240] sm:$0xff] %vm582_vm0, %v526_v4  ;;  %v530_v58 = vmax.f32 %v402_v57, 0.0  ;;  %v250_v18 = vmul.f32 %v1309_v62, %v94_v3  ;;  %v110_v57 = vld [vmem:[%s1935_s0 + $0x300] sm:$0xff] }
  0x42   :  { %v531_v16 = vmax.f32 %v403_v5, 0.0  ;;  %v532_v17 = vmax.f32 %v404_v6, 0.0  ;;  %656 = vst.msk [vmem:[%s1938_s3 + $0x248] sm:$0xff] %vm582_vm0, %v527_v10  ;;  %657 = vst.msk [vmem:[%s1938_s3 + $0x250] sm:$0xff] %vm582_vm0, %v528_v11  ;;  %v251_v21 = vmul.f32 %v1309_v62, %v95_v7  ;;  %v252_v22 = vmul.f32 %v1309_v62, %v96_v8  ;;  %v1607_v5 = vld [vmem:[%s1936_s1 + $0x3] ss:$0 sm:$0xff] }
  0x43   :  { %658 = vst.msk [vmem:[%s1938_s3 + $0x258] sm:$0xff] %vm582_vm0, %v529_v2  ;;  %v533_v20 = vmax.f32 %v405_v12, 0.0  ;;  %v253_v23 = vmul.f32 %v1309_v62, %v97_v9  ;;  %659 = vst.msk [vmem:[%s1938_s3 + $0x260] sm:$0xff] %vm582_vm0, %v530_v58  ;;  %v406_v24 = vadd.f32 %v1314_v63, %v250_v18  ;;  %v254_v25 = vmul.f32 %v1309_v62, %v98_v13  ;;  %v1612_v6 = vld [vmem:[%s1937_s2 + $0x3] ss:$0 sm:$0xff]  ;;  %v111_v10 = vld [vmem:[%s1935_s0 + $0x308] sm:$0xff] }
  0x44   :  { %660 = vst.msk [vmem:[%s1938_s3 + $0x268] sm:$0xff] %vm582_vm0, %v531_v16  ;;  %661 = vst.msk [vmem:[%s1938_s3 + $0x270] sm:$0xff] %vm582_vm0, %v532_v17  ;;  %v255_v26 = vmul.f32 %v1309_v62, %v99_v14  ;;  %v256_v27 = vmul.f32 %v1309_v62, %v100_v15  ;;  %v407_v28 = vadd.f32 %v1314_v63, %v251_v21  ;;  %v112_v11 = vld [vmem:[%s1935_s0 + $0x310] sm:$0xff]  ;;  %v113_v2 = vld [vmem:[%s1935_s0 + $0x318] sm:$0xff] }
  0x45   :  { %662 = vst.msk [vmem:[%s1938_s3 + $0x278] sm:$0xff] %vm582_vm0, %v533_v20  ;;  %v408_v29 = vadd.f32 %v1314_v63, %v252_v22  ;;  %v409_v30 = vadd.f32 %v1314_v63, %v253_v23  ;;  %v257_v31 = vmul.f32 %v1309_v62, %v101_v19  ;;  %v534_v33 = vmax.f32 %v406_v24, 0.0  ;;  %v114_v58 = vld [vmem:[%s1935_s0 + $0x320] sm:$0xff]  ;;  %v115_v16 = vld [vmem:[%s1935_s0 + $0x328] sm:$0xff]  ;;  %v116_v17 = vld [vmem:[%s1935_s0 + $0x330] sm:$0xff] }
  0x46   :  { %v410_v34 = vadd.f32 %v1314_v63, %v254_v25  ;;  %v411_v35 = vadd.f32 %v1314_v63, %v255_v26  ;;  %v412_v36 = vadd.f32 %v1314_v63, %v256_v27  ;;  %v535_v40 = vmax.f32 %v407_v28, 0.0  ;;  %v117_v21 = vld [vmem:[%s1935_s0 + $0x338] sm:$0xff] }
  0x47   :  { %v536_v41 = vmax.f32 %v408_v29, 0.0  ;;  %v537_v42 = vmax.f32 %v409_v30, 0.0  ;;  %v413_v43 = vadd.f32 %v1314_v63, %v257_v31  ;;  %663 = vst.msk [vmem:[%s1938_s3 + $0x280] sm:$0xff] %vm582_vm0, %v534_v33  ;;  %v258_v50 = vmul.f32 %v1309_v62, %v102_v32 }
  0x48   :  { %v538_v47 = vmax.f32 %v410_v34, 0.0  ;;  %v539_v48 = vmax.f32 %v411_v35, 0.0  ;;  %v540_v49 = vmax.f32 %v412_v36, 0.0  ;;  %664 = vst.msk [vmem:[%s1938_s3 + $0x288] sm:$0xff] %vm582_vm0, %v535_v40  ;;  %v259_v53 = vmul.f32 %v1309_v62, %v103_v37  ;;  %v118_v34 = vld [vmem:[%s1935_s0 + $0x340] sm:$0xff]  ;;  %v120_v40 = vld [vmem:[%s1935_s0 + $0x350] sm:$0xff] }
  0x49   :  { %665 = vst.msk [vmem:[%s1938_s3 + $0x290] sm:$0xff] %vm582_vm0, %v536_v41  ;;  %666 = vst.msk [vmem:[%s1938_s3 + $0x298] sm:$0xff] %vm582_vm0, %v537_v42  ;;  %v541_v52 = vmax.f32 %v413_v43, 0.0  ;;  %v260_v54 = vmul.f32 %v1309_v62, %v104_v38  ;;  %v261_v55 = vmul.f32 %v1309_v62, %v105_v39  ;;  %v414_v56 = vadd.f32 %v1314_v63, %v258_v50  ;;  %v119_v39 = vld [vmem:[%s1935_s0 + $0x348] sm:$0xff]  ;;  %v121_v41 = vld [vmem:[%s1935_s0 + $0x358] sm:$0xff] }
  0x4a   :  { %667 = vst.msk [vmem:[%s1938_s3 + $0x2a0] sm:$0xff] %vm582_vm0, %v538_v47  ;;  %668 = vst.msk [vmem:[%s1938_s3 + $0x2a8] sm:$0xff] %vm582_vm0, %v539_v48  ;;  %v262_v59 = vmul.f32 %v1309_v62, %v106_v44  ;;  %v263_v60 = vmul.f32 %v1309_v62, %v107_v45  ;;  %v264_v61 = vmul.f32 %v1309_v62, %v108_v46  ;;  %v122_v46 = vld [vmem:[%s1935_s0 + $0x360] sm:$0xff]  ;;  %v123_v47 = vld [vmem:[%s1935_s0 + $0x368] sm:$0xff] }
  0x4b   :  { %669 = vst.msk [vmem:[%s1938_s3 + $0x2b0] sm:$0xff] %vm582_vm0, %v540_v49  ;;  %670 = vst.msk [vmem:[%s1938_s3 + $0x2b8] sm:$0xff] %vm582_vm0, %v541_v52  ;;  %v415_v1 = vadd.f32 %v1314_v63, %v259_v53  ;;  %v416_v0 = vadd.f32 %v1314_v63, %v260_v54  ;;  %v417_v3 = vadd.f32 %v1314_v63, %v261_v55  ;;  %v542_v7 = vmax.f32 %v414_v56, 0.0  ;;  %v124_v48 = vld [vmem:[%s1935_s0 + $0x370] sm:$0xff]  ;;  %v125_v53 = vld [vmem:[%s1935_s0 + $0x378] sm:$0xff] }
  0x4c   :  { %v265_v4 = vmul.f32 %v1309_v62, %v109_v51  ;;  %v418_v8 = vadd.f32 %v1314_v63, %v262_v59  ;;  %v419_v9 = vadd.f32 %v1314_v63, %v263_v60  ;;  %v420_v62 = vadd.f32 %v1314_v63, %v264_v61 }
  0x4d   :  { %v543_v12 = vmax.f32 %v415_v1, 0.0  ;;  %v544_v13 = vmax.f32 %v416_v0, 0.0  ;;  %v545_v14 = vmax.f32 %v417_v3, 0.0  ;;  %671 = vst.msk [vmem:[%s1938_s3 + $0x2c0] sm:$0xff] %vm582_vm0, %v542_v7  ;;  %v266_v20 = vmul.f32 %v1607_v5, %v110_v57 }
  0x4e   :  { %v421_v15 = vadd.f32 %v1314_v63, %v265_v4  ;;  %v546_v18 = vmax.f32 %v418_v8, 0.0  ;;  %v547_v19 = vmax.f32 %v419_v9, 0.0  ;;  %v548_v63 = vmax.f32 %v420_v62, 0.0  ;;  %v126_v8 = vld [vmem:[%s1935_s0 + $0x380] sm:$0xff] }
  0x4f   :  { %672 = vst.msk [vmem:[%s1938_s3 + $0x2c8] sm:$0xff] %vm582_vm0, %v543_v12  ;;  %673 = vst.msk [vmem:[%s1938_s3 + $0x2d0] sm:$0xff] %vm582_vm0, %v544_v13  ;;  %v267_v23 = vmul.f32 %v1607_v5, %v111_v10  ;;  %v268_v24 = vmul.f32 %v1607_v5, %v112_v11  ;;  %v269_v25 = vmul.f32 %v1607_v5, %v113_v2  ;;  %v127_v2 = vld [vmem:[%s1935_s0 + $0x388] sm:$0xff]  ;;  %v128_v12 = vld [vmem:[%s1935_s0 + $0x390] sm:$0xff] }
  0x50   :  { %674 = vst.msk [vmem:[%s1938_s3 + $0x2d8] sm:$0xff] %vm582_vm0, %v545_v14  ;;  %v549_v22 = vmax.f32 %v421_v15, 0.0  ;;  %675 = vst.msk [vmem:[%s1938_s3 + $0x2e0] sm:$0xff] %vm582_vm0, %v546_v18  ;;  %v422_v26 = vadd.f32 %v1612_v6, %v266_v20  ;;  %v270_v27 = vmul.f32 %v1607_v5, %v114_v58  ;;  %v271_v28 = vmul.f32 %v1607_v5, %v115_v16  ;;  %v129_v13 = vld [vmem:[%s1935_s0 + $0x398] sm:$0xff]  ;;  %v131_v18 = vld [vmem:[%s1935_s0 + $0x3a8] sm:$0xff] }
  0x51   :  { %676 = vst.msk [vmem:[%s1938_s3 + $0x2e8] sm:$0xff] %vm582_vm0, %v547_v19  ;;  %677 = vst.msk [vmem:[%s1938_s3 + $0x2f0] sm:$0xff] %vm582_vm0, %v548_v63  ;;  %v272_v29 = vmul.f32 %v1607_v5, %v116_v17  ;;  %v423_v30 = vadd.f32 %v1612_v6, %v267_v23  ;;  %v424_v31 = vadd.f32 %v1612_v6, %v268_v24  ;;  %v130_v17 = vld [vmem:[%s1935_s0 + $0x3a0] sm:$0xff]  ;;  %v132_v19 = vld [vmem:[%s1935_s0 + $0x3b0] sm:$0xff] }
  0x52   :  { %678 = vst.msk [vmem:[%s1938_s3 + $0x2f8] sm:$0xff] %vm582_vm0, %v549_v22  ;;  %v425_v32 = vadd.f32 %v1612_v6, %v269_v25  ;;  %v273_v33 = vmul.f32 %v1607_v5, %v117_v21  ;;  %v550_v35 = vmax.f32 %v422_v26, 0.0  ;;  %v426_v36 = vadd.f32 %v1612_v6, %v270_v27  ;;  %v133_v23 = vld [vmem:[%s1935_s0 + $0x3b8] sm:$0xff] }
  0x53   :  { %v427_v37 = vadd.f32 %v1612_v6, %v271_v28  ;;  %v428_v38 = vadd.f32 %v1612_v6, %v272_v29  ;;  %v551_v42 = vmax.f32 %v423_v30, 0.0  ;;  %v552_v43 = vmax.f32 %v424_v31, 0.0 }
  0x54   :  { %v553_v44 = vmax.f32 %v425_v32, 0.0  ;;  %v429_v45 = vadd.f32 %v1612_v6, %v273_v33  ;;  %679 = vst.msk [vmem:[%s1938_s3 + $0x300] sm:$0xff] %vm582_vm0, %v550_v35  ;;  %v554_v49 = vmax.f32 %v426_v36, 0.0  ;;  %v274_v52 = vmul.f32 %v1607_v5, %v118_v34  ;;  %v134_v36 = vld [vmem:[%s1935_s0 + $0x3c0] sm:$0xff] }
  0x55   :  { %v555_v50 = vmax.f32 %v427_v37, 0.0  ;;  %v556_v51 = vmax.f32 %v428_v38, 0.0  ;;  %680 = vst.msk [vmem:[%s1938_s3 + $0x308] sm:$0xff] %vm582_vm0, %v551_v42  ;;  %681 = vst.msk [vmem:[%s1938_s3 + $0x310] sm:$0xff] %vm582_vm0, %v552_v43  ;;  %v275_v55 = vmul.f32 %v1607_v5, %v119_v39  ;;  %v276_v56 = vmul.f32 %v1607_v5, %v120_v40  ;;  %v136_v42 = vld [vmem:[%s1935_s0 + $0x3d0] sm:$0xff]  ;;  %v137_v43 = vld [vmem:[%s1935_s0 + $0x3d8] sm:$0xff] }
  0x56   :  { %682 = vst.msk [vmem:[%s1938_s3 + $0x318] sm:$0xff] %vm582_vm0, %v553_v44  ;;  %v557_v54 = vmax.f32 %v429_v45, 0.0  ;;  %v277_v59 = vmul.f32 %v1607_v5, %v121_v41  ;;  %683 = vst.msk [vmem:[%s1938_s3 + $0x320] sm:$0xff] %vm582_vm0, %v554_v49  ;;  %v430_v60 = vadd.f32 %v1612_v6, %v274_v52  ;;  %v278_v61 = vmul.f32 %v1607_v5, %v122_v46  ;;  %v135_v41 = vld [vmem:[%s1935_s0 + $0x3c8] sm:$0xff] }
  0x57   :  { %684 = vst.msk [vmem:[%s1938_s3 + $0x328] sm:$0xff] %vm582_vm0, %v555_v50  ;;  %685 = vst.msk [vmem:[%s1938_s3 + $0x330] sm:$0xff] %vm582_vm0, %v556_v51  ;;  %v279_v1 = vmul.f32 %v1607_v5, %v123_v47  ;;  %v280_v0 = vmul.f32 %v1607_v5, %v124_v48  ;;  %v431_v3 = vadd.f32 %v1612_v6, %v275_v55  ;;  %v138_v48 = vld [vmem:[%s1935_s0 + $0x3e0] sm:$0xff]  ;;  %v139_v49 = vld [vmem:[%s1935_s0 + $0x3e8] sm:$0xff] }
  0x58   :  { %686 = vst.msk [vmem:[%s1938_s3 + $0x338] sm:$0xff] %vm582_vm0, %v557_v54  ;;  %v432_v4 = vadd.f32 %v1612_v6, %v276_v56  ;;  %v433_v57 = vadd.f32 %v1612_v6, %v277_v59  ;;  %v281_v7 = vmul.f32 %v1607_v5, %v125_v53  ;;  %v558_v9 = vmax.f32 %v430_v60, 0.0  ;;  %v140_v50 = vld [vmem:[%s1935_s0 + $0x3f0] sm:$0xff]  ;;  %v141_v55 = vld [vmem:[%s1935_s0 + $0x3f8] sm:$0xff] }
  0x59   :  { %v434_v62 = vadd.f32 %v1612_v6, %v278_v61  ;;  %v435_v10 = vadd.f32 %v1612_v6, %v279_v1  ;;  %v436_v11 = vadd.f32 %v1612_v6, %v280_v0  ;;  %v559_v14 = vmax.f32 %v431_v3, 0.0 }
  0x5a   :  { %v560_v15 = vmax.f32 %v432_v4, 0.0  ;;  %v561_v58 = vmax.f32 %v433_v57, 0.0  ;;  %v437_v16 = vadd.f32 %v1612_v6, %v281_v7  ;;  %687 = vst.msk [vmem:[%s1938_s3 + $0x340] sm:$0xff] %vm582_vm0, %v558_v9  ;;  %v282_v22 = vmul.f32 %v1607_v5, %v126_v8 }
  0x5b   :  { %v562_v63 = vmax.f32 %v434_v62, 0.0  ;;  %v563_v20 = vmax.f32 %v435_v10, 0.0  ;;  %v564_v21 = vmax.f32 %v436_v11, 0.0  ;;  %688 = vst.msk [vmem:[%s1938_s3 + $0x348] sm:$0xff] %vm582_vm0, %v559_v14  ;;  %v283_v25 = vmul.f32 %v1607_v5, %v127_v2 }
  0x5c   :  { %689 = vst.msk [vmem:[%s1938_s3 + $0x350] sm:$0xff] %vm582_vm0, %v560_v15  ;;  %690 = vst.msk [vmem:[%s1938_s3 + $0x358] sm:$0xff] %vm582_vm0, %v561_v58  ;;  %v565_v24 = vmax.f32 %v437_v16, 0.0  ;;  %v284_v26 = vmul.f32 %v1607_v5, %v128_v12  ;;  %v285_v27 = vmul.f32 %v1607_v5, %v129_v13  ;;  %v438_v28 = vadd.f32 %v1612_v6, %v282_v22 }
  0x5d   :  { %691 = vst.msk [vmem:[%s1938_s3 + $0x360] sm:$0xff] %vm582_vm0, %v562_v63  ;;  %692 = vst.msk [vmem:[%s1938_s3 + $0x368] sm:$0xff] %vm582_vm0, %v563_v20  ;;  %v286_v29 = vmul.f32 %v1607_v5, %v130_v17  ;;  %v287_v30 = vmul.f32 %v1607_v5, %v131_v18  ;;  %v288_v31 = vmul.f32 %v1607_v5, %v132_v19 }
  0x5e   :  { %693 = vst.msk [vmem:[%s1938_s3 + $0x370] sm:$0xff] %vm582_vm0, %v564_v21  ;;  %694 = vst.msk [vmem:[%s1938_s3 + $0x378] sm:$0xff] %vm582_vm0, %v565_v24  ;;  %v439_v32 = vadd.f32 %v1612_v6, %v283_v25  ;;  %v440_v33 = vadd.f32 %v1612_v6, %v284_v26  ;;  %v441_v34 = vadd.f32 %v1612_v6, %v285_v27  ;;  %v566_v37 = vmax.f32 %v438_v28, 0.0 }
  0x5f   :  { %v289_v35 = vmul.f32 %v1607_v5, %v133_v23  ;;  %v442_v38 = vadd.f32 %v1612_v6, %v286_v29  ;;  %v443_v39 = vadd.f32 %v1612_v6, %v287_v30  ;;  %v444_v40 = vadd.f32 %v1612_v6, %v288_v31 }
  0x60   :  { %v567_v44 = vmax.f32 %v439_v32, 0.0  ;;  %v568_v45 = vmax.f32 %v440_v33, 0.0  ;;  %v569_v46 = vmax.f32 %v441_v34, 0.0  ;;  %695 = vst.msk [vmem:[%s1938_s3 + $0x380] sm:$0xff] %vm582_vm0, %v566_v37  ;;  %v290_v54 = vmul.f32 %v1607_v5, %v134_v36 }
  0x61   :  { %v445_v47 = vadd.f32 %v1612_v6, %v289_v35  ;;  %v570_v51 = vmax.f32 %v442_v38, 0.0  ;;  %v571_v52 = vmax.f32 %v443_v39, 0.0  ;;  %v572_v53 = vmax.f32 %v444_v40, 0.0 }
  0x62   :  { %696 = vst.msk [vmem:[%s1938_s3 + $0x388] sm:$0xff] %vm582_vm0, %v567_v44  ;;  %697 = vst.msk [vmem:[%s1938_s3 + $0x390] sm:$0xff] %vm582_vm0, %v568_v45  ;;  %v291_v59 = vmul.f32 %v1607_v5, %v135_v41  ;;  %v292_v60 = vmul.f32 %v1607_v5, %v136_v42  ;;  %v293_v61 = vmul.f32 %v1607_v5, %v137_v43 }
  0x63   :  { %698 = vst.msk [vmem:[%s1938_s3 + $0x398] sm:$0xff] %vm582_vm0, %v569_v46  ;;  %v573_v56 = vmax.f32 %v445_v47, 0.0  ;;  %699 = vst.msk [vmem:[%s1938_s3 + $0x3a0] sm:$0xff] %vm582_vm0, %v570_v51  ;;  %v446_v1 = vadd.f32 %v1612_v6, %v290_v54  ;;  %v294_v0 = vmul.f32 %v1607_v5, %v138_v48  ;;  %v295_v3 = vmul.f32 %v1607_v5, %v139_v49 }
  0x64   :  { %700 = vst.msk [vmem:[%s1938_s3 + $0x3a8] sm:$0xff] %vm582_vm0, %v571_v52  ;;  %701 = vst.msk [vmem:[%s1938_s3 + $0x3b0] sm:$0xff] %vm582_vm0, %v572_v53  ;;  %v296_v4 = vmul.f32 %v1607_v5, %v140_v50  ;;  %v447_v57 = vadd.f32 %v1612_v6, %v291_v59  ;;  %v448_v7 = vadd.f32 %v1612_v6, %v292_v60 }
  0x65   :  { %702 = vst.msk [vmem:[%s1938_s3 + $0x3b8] sm:$0xff] %vm582_vm0, %v573_v56  ;;  %v449_v8 = vadd.f32 %v1612_v6, %v293_v61  ;;  %v297_v9 = vmul.f32 %v1607_v5, %v141_v55  ;;  %v574_v62 = vmax.f32 %v446_v1, 0.0  ;;  %v450_v10 = vadd.f32 %v1612_v6, %v294_v0 }
  0x66   :  { %v451_v11 = vadd.f32 %v1612_v6, %v295_v3  ;;  %v452_v2 = vadd.f32 %v1612_v6, %v296_v4  ;;  %v575_v12 = vmax.f32 %v447_v57, 0.0  ;;  %v576_v13 = vmax.f32 %v448_v7, 0.0 }
  0x67   :  { %v577_v14 = vmax.f32 %v449_v8, 0.0  ;;  %v453_v15 = vadd.f32 %v1612_v6, %v297_v9  ;;  %703 = vst.msk [vmem:[%s1938_s3 + $0x3c0] sm:$0xff] %vm582_vm0, %v574_v62  ;;  %v578_v58 = vmax.f32 %v450_v10, 0.0 }
  0x68   :  { %v579_v16 = vmax.f32 %v451_v11, 0.0  ;;  %v580_v5 = vmax.f32 %v452_v2, 0.0  ;;  %704 = vst.msk [vmem:[%s1938_s3 + $0x3c8] sm:$0xff] %vm582_vm0, %v575_v12  ;;  %705 = vst.msk [vmem:[%s1938_s3 + $0x3d0] sm:$0xff] %vm582_vm0, %v576_v13 }
  0x69   :  { %706 = vst.msk [vmem:[%s1938_s3 + $0x3d8] sm:$0xff] %vm582_vm0, %v577_v14  ;;  %v581_v6 = vmax.f32 %v453_v15, 0.0  ;;  %707 = vst.msk [vmem:[%s1938_s3 + $0x3e0] sm:$0xff] %vm582_vm0, %v578_v58 }
  0x6a   :  { %708 = vst.msk [vmem:[%s1938_s3 + $0x3e8] sm:$0xff] %vm582_vm0, %v579_v16  ;;  %709 = vst.msk [vmem:[%s1938_s3 + $0x3f0] sm:$0xff] %vm582_vm0, %v580_v5 }
  0x6b   :  { %710 = vst.msk [vmem:[%s1938_s3 + $0x3f8] sm:$0xff] %vm582_vm0, %v581_v6 }

// kernel: double_conv_forward.18
= control target key start
LH: loop header
LB: loop body
LE: loop exit
PB: predicated region body
PF: predicated region fallthrough
CT: control target
= control target key end

     0   :  { %s1255_s12 = smov 0   ;;  %s1627_s0 = inlined_call_operand.vmem [shape: f32[1024,36], index: 0, kind: input, shape index: {}]   ;;  %s1628_s1 = inlined_call_operand.vmem [shape: f32[36,4], index: 1, kind: input, shape index: {}]   ;;  %s1629_s2 = inlined_call_operand.vmem [shape: f32[1,4], index: 2, kind: input, shape index: {}]   ;;  %s1630_s3 = inlined_call_operand.vmem [shape: f32[1024,4], index: 3, kind: output, shape index: {}]  }
   0x1 LB: > { %s953_s13 = sadd.s32 4294967295, %s1233_s12   ;;  %p957_p0 = scmp.ge.s32.totalorder %s1233_s12, 1  ;;  %s1233_s12 = sphi %s1255_s12, %s13_s12  }
   0x2   : > { %p138_p1 = scmp.lt.s32.totalorder %s1233_s12, 3 }
   0x4   : > { %p139_p2 = pnand %p957_p0, %p138_p1 }
   0x5   : > { %v238_v0 = vld [vmem:[%s1628_s1] sm:$0xff] (!%p139_p2)  ;;  %v239_v1 = vld [vmem:[%s1628_s1 + $0x8] sm:$0xff] (!%p139_p2)  ;;  %v240_v2 = vld [vmem:[%s1628_s1 + $0x10] sm:$0xff] (!%p139_p2)  ;;  %s958_s20 = sshll.u32 (!%p139_p2), %s953_s13, 6  ;;  %vm443_vm0 = vcmask (!%p139_p2), 1043456   ;;  %vm250_vm1 = vcmask (!%p139_p2), 293888  }
   0x6   : > { %142 = sbr.rel (%p139_p2) target bundleno = 295 (0x127), region = 32  ;;  %v1205_v3 = vpack.c.bf16 (!%p139_p2), %v239_v1, %v238_v0  ;;  %v241_v4 = vld [vmem:[%s1628_s1 + $0x18] sm:$0xff] (!%p139_p2)  ;;  %p163_p3 = scmp.lt.s32.totalorder (!%p139_p2), %s958_s20, 127  ;;  %v242_v6 = vld [vmem:[%s1628_s1 + $0x20] sm:$0xf] (!%p139_p2)  ;;  %vm832_vm2 = vcmask (!%p139_p2), 31744  }
   0x7   : > { %v1209_v5 = vpack.c.bf16 (!%p139_p2), %v241_v4, %v240_v2 }
   0x8   : > { %1206 = vmatprep.subr.bf16.mxu0 (!%p139_p2), %v1205_v3  ;;  %1213 = vmatprep.subr.bf16.mxu1 (!%p139_p2), %v1205_v3 }
   0x9   : > { %1208 = vmatpush3.bf16.msra.mxu0 (!%p139_p2), %v1205_v3  ;;  %1216 = vmatpush3.bf16.msra.mxu1 (!%p139_p2), %v1205_v3 }
   0xa   : > { %1210 = vmatprep.subr.bf16.mxu0 (!%p139_p2), %v1209_v5  ;;  %1214 = vmatprep.subr.bf16.mxu1 (!%p139_p2), %v1209_v5 }
   0xd   : > { %s1632_s20 = smov (!%p163_p3, %s958_s20), 127  ;;  %1212 = vmatpush3.bf16.msra.mxu0 %v1209_v5  ;;  %1217 = vmatpush3.bf16.msra.mxu1 %v1209_v5 }
   0xe   : > { %s959_s23 = sshll.u32 %s1632_s20, 3  ;;  %1107 = vmatprep.subr.msk.mxu0 %vm443_vm0, %v242_v6  ;;  %1215 = vmatprep.subr.msk.mxu1 %vm443_vm0, %v242_v6 }
   0xf   : > { %s1286_s28 = scalar_lea.vmem %s1627_s0, %s959_s23  ;;  %s1430_s6 = scalar_lea.vmem %s1630_s3, %s959_s23 }
  0x10   : > { %v174_v7 = vld [vmem:[%s1286_s28] sm:$0xff]  ;;  %v175_v9 = vld [vmem:[%s1286_s28 + $0x8] sm:$0xff]  ;;  %v176_v11 = vld [vmem:[%s1286_s28 + $0x10] sm:$0xff] }
  0x11   : > { %v206_v8 = vld [vmem:[%s1286_s28 + $0x100] sm:$0xff]  ;;  %1109 = vmatprep.mubr.msk.f32.mxu0 %vm250_vm1, %v174_v7  ;;  %v207_v10 = vld [vmem:[%s1286_s28 + $0x108] sm:$0xff]  ;;  %v208_v12 = vld [vmem:[%s1286_s28 + $0x110] sm:$0xff]  ;;  %1108 = vmatpush3.msk.msra.mxu0 %vm443_vm0, %v242_v6 }
  0x12   : > { %1157 = vmatprep.mubr.msk.f32.mxu1 %vm250_vm1, %v206_v8  ;;  %1218 = vmatpush3.msk.msra.mxu1 %vm443_vm0, %v242_v6  ;;  %v177_v13 = vld [vmem:[%s1286_s28 + $0x18] sm:$0xff]  ;;  %v178_v15 = vld [vmem:[%s1286_s28 + $0x20] sm:$0xff]  ;;  %v179_v17 = vld [vmem:[%s1286_s28 + $0x28] sm:$0xff] }
  0x13   : > { %1110 = vmatmul.mubr.msk.f32.vlgmr.msra.gmra.mrb[0].mxu0 %vm250_vm1, %v175_v9  ;;  %1158 = vmatmul.mubr.msk.f32.vlgmr.msra.gmra.mrb[0].mxu1 %vm250_vm1, %v207_v10  ;;  %v209_v14 = vld [vmem:[%s1286_s28 + $0x118] sm:$0xff]  ;;  %v210_v16 = vld [vmem:[%s1286_s28 + $0x120] sm:$0xff]  ;;  %v211_v18 = vld [vmem:[%s1286_s28 + $0x128] sm:$0xff] }
  0x14   : > { %1112 = vmatprep.mubr.msk.f32.mxu0 %vm250_vm1, %v176_v11  ;;  %1160 = vmatprep.mubr.msk.f32.mxu1 %vm250_vm1, %v208_v12  ;;  %v180_v19 = vld [vmem:[%s1286_s28 + $0x30] sm:$0xff]  ;;  %v181_v21 = vld [vmem:[%s1286_s28 + $0x38] sm:$0xff]  ;;  %v182_v23 = vld [vmem:[%s1286_s28 + $0x40] sm:$0xff] }
  0x15   : > { %v212_v20 = vld [vmem:[%s1286_s28 + $0x130] sm:$0xff]  ;;  %v213_v22 = vld [vmem:[%s1286_s28 + $0x138] sm:$0xff]  ;;  %v214_v24 = vld [vmem:[%s1286_s28 + $0x140] sm:$0xff] }
  0x16   : > { %v183_v25 = vld [vmem:[%s1286_s28 + $0x48] sm:$0xff]  ;;  %v184_v27 = vld [vmem:[%s1286_s28 + $0x50] sm:$0xff]  ;;  %v185_v29 = vld [vmem:[%s1286_s28 + $0x58] sm:$0xff] }
  0x17   : > { %1113 = vmatmul.mubr.msk.f32.gmra.mrb[2].mxu0 %vm250_vm1, %v177_v13  ;;  %1161 = vmatmul.mubr.msk.f32.gmra.mrb[2].mxu1 %vm250_vm1, %v209_v14  ;;  %v215_v26 = vld [vmem:[%s1286_s28 + $0x148] sm:$0xff]  ;;  %v216_v28 = vld [vmem:[%s1286_s28 + $0x150] sm:$0xff]  ;;  %v217_v30 = vld [vmem:[%s1286_s28 + $0x158] sm:$0xff] }
  0x18   : > { %1115 = vmatprep.mubr.msk.f32.mxu0 %vm250_vm1, %v178_v15  ;;  %1163 = vmatprep.mubr.msk.f32.mxu1 %vm250_vm1, %v210_v16  ;;  %v186_v31 = vld [vmem:[%s1286_s28 + $0x60] sm:$0xff]  ;;  %v187_v33 = vld [vmem:[%s1286_s28 + $0x68] sm:$0xff]  ;;  %v188_v35 = vld [vmem:[%s1286_s28 + $0x70] sm:$0xff] }
  0x19   : > { %v218_v32 = vld [vmem:[%s1286_s28 + $0x160] sm:$0xff]  ;;  %v219_v34 = vld [vmem:[%s1286_s28 + $0x168] sm:$0xff]  ;;  %v220_v36 = vld [vmem:[%s1286_s28 + $0x170] sm:$0xff] }
  0x1a   : > { %v189_v37 = vld [vmem:[%s1286_s28 + $0x78] sm:$0xff]  ;;  %v190_v39 = vld [vmem:[%s1286_s28 + $0x80] sm:$0xff]  ;;  %v191_v41 = vld [vmem:[%s1286_s28 + $0x88] sm:$0xff] }
  0x1b   : > { %1116 = vmatmul.mubr.msk.f32.gmra.mrb[4].mxu0 %vm250_vm1, %v179_v17  ;;  %1164 = vmatmul.mubr.msk.f32.gmra.mrb[4].mxu1 %vm250_vm1, %v211_v18  ;;  %v221_v38 = vld [vmem:[%s1286_s28 + $0x178] sm:$0xff]  ;;  %v222_v40 = vld [vmem:[%s1286_s28 + $0x180] sm:$0xff]  ;;  %v223_v42 = vld [vmem:[%s1286_s28 + $0x188] sm:$0xff] }
  0x1c   : > { %1118 = vmatprep.mubr.msk.f32.mxu0 %vm250_vm1, %v180_v19  ;;  %1166 = vmatprep.mubr.msk.f32.mxu1 %vm250_vm1, %v212_v20  ;;  %v192_v43 = vld [vmem:[%s1286_s28 + $0x90] sm:$0xff]  ;;  %v193_v45 = vld [vmem:[%s1286_s28 + $0x98] sm:$0xff]  ;;  %v194_v47 = vld [vmem:[%s1286_s28 + $0xa0] sm:$0xff] }
  0x1d   : > { %v224_v44 = vld [vmem:[%s1286_s28 + $0x190] sm:$0xff]  ;;  %v225_v46 = vld [vmem:[%s1286_s28 + $0x198] sm:$0xff]  ;;  %v226_v48 = vld [vmem:[%s1286_s28 + $0x1a0] sm:$0xff] }
  0x1e   : > { %v195_v49 = vld [vmem:[%s1286_s28 + $0xa8] sm:$0xff]  ;;  %v196_v51 = vld [vmem:[%s1286_s28 + $0xb0] sm:$0xff]  ;;  %v197_v53 = vld [vmem:[%s1286_s28 + $0xb8] sm:$0xff] }
  0x1f   : > { %1119 = vmatmul.mubr.msk.f32.gmra.mrb[6].mxu0 %vm250_vm1, %v181_v21  ;;  %1167 = vmatmul.mubr.msk.f32.gmra.mrb[6].mxu1 %vm250_vm1, %v213_v22  ;;  %v227_v50 = vld [vmem:[%s1286_s28 + $0x1a8] sm:$0xff]  ;;  %v228_v52 = vld [vmem:[%s1286_s28 + $0x1b0] sm:$0xff]  ;;  %v229_v54 = vld [vmem:[%s1286_s28 + $0x1b8] sm:$0xff] }
  0x20   : > { %1121 = vmatprep.mubr.msk.f32.mxu0 %vm250_vm1, %v182_v23  ;;  %1169 = vmatprep.mubr.msk.f32.mxu1 %vm250_vm1, %v214_v24  ;;  %v198_v55 = vld [vmem:[%s1286_s28 + $0xc0] sm:$0xff]  ;;  %v199_v57 = vld [vmem:[%s1286_s28 + $0xc8] sm:$0xff]  ;;  %v200_v59 = vld [vmem:[%s1286_s28 + $0xd0] sm:$0xff] }
  0x21   : > { %v230_v56 = vld [vmem:[%s1286_s28 + $0x1c0] sm:$0xff]  ;;  %v231_v58 = vld [vmem:[%s1286_s28 + $0x1c8] sm:$0xff]  ;;  %v232_v60 = vld [vmem:[%s1286_s28 + $0x1d0] sm:$0xff] }
  0x22   : > { %v201_v61 = vld [vmem:[%s1286_s28 + $0xd8] sm:$0xff]  ;;  %v202_v63 = vld [vmem:[%s1286_s28 + $0xe0] sm:$0xff]  ;;  %v203_v1 = vld [vmem:[%s1286_s28 + $0xe8] sm:$0xff] }
  0x23   : > { %1122 = vmatmul.mubr.msk.f32.gmra.mrb[8].mxu0 %vm250_vm1, %v183_v25  ;;  %1170 = vmatmul.mubr.msk.f32.gmra.mrb[8].mxu1 %vm250_vm1, %v215_v26  ;;  %v233_v62 = vld [vmem:[%s1286_s28 + $0x1d8] sm:$0xff]  ;;  %v234_v0 = vld [vmem:[%s1286_s28 + $0x1e0] sm:$0xff]  ;;  %v235_v2 = vld [vmem:[%s1286_s28 + $0x1e8] sm:$0xff] }
  0x24   : > { %1124 = vmatprep.mubr.msk.f32.mxu0 %vm250_vm1, %v184_v27  ;;  %1172 = vmatprep.mubr.msk.f32.mxu1 %vm250_vm1, %v216_v28  ;;  %v204_v3 = vld [vmem:[%s1286_s28 + $0xf0] sm:$0xff]  ;;  %v205_v5 = vld [vmem:[%s1286_s28 + $0xf8] sm:$0xff]  ;;  %v1423_v7 = vld [vmem:[%s1629_s2] ss:$0 sm:$0xff] }
  0x25   : > { %v236_v4 = vld [vmem:[%s1286_s28 + $0x1f0] sm:$0xff]  ;;  %v237_v6 = vld [vmem:[%s1286_s28 + $0x1f8] sm:$0xff] }
  0x27   : > { %1125 = vmatmul.mubr.msk.f32.gmra.mrb[10].mxu0 %vm250_vm1, %v185_v29  ;;  %1173 = vmatmul.mubr.msk.f32.gmra.mrb[10].mxu1 %vm250_vm1, %v217_v30 }
  0x28   : > { %1127 = vmatprep.mubr.msk.f32.mxu0 %vm250_vm1, %v186_v31  ;;  %1175 = vmatprep.mubr.msk.f32.mxu1 %vm250_vm1, %v218_v32 }
  0x2b   : > { %1128 = vmatmul.mubr.msk.f32.gmra.mrb[12].mxu0 %vm250_vm1, %v187_v33  ;;  %1176 = vmatmul.mubr.msk.f32.gmra.mrb[12].mxu1 %vm250_vm1, %v219_v34 }
  0x2c   : > { %1130 = vmatprep.mubr.msk.f32.mxu0 %vm250_vm1, %v188_v35  ;;  %1178 = vmatprep.mubr.msk.f32.mxu1 %vm250_vm1, %v220_v36 }
  0x2f   : > { %1131 = vmatmul.mubr.msk.f32.gmra.mrb[14].mxu0 %vm250_vm1, %v189_v37  ;;  %1179 = vmatmul.mubr.msk.f32.gmra.mrb[14].mxu1 %vm250_vm1, %v221_v38 }
  0x30   : > { %1133 = vmatprep.mubr.msk.f32.mxu0 %vm250_vm1, %v190_v39  ;;  %1181 = vmatprep.mubr.msk.f32.mxu1 %vm250_vm1, %v222_v40 }
  0x33   : > { %1134 = vmatmul.mubr.msk.f32.gmra.mrb[16].mxu0 %vm250_vm1, %v191_v41  ;;  %1182 = vmatmul.mubr.msk.f32.gmra.mrb[16].mxu1 %vm250_vm1, %v223_v42 }
  0x34   : > { %1136 = vmatprep.mubr.msk.f32.mxu0 %vm250_vm1, %v192_v43  ;;  %1184 = vmatprep.mubr.msk.f32.mxu1 %vm250_vm1, %v224_v44 }
  0x37   : > { %1137 = vmatmul.mubr.msk.f32.gmra.mrb[18].mxu0 %vm250_vm1, %v193_v45  ;;  %1185 = vmatmul.mubr.msk.f32.gmra.mrb[18].mxu1 %vm250_vm1, %v225_v46 }
  0x38   : > { %1139 = vmatprep.mubr.msk.f32.mxu0 %vm250_vm1, %v194_v47  ;;  %1187 = vmatprep.mubr.msk.f32.mxu1 %vm250_vm1, %v226_v48 }
  0x3b   : > { %1140 = vmatmul.mubr.msk.f32.gmra.mrb[20].mxu0 %vm250_vm1, %v195_v49  ;;  %1188 = vmatmul.mubr.msk.f32.gmra.mrb[20].mxu1 %vm250_vm1, %v227_v50 }
  0x3c   : > { %1142 = vmatprep.mubr.msk.f32.mxu0 %vm250_vm1, %v196_v51  ;;  %1190 = vmatprep.mubr.msk.f32.mxu1 %vm250_vm1, %v228_v52 }
  0x3f   : > { %1143 = vmatmul.mubr.msk.f32.gmra.mrb[22].mxu0 %vm250_vm1, %v197_v53  ;;  %1191 = vmatmul.mubr.msk.f32.gmra.mrb[22].mxu1 %vm250_vm1, %v229_v54 }
  0x40   : > { %1145 = vmatprep.mubr.msk.f32.mxu0 %vm250_vm1, %v198_v55  ;;  %1193 = vmatprep.mubr.msk.f32.mxu1 %vm250_vm1, %v230_v56 }
  0x43   : > { %1146 = vmatmul.mubr.msk.f32.gmra.mrb[24].mxu0 %vm250_vm1, %v199_v57  ;;  %1194 = vmatmul.mubr.msk.f32.gmra.mrb[24].mxu1 %vm250_vm1, %v231_v58 }
  0x44   : > { %1148 = vmatprep.mubr.msk.f32.mxu0 %vm250_vm1, %v200_v59  ;;  %1196 = vmatprep.mubr.msk.f32.mxu1 %vm250_vm1, %v232_v60 }
  0x47   : > { %1149 = vmatmul.mubr.msk.f32.gmra.mrb[26].mxu0 %vm250_vm1, %v201_v61  ;;  %1197 = vmatmul.mubr.msk.f32.gmra.mrb[26].mxu1 %vm250_vm1, %v233_v62 }
  0x48   : > { %1151 = vmatprep.mubr.msk.f32.mxu0 %vm250_vm1, %v202_v63  ;;  %1199 = vmatprep.mubr.msk.f32.mxu1 %vm250_vm1, %v234_v0 }
  0x4b   : > { %1152 = vmatmul.mubr.msk.f32.gmra.mrb[28].mxu0 %vm250_vm1, %v203_v1  ;;  %1200 = vmatmul.mubr.msk.f32.gmra.mrb[28].mxu1 %vm250_vm1, %v235_v2 }
  0x4c   : > { %1154 = vmatprep.mubr.msk.f32.mxu0 %vm250_vm1, %v204_v3  ;;  %1202 = vmatprep.mubr.msk.f32.mxu1 %vm250_vm1, %v236_v4 }
  0x4f   : > { %1155 = vmatmul.mubr.msk.f32.gmra.mrb[30].mxu0 %vm250_vm1, %v205_v5  ;;  %1203 = vmatmul.mubr.msk.f32.gmra.mrb[30].mxu1 %vm250_vm1, %v237_v6 }
  0xe6   : > { %v1111_v8 = vpop.f32.mrb[0].mxu0  ;;  %v1159_v9 = vpop.f32.mrb[0].mxu1 }
  0xe7   : > { %v519_v10 = vadd.f32 %v1111_v8, %v1423_v7  ;;  %v679_v11 = vadd.f32 %v1159_v9, %v1423_v7  ;;  %v513_v12 = vpop.f32.mrb[1].mxu0  ;;  %v673_v13 = vpop.f32.mrb[1].mxu1 }
  0xe8   : > { %v514_v14 = vadd.f32 %v1423_v7, %v513_v12  ;;  %v674_v15 = vadd.f32 %v1423_v7, %v673_v13 }
  0xe9   : > { %834 = vst.msk [vmem:[%s1430_s6 + $0x8] sm:$0xff] %vm832_vm2, %v519_v10  ;;  %866 = vst.msk [vmem:[%s1430_s6 + $0x108] sm:$0xff] %vm832_vm2, %v679_v11 }
  0xea   : > { %833 = vst.msk [vmem:[%s1430_s6] sm:$0xff] %vm832_vm2, %v514_v14  ;;  %865 = vst.msk [vmem:[%s1430_s6 + $0x100] sm:$0xff] %vm832_vm2, %v674_v15  ;;  %v1114_v16 = vpop.f32.mrb[2].mxu0  ;;  %v1162_v17 = vpop.f32.mrb[2].mxu1 }
  0xeb   : > { %v529_v18 = vadd.f32 %v1114_v16, %v1423_v7  ;;  %v689_v19 = vadd.f32 %v1162_v17, %v1423_v7  ;;  %v523_v20 = vpop.f32.mrb[3].mxu0  ;;  %v683_v21 = vpop.f32.mrb[3].mxu1 }
  0xec   : > { %v524_v22 = vadd.f32 %v1423_v7, %v523_v20  ;;  %v684_v23 = vadd.f32 %v1423_v7, %v683_v21 }
  0xed   : > { %836 = vst.msk [vmem:[%s1430_s6 + $0x18] sm:$0xff] %vm832_vm2, %v529_v18  ;;  %868 = vst.msk [vmem:[%s1430_s6 + $0x118] sm:$0xff] %vm832_vm2, %v689_v19 }
  0xee   : > { %835 = vst.msk [vmem:[%s1430_s6 + $0x10] sm:$0xff] %vm832_vm2, %v524_v22  ;;  %867 = vst.msk [vmem:[%s1430_s6 + $0x110] sm:$0xff] %vm832_vm2, %v684_v23  ;;  %v1117_v24 = vpop.f32.mrb[4].mxu0  ;;  %v1165_v25 = vpop.f32.mrb[4].mxu1 }
  0xef   : > { %v539_v26 = vadd.f32 %v1117_v24, %v1423_v7  ;;  %v699_v27 = vadd.f32 %v1165_v25, %v1423_v7  ;;  %v533_v28 = vpop.f32.mrb[5].mxu0  ;;  %v693_v29 = vpop.f32.mrb[5].mxu1 }
  0xf0   : > { %v534_v30 = vadd.f32 %v1423_v7, %v533_v28  ;;  %v694_v31 = vadd.f32 %v1423_v7, %v693_v29 }
  0xf1   : > { %838 = vst.msk [vmem:[%s1430_s6 + $0x28] sm:$0xff] %vm832_vm2, %v539_v26  ;;  %870 = vst.msk [vmem:[%s1430_s6 + $0x128] sm:$0xff] %vm832_vm2, %v699_v27 }
  0xf2   : > { %837 = vst.msk [vmem:[%s1430_s6 + $0x20] sm:$0xff] %vm832_vm2, %v534_v30  ;;  %869 = vst.msk [vmem:[%s1430_s6 + $0x120] sm:$0xff] %vm832_vm2, %v694_v31  ;;  %v1120_v32 = vpop.f32.mrb[6].mxu0  ;;  %v1168_v33 = vpop.f32.mrb[6].mxu1 }
  0xf3   : > { %v549_v34 = vadd.f32 %v1120_v32, %v1423_v7  ;;  %v709_v35 = vadd.f32 %v1168_v33, %v1423_v7  ;;  %v543_v36 = vpop.f32.mrb[7].mxu0  ;;  %v703_v37 = vpop.f32.mrb[7].mxu1 }
  0xf4   : > { %v544_v38 = vadd.f32 %v1423_v7, %v543_v36  ;;  %v704_v39 = vadd.f32 %v1423_v7, %v703_v37 }
  0xf5   : > { %840 = vst.msk [vmem:[%s1430_s6 + $0x38] sm:$0xff] %vm832_vm2, %v549_v34  ;;  %872 = vst.msk [vmem:[%s1430_s6 + $0x138] sm:$0xff] %vm832_vm2, %v709_v35 }
  0xf6   : > { %839 = vst.msk [vmem:[%s1430_s6 + $0x30] sm:$0xff] %vm832_vm2, %v544_v38  ;;  %871 = vst.msk [vmem:[%s1430_s6 + $0x130] sm:$0xff] %vm832_vm2, %v704_v39  ;;  %v1123_v40 = vpop.f32.mrb[8].mxu0  ;;  %v1171_v41 = vpop.f32.mrb[8].mxu1 }
  0xf7   : > { %v559_v42 = vadd.f32 %v1123_v40, %v1423_v7  ;;  %v719_v43 = vadd.f32 %v1171_v41, %v1423_v7  ;;  %v553_v44 = vpop.f32.mrb[9].mxu0  ;;  %v713_v45 = vpop.f32.mrb[9].mxu1 }
  0xf8   : > { %v554_v46 = vadd.f32 %v1423_v7, %v553_v44  ;;  %v714_v47 = vadd.f32 %v1423_v7, %v713_v45 }
  0xf9   : > { %842 = vst.msk [vmem:[%s1430_s6 + $0x48] sm:$0xff] %vm832_vm2, %v559_v42  ;;  %874 = vst.msk [vmem:[%s1430_s6 + $0x148] sm:$0xff] %vm832_vm2, %v719_v43 }
  0xfa   : > { %841 = vst.msk [vmem:[%s1430_s6 + $0x40] sm:$0xff] %vm832_vm2, %v554_v46  ;;  %873 = vst.msk [vmem:[%s1430_s6 + $0x140] sm:$0xff] %vm832_vm2, %v714_v47  ;;  %v1126_v48 = vpop.f32.mrb[10].mxu0  ;;  %v1174_v49 = vpop.f32.mrb[10].mxu1 }
  0xfb   : > { %v569_v50 = vadd.f32 %v1126_v48, %v1423_v7  ;;  %v729_v51 = vadd.f32 %v1174_v49, %v1423_v7  ;;  %v563_v52 = vpop.f32.mrb[11].mxu0  ;;  %v723_v53 = vpop.f32.mrb[11].mxu1 }
  0xfc   : > { %v564_v54 = vadd.f32 %v1423_v7, %v563_v52  ;;  %v724_v55 = vadd.f32 %v1423_v7, %v723_v53 }
  0xfd   : > { %844 = vst.msk [vmem:[%s1430_s6 + $0x58] sm:$0xff] %vm832_vm2, %v569_v50  ;;  %876 = vst.msk [vmem:[%s1430_s6 + $0x158] sm:$0xff] %vm832_vm2, %v729_v51 }
  0xfe   : > { %843 = vst.msk [vmem:[%s1430_s6 + $0x50] sm:$0xff] %vm832_vm2, %v564_v54  ;;  %875 = vst.msk [vmem:[%s1430_s6 + $0x150] sm:$0xff] %vm832_vm2, %v724_v55  ;;  %v1129_v56 = vpop.f32.mrb[12].mxu0  ;;  %v1177_v57 = vpop.f32.mrb[12].mxu1 }
  0xff   : > { %v579_v58 = vadd.f32 %v1129_v56, %v1423_v7  ;;  %v739_v59 = vadd.f32 %v1177_v57, %v1423_v7  ;;  %v573_v60 = vpop.f32.mrb[13].mxu0  ;;  %v733_v61 = vpop.f32.mrb[13].mxu1 }
 0x100   : > { %v574_v62 = vadd.f32 %v1423_v7, %v573_v60  ;;  %v734_v63 = vadd.f32 %v1423_v7, %v733_v61 }
 0x101   : > { %846 = vst.msk [vmem:[%s1430_s6 + $0x68] sm:$0xff] %vm832_vm2, %v579_v58  ;;  %878 = vst.msk [vmem:[%s1430_s6 + $0x168] sm:$0xff] %vm832_vm2, %v739_v59 }
 0x102   : > { %845 = vst.msk [vmem:[%s1430_s6 + $0x60] sm:$0xff] %vm832_vm2, %v574_v62  ;;  %877 = vst.msk [vmem:[%s1430_s6 + $0x160] sm:$0xff] %vm832_vm2, %v734_v63  ;;  %v1132_v0 = vpop.f32.mrb[14].mxu0  ;;  %v1180_v1 = vpop.f32.mrb[14].mxu1 }
 0x103   : > { %v589_v2 = vadd.f32 %v1132_v0, %v1423_v7  ;;  %v749_v3 = vadd.f32 %v1180_v1, %v1423_v7  ;;  %v583_v4 = vpop.f32.mrb[15].mxu0  ;;  %v743_v5 = vpop.f32.mrb[15].mxu1 }
 0x104   : > { %v584_v6 = vadd.f32 %v1423_v7, %v583_v4  ;;  %v744_v8 = vadd.f32 %v1423_v7, %v743_v5 }
 0x105   : > { %848 = vst.msk [vmem:[%s1430_s6 + $0x78] sm:$0xff] %vm832_vm2, %v589_v2  ;;  %880 = vst.msk [vmem:[%s1430_s6 + $0x178] sm:$0xff] %vm832_vm2, %v749_v3 }
 0x106   : > { %847 = vst.msk [vmem:[%s1430_s6 + $0x70] sm:$0xff] %vm832_vm2, %v584_v6  ;;  %879 = vst.msk [vmem:[%s1430_s6 + $0x170] sm:$0xff] %vm832_vm2, %v744_v8  ;;  %v1135_v9 = vpop.f32.mrb[16].mxu0  ;;  %v1183_v10 = vpop.f32.mrb[16].mxu1 }
 0x107   : > { %v599_v11 = vadd.f32 %v1135_v9, %v1423_v7  ;;  %v759_v12 = vadd.f32 %v1183_v10, %v1423_v7  ;;  %v593_v13 = vpop.f32.mrb[17].mxu0  ;;  %v753_v14 = vpop.f32.mrb[17].mxu1 }
 0x108   : > { %v594_v15 = vadd.f32 %v1423_v7, %v593_v13  ;;  %v754_v16 = vadd.f32 %v1423_v7, %v753_v14 }
 0x109   : > { %850 = vst.msk [vmem:[%s1430_s6 + $0x88] sm:$0xff] %vm832_vm2, %v599_v11  ;;  %882 = vst.msk [vmem:[%s1430_s6 + $0x188] sm:$0xff] %vm832_vm2, %v759_v12 }
 0x10a   : > { %849 = vst.msk [vmem:[%s1430_s6 + $0x80] sm:$0xff] %vm832_vm2, %v594_v15  ;;  %881 = vst.msk [vmem:[%s1430_s6 + $0x180] sm:$0xff] %vm832_vm2, %v754_v16  ;;  %v1138_v17 = vpop.f32.mrb[18].mxu0  ;;  %v1186_v18 = vpop.f32.mrb[18].mxu1 }
 0x10b   : > { %v609_v19 = vadd.f32 %v1138_v17, %v1423_v7  ;;  %v769_v20 = vadd.f32 %v1186_v18, %v1423_v7  ;;  %v603_v21 = vpop.f32.mrb[19].mxu0  ;;  %v763_v22 = vpop.f32.mrb[19].mxu1 }
 0x10c   : > { %v604_v23 = vadd.f32 %v1423_v7, %v603_v21  ;;  %v764_v24 = vadd.f32 %v1423_v7, %v763_v22 }
 0x10d   : > { %852 = vst.msk [vmem:[%s1430_s6 + $0x98] sm:$0xff] %vm832_vm2, %v609_v19  ;;  %884 = vst.msk [vmem:[%s1430_s6 + $0x198] sm:$0xff] %vm832_vm2, %v769_v20 }
 0x10e   : > { %851 = vst.msk [vmem:[%s1430_s6 + $0x90] sm:$0xff] %vm832_vm2, %v604_v23  ;;  %883 = vst.msk [vmem:[%s1430_s6 + $0x190] sm:$0xff] %vm832_vm2, %v764_v24  ;;  %v1141_v25 = vpop.f32.mrb[20].mxu0  ;;  %v1189_v26 = vpop.f32.mrb[20].mxu1 }
 0x10f   : > { %v619_v27 = vadd.f32 %v1141_v25, %v1423_v7  ;;  %v779_v28 = vadd.f32 %v1189_v26, %v1423_v7  ;;  %v613_v29 = vpop.f32.mrb[21].mxu0  ;;  %v773_v30 = vpop.f32.mrb[21].mxu1 }
 0x110   : > { %v614_v31 = vadd.f32 %v1423_v7, %v613_v29  ;;  %v774_v32 = vadd.f32 %v1423_v7, %v773_v30 }
 0x111   : > { %854 = vst.msk [vmem:[%s1430_s6 + $0xa8] sm:$0xff] %vm832_vm2, %v619_v27  ;;  %886 = vst.msk [vmem:[%s1430_s6 + $0x1a8] sm:$0xff] %vm832_vm2, %v779_v28 }
 0x112   : > { %853 = vst.msk [vmem:[%s1430_s6 + $0xa0] sm:$0xff] %vm832_vm2, %v614_v31  ;;  %885 = vst.msk [vmem:[%s1430_s6 + $0x1a0] sm:$0xff] %vm832_vm2, %v774_v32  ;;  %v1144_v33 = vpop.f32.mrb[22].mxu0  ;;  %v1192_v34 = vpop.f32.mrb[22].mxu1 }
 0x113   : > { %v629_v35 = vadd.f32 %v1144_v33, %v1423_v7  ;;  %v789_v36 = vadd.f32 %v1192_v34, %v1423_v7  ;;  %v623_v37 = vpop.f32.mrb[23].mxu0  ;;  %v783_v38 = vpop.f32.mrb[23].mxu1 }
 0x114   : > { %v624_v39 = vadd.f32 %v1423_v7, %v623_v37  ;;  %v784_v40 = vadd.f32 %v1423_v7, %v783_v38 }
 0x115   : > { %856 = vst.msk [vmem:[%s1430_s6 + $0xb8] sm:$0xff] %vm832_vm2, %v629_v35  ;;  %888 = vst.msk [vmem:[%s1430_s6 + $0x1b8] sm:$0xff] %vm832_vm2, %v789_v36 }
 0x116   : > { %855 = vst.msk [vmem:[%s1430_s6 + $0xb0] sm:$0xff] %vm832_vm2, %v624_v39  ;;  %887 = vst.msk [vmem:[%s1430_s6 + $0x1b0] sm:$0xff] %vm832_vm2, %v784_v40  ;;  %v1147_v41 = vpop.f32.mrb[24].mxu0  ;;  %v1195_v42 = vpop.f32.mrb[24].mxu1 }
 0x117   : > { %v639_v43 = vadd.f32 %v1147_v41, %v1423_v7  ;;  %v799_v44 = vadd.f32 %v1195_v42, %v1423_v7  ;;  %v633_v45 = vpop.f32.mrb[25].mxu0  ;;  %v793_v46 = vpop.f32.mrb[25].mxu1 }
 0x118   : > { %v634_v47 = vadd.f32 %v1423_v7, %v633_v45  ;;  %v794_v48 = vadd.f32 %v1423_v7, %v793_v46 }
 0x119   : > { %858 = vst.msk [vmem:[%s1430_s6 + $0xc8] sm:$0xff] %vm832_vm2, %v639_v43  ;;  %890 = vst.msk [vmem:[%s1430_s6 + $0x1c8] sm:$0xff] %vm832_vm2, %v799_v44 }
 0x11a   : > { %857 = vst.msk [vmem:[%s1430_s6 + $0xc0] sm:$0xff] %vm832_vm2, %v634_v47  ;;  %889 = vst.msk [vmem:[%s1430_s6 + $0x1c0] sm:$0xff] %vm832_vm2, %v794_v48  ;;  %v1150_v49 = vpop.f32.mrb[26].mxu0  ;;  %v1198_v50 = vpop.f32.mrb[26].mxu1 }
 0x11b   : > { %v649_v51 = vadd.f32 %v1150_v49, %v1423_v7  ;;  %v809_v52 = vadd.f32 %v1198_v50, %v1423_v7  ;;  %v643_v53 = vpop.f32.mrb[27].mxu0  ;;  %v803_v54 = vpop.f32.mrb[27].mxu1 }
 0x11c   : > { %v644_v55 = vadd.f32 %v1423_v7, %v643_v53  ;;  %v804_v56 = vadd.f32 %v1423_v7, %v803_v54 }
 0x11d   : > { %860 = vst.msk [vmem:[%s1430_s6 + $0xd8] sm:$0xff] %vm832_vm2, %v649_v51  ;;  %892 = vst.msk [vmem:[%s1430_s6 + $0x1d8] sm:$0xff] %vm832_vm2, %v809_v52 }
 0x11e   : > { %859 = vst.msk [vmem:[%s1430_s6 + $0xd0] sm:$0xff] %vm832_vm2, %v644_v55  ;;  %891 = vst.msk [vmem:[%s1430_s6 + $0x1d0] sm:$0xff] %vm832_vm2, %v804_v56  ;;  %v1153_v57 = vpop.f32.mrb[28].mxu0  ;;  %v1201_v58 = vpop.f32.mrb[28].mxu1 }
 0x11f   : > { %v659_v59 = vadd.f32 %v1153_v57, %v1423_v7  ;;  %v819_v60 = vadd.f32 %v1201_v58, %v1423_v7  ;;  %v653_v61 = vpop.f32.mrb[29].mxu0  ;;  %v813_v62 = vpop.f32.mrb[29].mxu1 }
 0x120   : > { %v654_v63 = vadd.f32 %v1423_v7, %v653_v61  ;;  %v814_v0 = vadd.f32 %v1423_v7, %v813_v62 }
 0x121   : > { %862 = vst.msk [vmem:[%s1430_s6 + $0xe8] sm:$0xff] %vm832_vm2, %v659_v59  ;;  %894 = vst.msk [vmem:[%s1430_s6 + $0x1e8] sm:$0xff] %vm832_vm2, %v819_v60 }
 0x122   : > { %861 = vst.msk [vmem:[%s1430_s6 + $0xe0] sm:$0xff] %vm832_vm2, %v654_v63  ;;  %893 = vst.msk [vmem:[%s1430_s6 + $0x1e0] sm:$0xff] %vm832_vm2, %v814_v0  ;;  %v1156_v1 = vpop.f32.mrb[30].mxu0  ;;  %v1204_v2 = vpop.f32.mrb[30].mxu1 }
 0x123   : > { %v669_v3 = vadd.f32 %v1156_v1, %v1423_v7  ;;  %v829_v4 = vadd.f32 %v1204_v2, %v1423_v7  ;;  %v663_v5 = vpop.f32.mrb[31].mxu0  ;;  %v823_v6 = vpop.f32.mrb[31].mxu1 }
 0x124   : > { %v664_v8 = vadd.f32 %v1423_v7, %v663_v5  ;;  %v824_v9 = vadd.f32 %v1423_v7, %v823_v6 }
 0x125   : > { %864 = vst.msk [vmem:[%s1430_s6 + $0xf8] sm:$0xff] %vm832_vm2, %v669_v3  ;;  %896 = vst.msk [vmem:[%s1430_s6 + $0x1f8] sm:$0xff] %vm832_vm2, %v829_v4 }
 0x126   : > { %863 = vst.msk [vmem:[%s1430_s6 + $0xf0] sm:$0xff] %vm832_vm2, %v664_v8  ;;  %895 = vst.msk [vmem:[%s1430_s6 + $0x1f0] sm:$0xff] %vm832_vm2, %v824_v9 }
 0x127 PF: > { %s13_s12 = sadd.s32 1, %s1233_s12  }
 0x128   : > { %p10_p4 = scmp.ge.s32.totalorder %s13_s12, 4  }
 0x12a   :  { %12 = sbr.rel (!%p10_p4) target bundleno = 1 (0x1), region = 62 }

</bundles_post_ra>
